<compile_context>
chip_gen: v6e
topology: v6e:2x2x1
jax: 0.10.0
libtpu: 0.0.40
codegen_flags: <defaults>
</compile_context>

<pallas_src>
import functools

import numpy as np
import jax
import jax.numpy as jnp
from jax.experimental import pallas as pl
from jax.experimental.pallas import tpu as pltpu

# ---- model config (structure of SimpleMLPNetv1; sizes kept small) ----------
NUM_FREQ = 8                           # PosEncodingNeRF2D(num_frequencies=8)
IN_FEATURES = 2 + 2 * 2 * NUM_FREQ     # = 34 (PE output dim)
HIDDEN = 64                            # hidden_features (default 256, shrunk)
NUM_HIDDEN_LAYERS = 2                  # num_hidden_layers (default 3, shrunk)
OUT_FEATURES = 1
OMEGA = 30.0                           # Sine() activation: sin(30 * x)

# HIGHEST (multi-pass) only for the angle / first-layer matmuls, where the
# omega-amplified values (angles up to 128*pi) make bf16 rounding visible
# against the 5e-3 check.  Hidden/output layers run at DEFAULT precision:
# weights are O(0.3), activations |h| <= 1, so the error stays ~1e-4 at the
# output while the activation bf16-splitting VPU work disappears.
_dot_hi = functools.partial(jnp.dot, preferred_element_type=jnp.float32,
                            precision=jax.lax.Precision.HIGHEST)
_dot_lo = functools.partial(jnp.dot, preferred_element_type=jnp.float32,
                            precision=jax.lax.Precision.DEFAULT)


# ----------------------------- Pallas kernel --------------------------------
def _mlp_kernel(coords_ref, wxy_ref, wsin_ref, wcos_ref, b1_ref,
                wh_ref, bh_ref, wo_ref, bo_ref, out_ref):
    c = coords_ref[...]                                   # (2, TM), feature-major

    # Constant frequency matrix F (2*NF, 2): row r selects coordinate
    # (0 for rows 0..NF-1, 1 for rows NF..2NF-1) scaled by pi * 2**(r % NF).
    # Built from iota + integer ops (no extra input ref, no transcendentals).
    rows = jax.lax.broadcasted_iota(jnp.int32, (2 * NUM_FREQ, 2), 0)
    cols = jax.lax.broadcasted_iota(jnp.int32, (2 * NUM_FREQ, 2), 1)
    pow2 = jnp.left_shift(1, rows & (NUM_FREQ - 1)).astype(jnp.float32)
    coord_sel = jnp.where(rows < NUM_FREQ, 0, 1)
    F = jnp.where(cols == coord_sel, np.float32(np.pi) * pow2, jnp.float32(0.0))

    # PE angles on the MXU (replaces broadcast-multiplies + sublane concats).
    ang = _dot_hi(F, c)                                   # (2*NF, TM)

    # First BatchLinear + Sine. Omega is already folded into the weights and
    # bias by the wrapper, so no extra 30*x vmul is needed before the sine.
    z = (_dot_hi(wsin_ref[...], jnp.sin(ang))
         + _dot_hi(wcos_ref[...], jnp.cos(ang))
         + _dot_hi(wxy_ref[...], c)
         + b1_ref[...])
    h = jnp.sin(z)                                        # (HIDDEN, TM), lane-dense

    # Hidden BatchLinear + Sine layers (omega pre-folded): (H,H) @ (H,TM).
    for l in range(NUM_HIDDEN_LAYERS):
        h = jnp.sin(_dot_lo(wh_ref[l], h) + bh_ref[l])

    # Outermost linear layer (no activation): (OUT,H) @ (H,TM) -> (OUT, TM).
    out = _dot_lo(wo_ref[...], h) + bo_ref[...]
    out_ref[...] = out.astype(out_ref.dtype)              # lane-dense (1, TM) store


# ----------------------------- tiling helpers --------------------------------
def _round_up(x, m):
    return ((x + m - 1) // m) * m


def _cdiv(a, b):
    return -(-a // b)


def _choose_tile(P, requested=None):
    """Pick the point tile first; the caller pads P up to a multiple of it.

    Heuristic: tile as large as possible (cap 4096 lanes) while keeping at
    least 4 grid steps (>= 2 per v7x TensorCore with dimension_semantics=
    ("parallel",) and enough depth for BlockSpec double-buffering to hide the
    coords/output DMAs), preferring an even step count so the two v7x cores
    stay balanced. Single-TC v5e/v6e simply get fewer, larger steps.
    """
    if requested is not None:
        assert requested % 128 == 0
        return requested
    MIN_STEPS, CAP = 4, 4096
    p128 = _round_up(P, 128)
    if p128 <= MIN_STEPS * 128:
        return 128
    tile = min(CAP, _round_up(_cdiv(p128, MIN_STEPS), 128))
    steps = _cdiv(p128, tile)
    if steps > 1 and steps % 2 == 1:
        tile_even = _round_up(_cdiv(p128, steps + 1), 128)
        if _cdiv(p128, tile_even) % 2 == 0:
            tile = tile_even
    return tile


# ----------------------------- JAX wrapper -----------------------------------
def simple_mlp_forward(coords, params, tile_m=None):
    """coords: (B, N, 2) float32. Returns {'model_in', 'model_out'} like the torch module."""
    B, N, D = coords.shape
    assert D == 2
    P = B * N

    tile_m = _choose_tile(P, tile_m)
    p_pad = _round_up(P, tile_m)
    grid = (p_pad // tile_m,)

    # Feature-major: (2, P) with the point axis on lanes; zero-pad to a
    # multiple of the tile (padded points are finite and sliced off below).
    coords_fm = coords.reshape(P, 2).T.astype(jnp.float32)
    if p_pad != P:
        coords_fm = jnp.pad(coords_fm, ((0, 0), (0, p_pad - P)))

    # Fold omega=30 into every weight/bias that feeds a Sine activation
    # (one-time XLA work on tiny static tensors).
    W1 = params["w0"] * OMEGA                              # (HIDDEN, 34)
    wxy = W1[:, 0:2]                                       # [x, y] columns
    # Torch PE column order: [x, y, then per freq i: sin_x, cos_x, sin_y, cos_y].
    # Kernel angle row order: [x freqs 0..7, y freqs 0..7].
    wsin = jnp.concatenate([W1[:, 2::4], W1[:, 4::4]], axis=1)   # (H, 2*NF)
    wcos = jnp.concatenate([W1[:, 3::4], W1[:, 5::4]], axis=1)   # (H, 2*NF)
    b1 = (params["b0"] * OMEGA).reshape(HIDDEN, 1)

    wh = jnp.stack([params[f"wh{l}"] for l in range(NUM_HIDDEN_LAYERS)], axis=0) * OMEGA
    bh = jnp.stack([params[f"bh{l}"].reshape(HIDDEN, 1)
                    for l in range(NUM_HIDDEN_LAYERS)], axis=0) * OMEGA
    wo = params["wo"]                                      # (OUT, HIDDEN) — no omega
    bo = params["bo"].reshape(OUT_FEATURES, 1)

    const = lambda i: (0, 0)
    out_fm = pl.pallas_call(
        _mlp_kernel,
        out_shape=jax.ShapeDtypeStruct((OUT_FEATURES, p_pad), jnp.float32),
        grid_spec=pltpu.PrefetchScalarGridSpec(
            num_scalar_prefetch=0,
            grid=grid,
            in_specs=[
                pl.BlockSpec((2, tile_m), lambda i: (0, i)),                 # coords tile
                pl.BlockSpec((HIDDEN, 2), const),                            # W1 [x,y] cols (*30)
                pl.BlockSpec((HIDDEN, 2 * NUM_FREQ), const),                 # W1 sin cols (*30)
                pl.BlockSpec((HIDDEN, 2 * NUM_FREQ), const),                 # W1 cos cols (*30)
                pl.BlockSpec((HIDDEN, 1), const),                            # b1 (*30)
                pl.BlockSpec((NUM_HIDDEN_LAYERS, HIDDEN, HIDDEN), lambda i: (0, 0, 0)),
                pl.BlockSpec((NUM_HIDDEN_LAYERS, HIDDEN, 1), lambda i: (0, 0, 0)),
                pl.BlockSpec((OUT_FEATURES, HIDDEN), const),                 # W_out
                pl.BlockSpec((OUT_FEATURES, 1), const),                      # b_out
            ],
            out_specs=pl.BlockSpec((OUT_FEATURES, tile_m), lambda i: (0, i)),
        ),
        compiler_params=pltpu.CompilerParams(dimension_semantics=("parallel",)),
    )(coords_fm, wxy, wsin, wcos, b1, wh, bh, wo, bo)

    model_out = out_fm[:, :P].T.reshape(B, N, OUT_FEATURES)
    # TODO(synk): return_grad=True path (dy/dx via autograd) is not implemented.
    return {"model_in": coords, "model_out": model_out}


# ------------------------ deterministic parameter init -----------------------
def init_params(key):
    keys = jax.random.split(key, 2 * (NUM_HIDDEN_LAYERS + 2))
    it = iter(keys)
    params = {}
    # first layer: first_layer_sine_init for weight, nn.Linear default for bias
    params["w0"] = jax.random.uniform(next(it), (HIDDEN, IN_FEATURES), jnp.float32,
                                      -1.0 / IN_FEATURES, 1.0 / IN_FEATURES)
    params["b0"] = jax.random.uniform(next(it), (HIDDEN,), jnp.float32,
                                      -1.0 / np.sqrt(IN_FEATURES), 1.0 / np.sqrt(IN_FEATURES))
    wb = np.sqrt(6.0 / HIDDEN) / OMEGA       # sine_init bound
    bb = 1.0 / np.sqrt(HIDDEN)               # nn.Linear default bias bound
    for l in range(NUM_HIDDEN_LAYERS):
        params[f"wh{l}"] = jax.random.uniform(next(it), (HIDDEN, HIDDEN), jnp.float32, -wb, wb)
        params[f"bh{l}"] = jax.random.uniform(next(it), (HIDDEN,), jnp.float32, -bb, bb)
    params["wo"] = jax.random.uniform(next(it), (OUT_FEATURES, HIDDEN), jnp.float32, -wb, wb)
    params["bo"] = jax.random.uniform(next(it), (OUT_FEATURES,), jnp.float32, -bb, bb)
    return params


# --------------------- pure-JAX reference (torch semantics) ------------------
def reference_forward(coords, params):
    c = coords.reshape(coords.shape[0], -1, 2)
    pe = [c]
    for i in range(NUM_FREQ):
        for j in range(2):
            cc = c[..., j]
            pe.append(jnp.sin((2.0 ** i) * np.pi * cc)[..., None])
            pe.append(jnp.cos((2.0 ** i) * np.pi * cc)[..., None])
    h = jnp.concatenate(pe, axis=-1)                      # (B, N, 34)
    h = jnp.sin(OMEGA * (jnp.einsum("bnd,hd->bnh", h, params["w0"],
                                    precision=jax.lax.Precision.HIGHEST) + params["b0"]))
    for l in range(NUM_HIDDEN_LAYERS):
        h = jnp.sin(OMEGA * (jnp.einsum("bnd,hd->bnh", h, params[f"wh{l}"],
                                        precision=jax.lax.Precision.HIGHEST) + params[f"bh{l}"]))
    out = jnp.einsum("bnd,od->bno", h, params["wo"],
                     precision=jax.lax.Precision.HIGHEST) + params["bo"]
    return out


if __name__ == "__main__":
    key = jax.random.PRNGKey(0)
    k_coords, k_params = jax.random.split(key)
    params = init_params(k_params)

    # Primary check: 512 points -> 4 grid steps of 128.
    B, N = 2, 256
    coords = jax.random.uniform(k_coords, (B, N, 2), jnp.float32, -1.0, 1.0)
    result = simple_mlp_forward(coords, params)
    model_out = jax.block_until_ready(result["model_out"])
    assert model_out.shape == (B, N, OUT_FEATURES)
    ref = jax.block_until_ready(reference_forward(coords, params))
    np.testing.assert_allclose(np.asarray(model_out), np.asarray(ref), rtol=5e-3, atol=5e-3)

    # Secondary check: awkward point count exercises the pad-to-tile path.
    B2, N2 = 1, 300
    coords2 = jax.random.uniform(jax.random.PRNGKey(7), (B2, N2, 2), jnp.float32, -1.0, 1.0)
    out2 = jax.block_until_ready(simple_mlp_forward(coords2, params)["model_out"])
    ref2 = jax.block_until_ready(reference_forward(coords2, params))
    np.testing.assert_allclose(np.asarray(out2), np.asarray(ref2), rtol=5e-3, atol=5e-3)

    print("KERNEL_OK")
</pallas_src>

<mosaic_0001>
module attributes {stable_mosaic.version = 11 : i64} {
  func.func @_mlp_kernel(%arg0: i32, %arg1: memref<2x128xf32, #tpu.memory_space<vmem>>, %arg2: memref<64x2xf32, #tpu.memory_space<vmem>>, %arg3: memref<64x16xf32, #tpu.memory_space<vmem>>, %arg4: memref<64x16xf32, #tpu.memory_space<vmem>>, %arg5: memref<64x1xf32, #tpu.memory_space<vmem>>, %arg6: memref<2x64x64xf32, #tpu.memory_space<vmem>>, %arg7: memref<2x64x1xf32, #tpu.memory_space<vmem>>, %arg8: memref<1x64xf32, #tpu.memory_space<vmem>>, %arg9: memref<1x1xf32, #tpu.memory_space<vmem>>, %arg10: memref<1x128xf32, #tpu.memory_space<vmem>>) attributes {dimension_semantics = [#tpu.dimension_semantics<parallel>], iteration_bounds = array<i64: 4>, scalar_prefetch = 0 : i64, scratch_operands = 0 : i64, tpu.core_type = #tpu.core_type<tc>, window_params = [{transform_indices = @transform_0, window_bounds = array<i64: 2, 128>}, {pipeline_mode = #tpu.pipeline_mode<synchronous>, transform_indices = @transform_1, window_bounds = array<i64: 64, 2>}, {pipeline_mode = #tpu.pipeline_mode<synchronous>, transform_indices = @transform_2, window_bounds = array<i64: 64, 16>}, {pipeline_mode = #tpu.pipeline_mode<synchronous>, transform_indices = @transform_3, window_bounds = array<i64: 64, 16>}, {pipeline_mode = #tpu.pipeline_mode<synchronous>, transform_indices = @transform_4, window_bounds = array<i64: 64, 1>}, {pipeline_mode = #tpu.pipeline_mode<synchronous>, transform_indices = @transform_5, window_bounds = array<i64: 2, 64, 64>}, {pipeline_mode = #tpu.pipeline_mode<synchronous>, transform_indices = @transform_6, window_bounds = array<i64: 2, 64, 1>}, {pipeline_mode = #tpu.pipeline_mode<synchronous>, transform_indices = @transform_7, window_bounds = array<i64: 1, 64>}, {pipeline_mode = #tpu.pipeline_mode<synchronous>, transform_indices = @transform_8, window_bounds = array<i64: 1, 1>}, {transform_indices = @transform_9, window_bounds = array<i64: 1, 128>}]} {
    %c0 = arith.constant 0 : index
    %c0_0 = arith.constant 0 : index
    %0 = vector.load %arg1[%c0, %c0_0] : memref<2x128xf32, #tpu.memory_space<vmem>>, vector<2x128xf32>
    %1 = tpu.iota {dimensions = array<i32: 0>} : vector<16x2xi32>
    %2 = tpu.iota {dimensions = array<i32: 1>} : vector<16x2xi32>
    %c7_i32 = arith.constant 7 : i32
    %3 = vector.broadcast %c7_i32 : i32 to vector<16x2xi32>
    %4 = arith.andi %1, %3 : vector<16x2xi32>
    %c1_i32 = arith.constant 1 : i32
    %5 = vector.broadcast %c1_i32 : i32 to vector<16x2xi32>
    %6 = arith.shli %5, %4 : vector<16x2xi32>
    %7 = arith.sitofp %6 : vector<16x2xi32> to vector<16x2xf32>
    %c8_i32 = arith.constant 8 : i32
    %8 = vector.broadcast %c8_i32 : i32 to vector<16x2xi32>
    %9 = arith.cmpi slt, %1, %8 : vector<16x2xi32>
    %c0_i32 = arith.constant 0 : i32
    %c1_i32_1 = arith.constant 1 : i32
    %10 = vector.broadcast %c0_i32 : i32 to vector<16x2xi32>
    %11 = vector.broadcast %c1_i32_1 : i32 to vector<16x2xi32>
    %12 = arith.select %9, %10, %11 : vector<16x2xi1>, vector<16x2xi32>
    %13 = arith.cmpi eq, %2, %12 : vector<16x2xi32>
    %cst = arith.constant 3.14159274 : f32
    %14 = vector.broadcast %cst : f32 to vector<16x2xf32>
    %15 = arith.mulf %14, %7 : vector<16x2xf32>
    %cst_2 = arith.constant 0.000000e+00 : f32
    %16 = vector.broadcast %cst_2 : f32 to vector<16x2xf32>
    %17 = arith.select %13, %15, %16 : vector<16x2xi1>, vector<16x2xf32>
    %cst_3 = arith.constant dense<0.000000e+00> : vector<16x128xf32>
    %18 = tpu.matmul %17, %0, %cst_3 {dimension_numbers = #tpu.dot_dimension_numbers<[1], [0], [0], [1], [0, 0, 1, 1], [], []>, precision = #tpu.contract_precision<fp32>} : vector<16x2xf32>, vector<2x128xf32>, vector<16x128xf32> -> vector<16x128xf32>
    %c0_4 = arith.constant 0 : index
    %c0_5 = arith.constant 0 : index
    %19 = vector.load %arg3[%c0_4, %c0_5] : memref<64x16xf32, #tpu.memory_space<vmem>>, vector<64x16xf32>
    %20 = math.sin %18 : vector<16x128xf32>
    %cst_6 = arith.constant dense<0.000000e+00> : vector<64x128xf32>
    %21 = tpu.matmul %19, %20, %cst_6 {dimension_numbers = #tpu.dot_dimension_numbers<[1], [0], [0], [1], [0, 0, 1, 1], [], []>, precision = #tpu.contract_precision<fp32>} : vector<64x16xf32>, vector<16x128xf32>, vector<64x128xf32> -> vector<64x128xf32>
    %c0_7 = arith.constant 0 : index
    %c0_8 = arith.constant 0 : index
    %22 = vector.load %arg4[%c0_7, %c0_8] : memref<64x16xf32, #tpu.memory_space<vmem>>, vector<64x16xf32>
    %23 = math.cos %18 : vector<16x128xf32>
    %cst_9 = arith.constant dense<0.000000e+00> : vector<64x128xf32>
    %24 = tpu.matmul %22, %23, %cst_9 {dimension_numbers = #tpu.dot_dimension_numbers<[1], [0], [0], [1], [0, 0, 1, 1], [], []>, precision = #tpu.contract_precision<fp32>} : vector<64x16xf32>, vector<16x128xf32>, vector<64x128xf32> -> vector<64x128xf32>
    %25 = arith.addf %21, %24 : vector<64x128xf32>
    %c0_10 = arith.constant 0 : index
    %c0_11 = arith.constant 0 : index
    %26 = vector.load %arg2[%c0_10, %c0_11] : memref<64x2xf32, #tpu.memory_space<vmem>>, vector<64x2xf32>
    %cst_12 = arith.constant dense<0.000000e+00> : vector<64x128xf32>
    %27 = tpu.matmul %26, %0, %cst_12 {dimension_numbers = #tpu.dot_dimension_numbers<[1], [0], [0], [1], [0, 0, 1, 1], [], []>, precision = #tpu.contract_precision<fp32>} : vector<64x2xf32>, vector<2x128xf32>, vector<64x128xf32> -> vector<64x128xf32>
    %28 = arith.addf %25, %27 : vector<64x128xf32>
    %c0_13 = arith.constant 0 : index
    %c0_14 = arith.constant 0 : index
    %29 = vector.load %arg5[%c0_13, %c0_14] : memref<64x1xf32, #tpu.memory_space<vmem>>, vector<64x1xf32>
    %30 = vector.broadcast %29 : vector<64x1xf32> to vector<64x128xf32>
    %31 = arith.addf %28, %30 : vector<64x128xf32>
    %32 = math.sin %31 : vector<64x128xf32>
    %c0_15 = arith.constant 0 : index
    %c0_16 = arith.constant 0 : index
    %c0_17 = arith.constant 0 : index
    %33 = vector.load %arg6[%c0_15, %c0_16, %c0_17] : memref<2x64x64xf32, #tpu.memory_space<vmem>>, vector<1x64x64xf32>
    %34 = vector.shape_cast %33 : vector<1x64x64xf32> to vector<64x64xf32>
    %cst_18 = arith.constant dense<0.000000e+00> : vector<64x128xf32>
    %35 = tpu.matmul %34, %32, %cst_18 {dimension_numbers = #tpu.dot_dimension_numbers<[1], [0], [0], [1], [0, 0, 1, 1], [], []>} : vector<64x64xf32>, vector<64x128xf32>, vector<64x128xf32> -> vector<64x128xf32>
    %c0_19 = arith.constant 0 : index
    %c0_20 = arith.constant 0 : index
    %c0_21 = arith.constant 0 : index
    %36 = vector.load %arg7[%c0_19, %c0_20, %c0_21] : memref<2x64x1xf32, #tpu.memory_space<vmem>>, vector<1x64x1xf32>
    %37 = vector.shape_cast %36 : vector<1x64x1xf32> to vector<64x1xf32>
    %38 = vector.broadcast %37 : vector<64x1xf32> to vector<64x128xf32>
    %39 = arith.addf %35, %38 : vector<64x128xf32>
    %40 = math.sin %39 : vector<64x128xf32>
    %c1 = arith.constant 1 : index
    %c0_22 = arith.constant 0 : index
    %c0_23 = arith.constant 0 : index
    %41 = vector.load %arg6[%c1, %c0_22, %c0_23] : memref<2x64x64xf32, #tpu.memory_space<vmem>>, vector<1x64x64xf32>
    %42 = vector.shape_cast %41 : vector<1x64x64xf32> to vector<64x64xf32>
    %cst_24 = arith.constant dense<0.000000e+00> : vector<64x128xf32>
    %43 = tpu.matmul %42, %40, %cst_24 {dimension_numbers = #tpu.dot_dimension_numbers<[1], [0], [0], [1], [0, 0, 1, 1], [], []>} : vector<64x64xf32>, vector<64x128xf32>, vector<64x128xf32> -> vector<64x128xf32>
    %c1_25 = arith.constant 1 : index
    %c0_26 = arith.constant 0 : index
    %c0_27 = arith.constant 0 : index
    %44 = vector.load %arg7[%c1_25, %c0_26, %c0_27] : memref<2x64x1xf32, #tpu.memory_space<vmem>>, vector<1x64x1xf32>
    %45 = vector.shape_cast %44 : vector<1x64x1xf32> to vector<64x1xf32>
    %46 = vector.broadcast %45 : vector<64x1xf32> to vector<64x128xf32>
    %47 = arith.addf %43, %46 : vector<64x128xf32>
    %48 = math.sin %47 : vector<64x128xf32>
    %c0_28 = arith.constant 0 : index
    %c0_29 = arith.constant 0 : index
    %49 = vector.load %arg8[%c0_28, %c0_29] : memref<1x64xf32, #tpu.memory_space<vmem>>, vector<1x64xf32>
    %cst_30 = arith.constant dense<0.000000e+00> : vector<1x128xf32>
    %50 = tpu.matmul %49, %48, %cst_30 {dimension_numbers = #tpu.dot_dimension_numbers<[1], [0], [0], [1], [0, 0, 1, 1], [], []>} : vector<1x64xf32>, vector<64x128xf32>, vector<1x128xf32> -> vector<1x128xf32>
    %c0_31 = arith.constant 0 : index
    %c0_32 = arith.constant 0 : index
    %51 = vector.load %arg9[%c0_31, %c0_32] : memref<1x1xf32, #tpu.memory_space<vmem>>, vector<1x1xf32>
    %52 = vector.broadcast %51 : vector<1x1xf32> to vector<1x128xf32>
    %53 = arith.addf %50, %52 : vector<1x128xf32>
    %c0_33 = arith.constant 0 : index
    %c0_34 = arith.constant 0 : index
    %54 = vector.load %arg10[%c0_33, %c0_34] : memref<1x128xf32, #tpu.memory_space<vmem>>, vector<1x128xf32>
    tpu.vector_store %arg10[%c0_33, %c0_34], %53 {strides = array<i32>} : memref<1x128xf32, #tpu.memory_space<vmem>>, vector<1x128xf32>,
    return
  }
  func.func @transform_0(%arg0: i32) -> (i32, i32) {
    %c0_i32 = arith.constant 0 : i32
    %c0_i32_0 = arith.constant 0 : i32
    return %c0_i32, %arg0 : i32, i32
  }
  func.func @transform_1(%arg0: i32) -> (i32, i32) {
    %c0_i32 = arith.constant 0 : i32
    %c0_i32_0 = arith.constant 0 : i32
    %c0_i32_1 = arith.constant 0 : i32
    return %c0_i32, %c0_i32_0 : i32, i32
  }
  func.func @transform_2(%arg0: i32) -> (i32, i32) {
    %c0_i32 = arith.constant 0 : i32
    %c0_i32_0 = arith.constant 0 : i32
    %c0_i32_1 = arith.constant 0 : i32
    return %c0_i32, %c0_i32_0 : i32, i32
  }
  func.func @transform_3(%arg0: i32) -> (i32, i32) {
    %c0_i32 = arith.constant 0 : i32
    %c0_i32_0 = arith.constant 0 : i32
    %c0_i32_1 = arith.constant 0 : i32
    return %c0_i32, %c0_i32_0 : i32, i32
  }
  func.func @transform_4(%arg0: i32) -> (i32, i32) {
    %c0_i32 = arith.constant 0 : i32
    %c0_i32_0 = arith.constant 0 : i32
    %c0_i32_1 = arith.constant 0 : i32
    return %c0_i32, %c0_i32_0 : i32, i32
  }
  func.func @transform_5(%arg0: i32) -> (i32, i32, i32) {
    %c0_i32 = arith.constant 0 : i32
    %c0_i32_0 = arith.constant 0 : i32
    %c0_i32_1 = arith.constant 0 : i32
    %c0_i32_2 = arith.constant 0 : i32
    return %c0_i32, %c0_i32_0, %c0_i32_1 : i32, i32, i32
  }
  func.func @transform_6(%arg0: i32) -> (i32, i32, i32) {
    %c0_i32 = arith.constant 0 : i32
    %c0_i32_0 = arith.constant 0 : i32
    %c0_i32_1 = arith.constant 0 : i32
    %c0_i32_2 = arith.constant 0 : i32
    return %c0_i32, %c0_i32_0, %c0_i32_1 : i32, i32, i32
  }
  func.func @transform_7(%arg0: i32) -> (i32, i32) {
    %c0_i32 = arith.constant 0 : i32
    %c0_i32_0 = arith.constant 0 : i32
    %c0_i32_1 = arith.constant 0 : i32
    return %c0_i32, %c0_i32_0 : i32, i32
  }
  func.func @transform_8(%arg0: i32) -> (i32, i32) {
    %c0_i32 = arith.constant 0 : i32
    %c0_i32_0 = arith.constant 0 : i32
    %c0_i32_1 = arith.constant 0 : i32
    return %c0_i32, %c0_i32_0 : i32, i32
  }
  func.func @transform_9(%arg0: i32) -> (i32, i32) {
    %c0_i32 = arith.constant 0 : i32
    %c0_i32_0 = arith.constant 0 : i32
    return %c0_i32, %arg0 : i32, i32
  }
}

</mosaic_0001>

<bundles_post_ra>
// kernel: tpu_custom_call.1
= control target key start
LH: loop header
LB: loop body
LE: loop exit
PB: predicated region body
PF: predicated region fallthrough
CT: control target
= control target key end

     0   :  { %s11154_s0 = inlined_call_operand.vmem [shape: f32[2,512], index: 0, kind: input, shape index: {}]   ;;  %s11155_s1 = inlined_call_operand.vmem [shape: f32[64,2], index: 1, kind: input, shape index: {}]   ;;  %s11156_s2 = inlined_call_operand.vmem [shape: f32[64,16], index: 2, kind: input, shape index: {}]   ;;  %s11157_s3 = inlined_call_operand.vmem [shape: f32[64,16], index: 3, kind: input, shape index: {}]   ;;  %s11158_s4 = inlined_call_operand.vmem [shape: f32[64,1], index: 4, kind: input, shape index: {}]   ;;  %s11159_s5 = inlined_call_operand.vmem [shape: f32[2,64,64], index: 5, kind: input, shape index: {}]   ;;  %s11160_s6 = inlined_call_operand.vmem [shape: f32[2,64,1], index: 6, kind: input, shape index: {}]   ;;  %s11161_s7 = inlined_call_operand.vmem [shape: f32[1,64], index: 7, kind: input, shape index: {}]   ;;  %s11162_s8 = inlined_call_operand.<no memory space> [shape: f32[1,1], index: 8, kind: input, shape index: {}]   ;;  %s11163_s9 = inlined_call_operand.hbm [shape: f32[1,512], index: 9, kind: output, shape index: {}]  }
   0x1   :  { %v14_v0 = vstv %s11162_s8 }
   0x2   :  { %15 = vst [vmem:[#allocation2] sm:$0x1] %v14_v0 }
   0x3   :  { %16 = vsyncpa [#allocation4], 0 }
   0x4   :  { %18 = vsyncpa [#allocation4 + $0x1], 0  ;;  %s7867_s11 = smov 0   ;;  %s7869_s12 = smov 0  }
   0x5   :  { %s7871_s13 = smov 0   ;;  %s7873_s14 = smov 0  }
   0x6 LB: > { %s7888_s8 = sadd.s32 4294967295, %s7801_s14   ;;  %s6715_s15 = sadd.s32 4294967294, %s7801_s14   ;;  %s7801_s14 = sphi %s7873_s14, %s11316_s14   ;;  %s7797_s13 = sphi %s7871_s13, %s11315_s13   ;;  %s7793_s12 = sphi %s7869_s12, %s11314_s12   ;;  %s7789_s11 = sphi %s7867_s11, %s11313_s11  }
   0x7   : > { %s7892_s16 = sadd.s32 1, %s7801_s14   ;;  %s225_s17 = sadd.s32 1, %s7797_s13 }
   0x8   : > { %s222_s18 = ssub.s32 %s7801_s14, %s7892_s16  ;;  %p235_p0 = scmp.ne.s32.totalorder %s7797_s13, %s7793_s12 }
   0x9   : > { %p223_p1 = scmp.eq.s32.totalorder %s222_s18, 0  ;;  %p236_p2 = scmp.eq.s32.totalorder %s7888_s8, 3 }
   0xa   : > { %p241_p3 = scmp.ne.s32.totalorder %s7793_s12, %s7789_s11  ;;  %p242_p4 = scmp.eq.s32.totalorder %s6715_s15, 3 }
   0xb   : > { %s7903_s19 = scalar_select %p223_p1, %s7797_s13, %s225_s17  }
   0xc   : > { %p7905_p5 = por %p236_p2, %p235_p0  ;;  %p7909_p6 = por %p242_p4, %p241_p3 }
   0xd   : > { %p6718_p7 = scmp.ge.s32.totalorder %s7801_s14, 1  ;;  %p291_p8 = scmp.lt.s32.totalorder %s7801_s14, 5 }
   0xf   : > { %p292_p9 = pnand %p6718_p7, %p291_p8 }
  0x11   : > { %295 = sbr.rel (%p292_p9) target bundleno = 1953 (0x7a1), region = 56 }
  0x16   : > { %p325_p10 = scmp.lt.s32.totalorder %s7888_s8, 3  ;;  %v330_v1 = vlaneseq  ;;  %vm358_vm0 = vcmask 1041408   ;;  %v7803_v8 = vmov 1   ;;  %vm351_vm2 = vcmask 15360   ;;  %v1067_v35 = vld [vmem:[%s11157_s3] sm:$0xff]  ;;  %s323_s27 = sand.u32 1, %s7793_s12  }
  0x17   : > { %vm1281_vm4 = vcmask 130048   ;;  %s6865_s28 = sshll.u32 %s7888_s8, 4  ;;  %s324_s29 = scalar_lea.vmem [#allocation3], %s323_s27 }
  0x18   : > { %s326_s22 = scalar_select %p325_p10, %s7888_s8, 3  ;;  %v7917_v2 = vshrl.u32 %v330_v1, 7  ;;  %v334_v5 = vand.u32 127, %v330_v1  ;;  %v1283_v36 = vsel %vm1281_vm4, %v1067_v35, 0 }
  0x19   : > { %v7954_v37 = vand.u32 4294901760, %v1283_v36  ;;  %s6660_s30 = sshll.u32 %s324_s29, 4  ;;  %s11119_s17 = scalar_lea.hbm %s11163_s9, %s6865_s28  ;;  %s6661_s30 = int_to_ptr.vmem [resolvable:$true] %s6660_s30 }
  0x1a   : > { %11215 = vst [vmem:[#allocation6_spill] sm:$0xff] %v7917_v2  ;;  %s6719_s23 = sshll.u32 %s326_s22, 1  ;;  %v332_v3 = vadd.s32 8, %v7917_v2  ;;  %v335_v4 = vand.u32 7, %v7917_v2  ;;  %vm345_vm1 = vcmp.eq.s32.totalorder %v334_v5, 0  ;;  %vm346_vm3 = vcmp.eq.s32.totalorder %v334_v5, 1 }
  0x1b   : > { %s328_s26 = scalar_lea.vmem %s11154_s0, %s6719_s23  ;;  %v7957_v38 = vsub.f32 %v1283_v36, %v7954_v37  ;;  %s6648_s18 = scalar_lea.sflag [#allocation4], %s323_s27 }
  0x1c   : > { %v329_v6 = vld [vmem:[%s328_s26] sm:$0x3]  ;;  %v336_v7 = vand.u32 7, %v332_v3  ;;  %v337_v9 = vshll.u32 %v7803_v8, %v335_v4  ;;  %s7741_s22 = scalar_lea.vmem %s6661_s30, 16  ;;  %s7813_s8 = smov [#allocation3]  }
  0x1d   : > { %v360_v10 = vsel %vm358_vm0, %v329_v6, 0  ;;  %v1375_v39 = vand.u32 4294901760, %v7957_v38  ;;  %p7742_p11 = scmp.ne.s32.totalorder %s6661_s30, %s7741_s22  ;;  %s7745_s23 = sshll.u32 %s7813_s8, 4  ;;  %s7746_s23 = int_to_ptr.vmem [resolvable:$false] %s7745_s23 }
  0x1e   : > { %v7924_v11 = vand.u32 4294901760, %v360_v10  ;;  %v338_v12 = vshll.u32 %v7803_v8, %v336_v7  ;;  %v339_v13 = vcvt.s32.f32 %v337_v9  ;;  %s7747_s24 = scalar_lea.vmem %s7746_s23, 32  ;;  %p7748_p0 = scmp.lt.s32.totalorder %s6661_s30, %s7746_s23 }
  0x1f   : > { %v1376_v40 = vsub.f32 %v7957_v38, %v1375_v39  ;;  %p7743_p12 = pnand %p7742_p11, %p7905_p5  ;;  %p7749_p1 = scmp.lt.s32.totalorder %s7747_s24, %s7741_s22 }
  0x20   : > { %7101 = vmatprep.subr.mxu0 %v7924_v11  ;;  %v7928_v14 = vsub.f32 %v360_v10, %v7924_v11  ;;  %v340_v15 = vcvt.s32.f32 %v338_v12  ;;  %v347_v16 = vmul.f32 3.1415927, %v339_v13 }
  0x21   : > { %7102 = vmatpush3.msra.mxu0 %v7924_v11  ;;  %v1377_v41 = vand.u32 4294901760, %v1376_v40  ;;  %p7744_p13 = pneg %p7743_p12  ;;  %p7750_p2 = por %p7749_p1, %p7748_p0 }
  0x22   : > { %v7932_v17 = vand.u32 4294901760, %v7928_v14  ;;  %v349_v18 = vsel %vm345_vm1, %v347_v16, 0.0  ;;  %v348_v19 = vmul.f32 3.1415927, %v340_v15  ;;  %7111 = vmatprep.subr.mxu0 %v7928_v14 }
  0x23   : > { %v353_v20 = vsel %vm351_vm2, %v349_v18, 0  ;;  %p7751_p3 = pnand %p7750_p2, %p7744_p13 }
  0x24   : > { %v482_v21 = vsub.f32 %v7928_v14, %v7932_v17  ;;  %v428_v22 = vand.u32 4294901760, %v353_v20  ;;  %v350_v23 = vsel %vm346_vm3, %v348_v19, 0.0 }
  0x25   : > { %v356_v24 = vsel %vm351_vm2, %v350_v23, 0 }
  0x26   : > { %v7939_v25 = vand.u32 4294901760, %v482_v21  ;;  %v429_v26 = vsub.f32 %v353_v20, %v428_v22  ;;  %7108 = vmatprep.mubr.f32.mxu1 %v428_v22  ;;  %v438_v27 = vand.u32 4294901760, %v356_v24 }
  0x28   : > { %7106 = vmatprep.subr.mxu1 %v7939_v25  ;;  %v430_v28 = vand.u32 4294901760, %v429_v26  ;;  %v439_v29 = vsub.f32 %v356_v24, %v438_v27 }
  0x29   : > { %7107 = vmatpush3.msra.mxu1 %v7939_v25 }
  0x2a   : > { %v431_v30 = vsub.f32 %v429_v26, %v430_v28  ;;  %v440_v31 = vand.u32 4294901760, %v439_v29  ;;  %7109 = vmatmul.mubr.f32.vlgmr.msra.gmra.mxu1 %v438_v27  ;;  %7116 = vmatprep.subr.mxu1 %v7924_v11 }
  0x2b   : > { %7117 = vmatpush3.msra.mxu1 %v7924_v11  ;;  %7118 = vmatprep.mubr.f32.mxu1 %v430_v28  ;;  %v11175_v28 = vmov 2131351028  }
  0x2c   : > { %v432_v32 = vand.u32 4294901760, %v431_v30  ;;  %v441_v33 = vsub.f32 %v439_v29, %v440_v31  ;;  %7126 = vmatprep.subr.mxu1 %v7924_v11  ;;  %v11173_v30 = vmov 2102212464  }
  0x2e   : > { %7103 = vmatprep.mubr.f32.mxu0 %v432_v32  ;;  %v442_v34 = vand.u32 4294901760, %v441_v33  ;;  %7119 = vmatmul.mubr.f32.vlgmr.msra.gmra.mxu1 %v440_v31  ;;  %v11195_v32 = vmov 920167782  }
  0x2f   : > { %7127 = vmatpush3.msra.mxu1 %v7924_v11  ;;  %7128 = vmatprep.mubr.f32.mxu1 %v428_v22 }
  0x30   : > { %7104 = vmatmul.mubr.f32.vlgmr.msra.gmra.mxu0 %v442_v34 }
  0x31   : > { %7112 = vmatpush3.msra.mxu0 %v7928_v14  ;;  %7113 = vmatprep.mubr.f32.mxu0 %v429_v26  ;;  %v11177_v26 = vmov 2475754826  }
  0x32   : > { %7121 = vmatprep.subr.mxu0 %v7932_v17  ;;  %7129 = vmatmul.mubr.f32.vlgmr.msra.gmra.mxu1 %v438_v27 }
  0x33   : > { %7151 = vmatprep.mubr.f32.mxu1 %v7954_v37 }
  0x34   : > { %7114 = vmatmul.mubr.f32.vlgmr.msra.gmra.mxu0 %v439_v29 }
  0x35   : > { %7122 = vmatpush3.msra.mxu0 %v7932_v17  ;;  %7123 = vmatprep.mubr.f32.mxu0 %v428_v22  ;;  %v11180_v22 = vmov 683565275  }
  0x38   : > { %7124 = vmatmul.mubr.f32.vlgmr.msra.gmra.mxu0 %v438_v27 }
  0x39   : > { %7135 = vmatprep.mubr.f32.mxu0 %v1377_v41 }
  0xea   : > { %v7110_v42 = vpop.f32.mrf.mxu1 }
  0xec   : > { %v520_v43 = vpop.f32.mrf.mxu1 }
  0xee   : > { %v7120_v45 = vpop.f32.mrf.mxu1 }
  0xf0   : > { %v7105_v44 = vpop.f32.mrf.mxu0  ;;  %v681_v51 = vpop.f32.mrf.mxu1 }
  0xf1   : > { %v527_v47 = vadd.f32 %v7110_v42, %v7105_v44  ;;  %v11165_v42 = vmov 1326507024  }
  0xf2   : > { %v434_v46 = vpop.f32.mrf.mxu0  ;;  %v7130_v58 = vpop.f32.mrf.mxu1 }
  0xf3   : > { %v521_v49 = vadd.f32 %v520_v43, %v434_v46 }
  0xf4   : > { %v7115_v48 = vpop.f32.mrf.mxu0  ;;  %v841_v0 = vpop.f32.mrf.mxu1 }
  0xf5   : > { %v608_v50 = vadd.f32 %v7115_v48, %v527_v47 }
  0xf6   : > { %v600_v52 = vpop.f32.mrf.mxu0 }
  0xf7   : > { %v690_v53 = vadd.f32 %v7120_v45, %v608_v50  ;;  %v601_v54 = vadd.f32 %v600_v52, %v521_v49 }
  0xf8   : > { %v7125_v55 = vpop.f32.mrf.mxu0 }
  0xf9   : > { %v682_v56 = vadd.f32 %v681_v51, %v601_v54  ;;  %v770_v57 = vadd.f32 %v7125_v55, %v690_v53 }
  0xfa   : > { %v763_v59 = vpop.f32.mrf.mxu0 }
  0xfb   : > { %v7964_v60 = vadd.f32 %v7130_v58, %v770_v57  ;;  %v764_v61 = vadd.f32 %v763_v59, %v682_v56 }
  0xfd   : > { %v963_v62 = vand.u32 2147483647, %v7964_v60  ;;  %v966_v63 = vand.u32 2139095040, %v7964_v60  ;;  %v7968_v1 = vadd.f32 %v841_v0, %v764_v61 }
  0xff   : > { %v967_v3 = vshrl.u32 %v966_v63, 23  ;;  %v970_v4 = vand.u32 8388607, %v963_v62  ;;  %v862_v5 = vand.u32 2139095040, %v7968_v1  ;;  %v859_v7 = vand.u32 2147483647, %v7968_v1 }
 0x101   : > { %v6724_v6 = vadd.s32 4294967169, %v967_v3  ;;  %v863_v8 = vshrl.u32 %v862_v5, 23  ;;  %v971_v10 = vor.u32 8388608, %v970_v4  ;;  %v866_v13 = vand.u32 8388607, %v859_v7 }
 0x103   : > { %v973_v9 = vadd.s32 1, %v6724_v6  ;;  %v6720_v12 = vadd.s32 4294967169, %v863_v8  ;;  %v7976_v20 = vshll.u32 %v971_v10, 8  ;;  %v867_v24 = vor.u32 8388608, %v866_v13 }
 0x105   : > { %vm974_vm5 = vcmp.gt.s32.totalorder %v973_v9, 0  ;;  %v869_v16 = vadd.s32 1, %v6720_v12  ;;  %v907_v63 = vshll.u32 %v867_v24, 8 }
 0x106   : > { %v975_v15 = vsel %vm974_vm5, %v973_v9, 0  ;;  %vm965_vm5 = vcmp.lt.s32.totalorder %v7964_v60, 0 }
 0x107   : > { %v976_v18 = vshrl.u32 %v975_v15, 5  ;;  %v977_v19 = vand.u32 31, %v975_v15  ;;  %vm870_vm6 = vcmp.gt.s32.totalorder %v869_v16, 0 }
 0x108   : > { %v871_v47 = vsel %vm870_vm6, %v869_v16, 0  ;;  %vm8039_vm6 = vcmp.le.f32.partialorder %v963_v62, 0.7853982  ;;  %v1068_v62 = vld [vmem:[%s11157_s3 + $0x8] sm:$0xff] }
 0x109   : > { %v978_v21 = vsub.s32 32, %v977_v19  ;;  %v980_v23 = vshll.u32 %v11180_v22, %v977_v19  ;;  %v983_v27 = vshll.u32 %v11177_v26, %v977_v19  ;;  %v986_v29 = vshll.u32 %v11175_v28, %v977_v19 }
 0x10a   : > { %v989_v31 = vshll.u32 %v11173_v30, %v977_v19  ;;  %v992_v33 = vshll.u32 %v11195_v32, %v977_v19  ;;  %vm995_vm7 = vcmp.lt.s32.totalorder %v976_v18, 1  ;;  %vm997_vm8 = vcmp.lt.s32.totalorder %v976_v18, 3 }
 0x10b   : > { %v981_v34 = vshrl.u32 %v11177_v26, %v978_v21  ;;  %v984_v35 = vshrl.u32 %v11175_v28, %v978_v21  ;;  %v987_v36 = vshrl.u32 %v11173_v30, %v978_v21  ;;  %v979_v40 = vshrl.u32 %v11180_v22, %v978_v21 }
 0x10c   : > { %v990_v41 = vshrl.u32 %v11195_v32, %v978_v21  ;;  %v993_v43 = vshrl.u32 %v11165_v42, %v978_v21  ;;  %vm998_vm9 = vcmp.lt.s32.totalorder %v976_v18, 4  ;;  %v873_v50 = vand.u32 31, %v871_v47 }
 0x10d   : > { %v982_v44 = vor.u32 %v981_v34, %v980_v23  ;;  %v985_v45 = vor.u32 %v984_v35, %v983_v27  ;;  %v988_v46 = vor.u32 %v987_v36, %v986_v29  ;;  %vm996_vm10 = vcmp.lt.s32.totalorder %v976_v18, 2 }
 0x10e   : > { %v991_v48 = vor.u32 %v990_v41, %v989_v31  ;;  %v994_v49 = vor.u32 %v993_v43, %v992_v33  ;;  %v874_v58 = vsub.s32 32, %v873_v50  ;;  %v872_v5 = vshrl.u32 %v871_v47, 5 }
 0x10f   : > { %v999_v51 = vsel %vm995_vm7, %v979_v40, %v982_v44  ;;  %v1000_v52 = vsel %vm998_vm9, %v988_v46, 2102212464  ;;  %v1003_v53 = vsel %vm995_vm7, %v982_v44, %v985_v45  ;;  %v1007_v54 = vsel %vm995_vm7, %v985_v45, %v988_v46 }
 0x110   : > { %v1001_v55 = vsel %vm997_vm8, %v985_v45, %v1000_v52  ;;  %v1004_v56 = vsel %vm998_vm9, %v991_v48, 920167782  ;;  %v1008_v57 = vsel %vm998_vm9, %v994_v49, 1326507024  ;;  %v876_v12 = vshll.u32 %v11180_v22, %v873_v50 }
 0x111   : > { %v1005_v59 = vsel %vm997_vm8, %v988_v46, %v1004_v56  ;;  %v1009_v61 = vsel %vm997_vm8, %v991_v48, %v1008_v57  ;;  %v1002_v0 = vsel %vm996_vm10, %v999_v51, %v1001_v55  ;;  %v877_v13 = vshrl.u32 %v11177_v26, %v874_v58 }
 0x112   : > { %v1006_v3 = vsel %vm996_vm10, %v1003_v53, %v1005_v59  ;;  %v1010_v4 = vsel %vm996_vm10, %v1007_v54, %v1009_v61  ;;  %v879_v15 = vshll.u32 %v11177_v26, %v873_v50  ;;  %v880_v16 = vshrl.u32 %v11175_v28, %v874_v58 }
 0x113   : > { %v7997_v6 = vmul.u32.u64.low %v7976_v20, %v1010_v4  ;;  %v7998_v8 = vmul.u32.u64.high %v7976_v20, %v1010_v4, %v7997_v6  ;;  %v8001_v9 = vmul.u32.u64.low %v7976_v20, %v1006_v3  ;;  %v8002_v10 = vmul.u32.u64.high %v7976_v20, %v1006_v3, %v8001_v9 }
 0x114   : > { %v882_v18 = vshll.u32 %v11175_v28, %v873_v50  ;;  %v883_v19 = vshrl.u32 %v11173_v30, %v874_v58  ;;  %v885_v21 = vshll.u32 %v11173_v30, %v873_v50  ;;  %v886_v23 = vshrl.u32 %v11195_v32, %v874_v58 }
 0x115   : > { %v878_v24 = vor.u32 %v877_v13, %v876_v12  ;;  %v881_v27 = vor.u32 %v880_v16, %v879_v15  ;;  %v888_v29 = vshll.u32 %v11195_v32, %v873_v50  ;;  %v889_v31 = vshrl.u32 %v11165_v42, %v874_v58 }
 0x116   : > { %v1018_v33 = vmul.u32 %v7976_v20, %v1002_v0  ;;  %vm1020_vm11 = vc.u32 %v7998_v8, %v8001_v9  ;;  %v1021_v34 = vadd.s32 1, %v8002_v10  ;;  %v884_v35 = vor.u32 %v883_v19, %v882_v18 }
 0x117   : > { %v875_v36 = vshrl.u32 %v11180_v22, %v874_v58  ;;  %v887_v40 = vor.u32 %v886_v23, %v885_v21  ;;  %v890_v41 = vor.u32 %v889_v31, %v888_v29  ;;  %vm891_vm12 = vcmp.lt.s32.totalorder %v872_v5, 1 }
 0x118   : > { %v1022_v43 = vsel %vm1020_vm11, %v1021_v34, %v8002_v10  ;;  %vm893_vm13 = vcmp.lt.s32.totalorder %v872_v5, 3  ;;  %vm894_vm14 = vcmp.lt.s32.totalorder %v872_v5, 4  ;;  %v899_v44 = vsel %vm891_vm12, %v878_v24, %v881_v27 }
 0x119   : > { %v1023_v45 = vadd.s32 %v1022_v43, %v1018_v33  ;;  %v896_v46 = vsel %vm894_vm14, %v884_v35, 2102212464  ;;  %v900_v47 = vsel %vm894_vm14, %v887_v40, 920167782  ;;  %v903_v20 = vsel %vm891_vm12, %v881_v27, %v884_v35 }
 0x11a   : > { %vm892_vm15 = vcmp.lt.s32.totalorder %v872_v5, 2  ;;  %v895_v48 = vsel %vm891_vm12, %v875_v36, %v878_v24  ;;  %v901_v49 = vsel %vm893_vm13, %v884_v35, %v900_v47  ;;  %v904_v50 = vsel %vm894_vm14, %v890_v41, 1326507024 }
 0x11b   : > { %v1024_v51 = vadd.s32 536870912, %v1023_v45  ;;  %v897_v52 = vsel %vm893_vm13, %v881_v27, %v896_v46  ;;  %v902_v53 = vsel %vm892_vm15, %v899_v44, %v901_v49  ;;  %v905_v54 = vsel %vm893_vm13, %v887_v40, %v904_v50 }
 0x11c   : > { %v906_v55 = vsel %vm892_vm15, %v903_v20, %v905_v54  ;;  %v8021_v56 = vmul.u32.u64.low %v907_v63, %v902_v53  ;;  %v8022_v57 = vmul.u32.u64.high %v907_v63, %v902_v53, %v8021_v56  ;;  %v898_v0 = vsel %vm892_vm15, %v895_v48, %v897_v52 }
 0x11d   : > { %v1025_v58 = vshrl.u32 %v1024_v51, 30  ;;  %v8024_v59 = vmul.u32.u64.low %v907_v63, %v906_v55  ;;  %v8025_v61 = vmul.u32.u64.high %v907_v63, %v906_v55, %v8024_v59  ;;  %v914_v6 = vmul.u32 %v907_v63, %v898_v0 }
 0x11e   : > { %v917_v4 = vadd.s32 1, %v8022_v57  ;;  %v1019_v63 = vadd.s32 %v8001_v9, %v7998_v8  ;;  %vm861_vm7 = vcmp.lt.s32.totalorder %v7968_v1, 0  ;;  %vm8059_vm8 = vcmp.le.f32.partialorder %v859_v7, 0.7853982  ;;  %v1070_v7 = vld [vmem:[%s11157_s3 + $0x18] sm:$0xff] }
 0x11f   : > { %v1026_v3 = vshll.u32 %v1025_v58, 30  ;;  %vm916_vm0 = vc.u32 %v8025_v61, %v8021_v56  ;;  %v915_v50 = vadd.s32 %v8021_v56, %v8025_v61  ;;  %v1049_v0 = vsub.s32 4, %v1025_v58 }
 0x120   : > { %v918_v10 = vsel %vm916_vm0, %v917_v4, %v8022_v57  ;;  %vm1055_vm12 = vweird.f32 %v7964_v60  ;;  %vm951_vm0 = vweird.f32 %v7968_v1 }
 0x121   : > { %v1027_v5 = vsub.s32 %v1023_v45, %v1026_v3  ;;  %v919_v13 = vadd.s32 %v918_v10, %v914_v6  ;;  %v1050_v6 = vsel %vm965_vm5, %v1049_v0, %v1025_v58 }
 0x123   : > { %v1029_v12 = vsub.s32 0, %v1027_v5  ;;  %v920_v16 = vadd.s32 536870912, %v919_v13 }
 0x125   : > { %v6725_v15 = vmin.u32 %v1029_v12, %v1027_v5  ;;  %v8030_v19 = vshrl.u32 %v920_v16, 30 }
 0x127   : > { %v1031_v18 = vclz %v6725_v15  ;;  %v922_v23 = vshll.u32 %v8030_v19, 30  ;;  %v8054_v15 = vsel %vm8039_vm6, 0, %v1050_v6 }
 0x129   : > { %v6726_v21 = vadd.s32 4294967294, %v1031_v18  ;;  %v923_v27 = vsub.s32 %v919_v13, %v922_v23  ;;  %v1069_v13 = vld [vmem:[%s11157_s3 + $0x10] sm:$0xff]  ;;  %v1286_v18 = vsel %vm1281_vm4, %v1068_v62, 0 }
 0x12a   : > { %v1289_v23 = vsel %vm1281_vm4, %v1069_v13, 0 }
 0x12b   : > { %vm6727_vm1 = vcmp.lt.s32.totalorder %v6726_v21, 0  ;;  %v925_v33 = vsub.s32 0, %v923_v27 }
 0x12c   : > { %v1034_v24 = vsel %vm6727_vm1, 0, %v6726_v21 }
 0x12d   : > { %v1035_v29 = vsub.s32 32, %v1034_v24  ;;  %v1039_v31 = vsub.s32 4294967266, %v1034_v24  ;;  %v1036_v34 = vshll.u32 %v1027_v5, %v1034_v24  ;;  %v6721_v40 = vmin.u32 %v925_v33, %v923_v27 }
 0x12e   : > { %v1271_v24 = vand.u32 3, %v8054_v15  ;;  %v8082_v33 = vand.u32 4294901760, %v1289_v23 }
 0x12f   : > { %v1037_v35 = vshrl.u32 %v1019_v63, %v1035_v29  ;;  %v1040_v36 = vadd.s32 127, %v1039_v31  ;;  %v927_v44 = vclz %v6721_v40  ;;  %v8075_v63 = vand.u32 4294901760, %v1286_v18  ;;  %v1071_v29 = vld [vmem:[%s11157_s3 + $0x20] sm:$0xff] }
 0x130   : > { %vm1276_vm9 = vcmp.eq.s32.totalorder %v1271_v24, 2  ;;  %vm1273_vm10 = vcmp.eq.s32.totalorder %v1271_v24, 0  ;;  %vm1272_vm11 = vcmp.lt.s32.totalorder %v1271_v24, 2 }
 0x131   : > { %v1038_v41 = vor.u32 %v1037_v35, %v1036_v34  ;;  %v1041_v43 = vshll.u32 %v1040_v36, 23  ;;  %v6722_v46 = vadd.s32 4294967294, %v927_v44  ;;  %v1292_v36 = vsel %vm1281_vm4, %v1070_v7, 0 }
 0x133   : > { %v1042_v45 = vor.u32 4788187, %v1041_v43  ;;  %v1045_v20 = vcvt.s32.f32 %v1038_v41  ;;  %vm6723_vm3 = vcmp.lt.s32.totalorder %v6722_v46, 0  ;;  %v1295_v41 = vsel %vm1281_vm4, %v1071_v29, 0  ;;  %v1072_v43 = vld [vmem:[%s11157_s3 + $0x28] sm:$0xff] }
 0x134   : > { %v930_v49 = vsel %vm6723_vm3, 0, %v6722_v46  ;;  %v8100_v46 = vsub.f32 %v1286_v18, %v8075_v63 }
 0x135   : > { %v1043_v47 = vand.u32 2147483647, %v1042_v45  ;;  %v931_v8 = vsub.s32 32, %v930_v49  ;;  %v935_v9 = vsub.s32 4294967266, %v930_v49  ;;  %v932_v52 = vshll.u32 %v923_v27, %v930_v49  ;;  %v1073_v49 = vld [vmem:[%s11157_s3 + $0x30] sm:$0xff] }
 0x136   : > { %v945_v27 = vsub.s32 4, %v8030_v19 }
 0x137   : > { %v1046_v48 = vmul.f32 %v1045_v20, %v1043_v47  ;;  %v933_v53 = vshrl.u32 %v915_v50, %v931_v8  ;;  %v936_v54 = vadd.s32 127, %v935_v9  ;;  %v8106_v20 = vsub.f32 %v1289_v23, %v8082_v33 }
 0x138   : > { %v946_v45 = vsel %vm861_vm7, %v945_v27, %v8030_v19  ;;  %v8114_v50 = vand.u32 4294901760, %v1295_v41  ;;  %v1298_v8 = vsel %vm1281_vm4, %v1072_v43, 0 }
 0x139   : > { %v1047_v51 = vxor.u32 2147483648, %v1046_v48  ;;  %v934_v56 = vor.u32 %v933_v53, %v932_v52  ;;  %v937_v61 = vshll.u32 %v936_v54, 23  ;;  %v1385_v53 = vand.u32 4294901760, %v8100_v46 }
 0x13a   : > { %v1301_v54 = vsel %vm1281_vm4, %v1073_v49, 0  ;;  %v1395_v55 = vand.u32 4294901760, %v8106_v20 }
 0x13b   : > { %v1048_v57 = vsel %vm965_vm5, %v1047_v51, %v1046_v48  ;;  %v938_v3 = vor.u32 4788187, %v937_v61  ;;  %v941_v5 = vcvt.s32.f32 %v934_v56  ;;  %v8108_v48 = vand.u32 4294901760, %v1292_v36  ;;  %v1074_v56 = vld [vmem:[%s11157_s3 + $0x38] sm:$0xff] }
 0x13c   : > { %v1051_v59 = vsel %vm8039_vm6, %v7964_v60, %v1048_v57  ;;  %v8121_v51 = vsel %vm8059_vm8, 0, %v946_v45  ;;  %v1386_v6 = vsub.f32 %v8100_v46, %v1385_v53  ;;  %v1304_v62 = vsel %vm1281_vm4, %v1074_v56, 0 }
 0x13d   : > { %7637 = vcosq.f32 %v1051_v59  ;;  %v939_v4 = vand.u32 2147483647, %v938_v3  ;;  %v8129_v57 = vsub.f32 %v1292_v36, %v8108_v48  ;;  %v1168_v61 = vand.u32 3, %v8121_v51 }
 0x13e   : > { %7639 = vsinq.f32 %v1051_v59  ;;  %v8131_v59 = vand.u32 4294901760, %v1298_v8  ;;  %v8140_v3 = vsub.f32 %v1295_v41, %v8114_v50  ;;  %v1396_v58 = vsub.f32 %v8106_v20, %v1395_v55 }
 0x13f   : > { %v942_v10 = vmul.f32 %v941_v5, %v939_v4  ;;  %v8143_v4 = vand.u32 4294901760, %v1301_v54  ;;  %vm1173_vm13 = vcmp.eq.s32.totalorder %v1168_v61, 2  ;;  %vm1170_vm14 = vcmp.eq.s32.totalorder %v1168_v61, 0 }
 0x140   : > { %v8161_v18 = vsub.f32 %v1298_v8, %v8131_v59  ;;  %v1415_v24 = vand.u32 4294901760, %v8140_v3  ;;  %v8172_v29 = vand.u32 4294901760, %v1304_v62  ;;  %v1056_v36 = vadd.s32 3, %v8054_v15 }
 0x141   : > { %v943_v12 = vxor.u32 2147483648, %v942_v10  ;;  %v8170_v27 = vsub.f32 %v1301_v54, %v8143_v4  ;;  %vm1169_vm15 = vcmp.lt.s32.totalorder %v1168_v61, 2  ;;  %v1397_v54 = vand.u32 4294901760, %v1396_v58 }
 0x142   : > { %v8188_v8 = vsub.f32 %v1304_v62, %v8172_v29  ;;  %v1416_v56 = vsub.f32 %v8140_v3, %v1415_v24 }
 0x143   : > { %v944_v16 = vsel %vm861_vm7, %v943_v12, %v942_v10  ;;  %v1435_v61 = vand.u32 4294901760, %v8170_v27 }
 0x144   : > { %v947_v21 = vsel %vm8059_vm8, %v7968_v1, %v944_v16  ;;  %v1405_v16 = vand.u32 4294901760, %v8129_v57  ;;  %v1445_v58 = vand.u32 4294901760, %v8188_v8 }
 0x145   : > { %7641 = vcosq.f32 %v947_v21 }
 0x146   : > { %7643 = vsinq.f32 %v947_v21  ;;  %v1406_v15 = vsub.f32 %v8129_v57, %v1405_v16 }
 0x14a   : > { %v8080_v31 = vpop.eup %7637 }
 0x14b   : > { %v8084_v34 = vpop.eup %7639  ;;  %v1063_v35 = vxor.u32 2147483648, %v8080_v31 }
 0x14c   : > { %v1060_v40 = vxor.u32 2147483648, %v8084_v34 }
 0x14d   : > { %v1278_v44 = vsel %vm1276_vm9, %v1063_v35, %v8084_v34 }
 0x14e   : > { %v1275_v47 = vsel %vm1273_vm10, %v8080_v31, %v1060_v40 }
 0x14f   : > { %v1279_v19 = vsel %vm1272_vm11, %v1275_v47, %v1278_v44  ;;  %v1387_v47 = vand.u32 4294901760, %v1386_v6 }
 0x150   : > { %v1280_v9 = vsel %vm1055_vm12, nan, %v1279_v19  ;;  %v1425_v19 = vand.u32 4294901760, %v8161_v18 }
 0x151   : > { %v8123_v52 = vand.u32 4294901760, %v1280_v9 }
 0x152   : > { %v8145_v5 = vpop.eup %7641  ;;  %v1426_v62 = vsub.f32 %v8161_v18, %v1425_v19 }
 0x153   : > { %7131 = vmatprep.subr.mxu0 %v8123_v52  ;;  %v1483_v0 = vsub.f32 %v1280_v9, %v8123_v52  ;;  %v8153_v12 = vpop.eup %7643  ;;  %v959_v13 = vxor.u32 2147483648, %v8145_v5  ;;  %v1057_v9 = vand.u32 3, %v1056_v36  ;;  %v1417_v36 = vand.u32 4294901760, %v1416_v56 }
 0x154   : > { %7132 = vmatpush3.msra.mxu0 %v8123_v52  ;;  %v956_v21 = vxor.u32 2147483648, %v8153_v12 }
 0x155   : > { %v8150_v10 = vand.u32 4294901760, %v1483_v0  ;;  %v1175_v7 = vsel %vm1173_vm13, %v959_v13, %v8153_v12  ;;  %vm1059_vm1 = vcmp.eq.s32.totalorder %v1057_v9, 0  ;;  %vm1062_vm3 = vcmp.eq.s32.totalorder %v1057_v9, 2 }
 0x156   : > { %v1172_v41 = vsel %vm1170_vm14, %v8145_v5, %v956_v21  ;;  %vm1058_vm5 = vcmp.lt.s32.totalorder %v1057_v9, 2 }
 0x157   : > { %v1485_v23 = vsub.f32 %v1483_v0, %v8150_v10  ;;  %v1176_v44 = vsel %vm1169_vm15, %v1172_v41, %v1175_v7  ;;  %v1436_v41 = vsub.f32 %v8170_v27, %v1435_v61 }
 0x158   : > { %v1177_v45 = vsel %vm951_vm0, nan, %v1176_v44  ;;  %v1064_v44 = vsel %vm1062_vm3, %v1063_v35, %v8084_v34 }
 0x159   : > { %v1486_v43 = vand.u32 4294901760, %v1485_v23  ;;  %v8181_v49 = vand.u32 4294901760, %v1177_v45  ;;  %v1407_v23 = vand.u32 4294901760, %v1406_v15  ;;  %v1446_v15 = vsub.f32 %v8188_v8, %v1445_v58 }
 0x15b   : > { %7147 = vmatprep.subr.mxu1 %v1486_v43  ;;  %7133 = vmatprep.subr.mxu0 %v8181_v49  ;;  %v1490_v6 = vsub.f32 %v1177_v45, %v8181_v49  ;;  %v1447_v35 = vand.u32 4294901760, %v1446_v15 }
 0x15c   : > { %7148 = vmatpush3.msra.mxu1 %v1486_v43  ;;  %7134 = vmatpush3.msra.mxu0 %v8181_v49  ;;  %v1061_v43 = vsel %vm1059_vm1, %v8080_v31, %v1060_v40  ;;  %v1437_v40 = vand.u32 4294901760, %v1436_v41  ;;  %v952_v31 = vadd.s32 3, %v8121_v51 }
 0x15d   : > { %7136 = vmatmul.mubr.f32.vlgmr.msra.gmra.mxu0 %v1387_v47  ;;  %7163 = vmatprep.subr.mxu0 %v1483_v0  ;;  %v1491_v7 = vand.u32 4294901760, %v1490_v6  ;;  %v1427_v47 = vand.u32 4294901760, %v1426_v62  ;;  %v7810_v62 = vmov 0  }
 0x15e   : > { %7164 = vmatpush3.msra.mxu0 %v1483_v0  ;;  %7138 = vmatprep.mubr.f32.mxu0 %v1397_v54  ;;  %v1065_v54 = vsel %vm1058_vm5, %v1061_v43, %v1064_v44  ;;  %v953_v56 = vand.u32 3, %v952_v31  ;;  %v853_v43 = vld [vmem:[%s11156_s2 + $0x10] sm:$0xff] }
 0x15f   : > { %7165 = vmatprep.subr.mxu0 %v1490_v6  ;;  %v1492_v45 = vsub.f32 %v1490_v6, %v1491_v7  ;;  %v1066_v34 = vsel %vm1055_vm12, nan, %v1065_v54  ;;  %7635 = vset.pattern.permute.xlu0 %v7810_v62 }
 0x160   : > { %7166 = vmatpush3.msra.mxu0 %v1490_v6  ;;  %v8221_v9 = vand.u32 4294901760, %v1066_v34  ;;  %vm955_vm6 = vcmp.eq.s32.totalorder %v953_v56, 0  ;;  %vm958_vm7 = vcmp.eq.s32.totalorder %v953_v56, 2  ;;  %vm954_vm8 = vcmp.lt.s32.totalorder %v953_v56, 2  ;;  %7636 = vset.pattern.permute.xlu1 %v7810_v62 }
 0x161   : > { %7139 = vmatmul.mubr.f32.gmra.mxu0 %v1407_v23  ;;  %7195 = vmatprep.subr.mxu0 %v8150_v10  ;;  %v1493_v0 = vand.u32 4294901760, %v1492_v45  ;;  %v957_v51 = vsel %vm955_vm6, %v8145_v5, %v956_v21  ;;  %v960_v6 = vsel %vm958_vm7, %v959_v13, %v8153_v12  ;;  %v851_v5 = vld [vmem:[%s11156_s2] sm:$0xff]  ;;  %v3642_v12 = vld [vmem:[%s11158_s4 + $0x28] sm:$0xff] }
 0x162   : > { %7141 = vmatprep.mubr.f32.mxu0 %v1417_v36  ;;  %v8230_v60 = vsub.f32 %v1066_v34, %v8221_v9  ;;  %v961_v23 = vsel %vm954_vm8, %v957_v51, %v960_v6  ;;  %v2067_v41 = vsel %vm1281_vm4, %v851_v5, 0  ;;  %3672 = vperm.xlu1 %7636, %v3642_v12   ;;  %v855_v45 = vld [vmem:[%s11156_s2 + $0x20] sm:$0xff]  ;;  %v3639_v5 = vld [vmem:[%s11158_s4 + $0x10] sm:$0xff] }
 0x163   : > { %7149 = vmatprep.subr.mxu1 %v1493_v0  ;;  %v962_v13 = vsel %vm951_vm0, nan, %v961_v23  ;;  %v8285_v44 = vand.u32 4294901760, %v2067_v41  ;;  %v2079_v54 = vsel %vm1281_vm4, %v855_v45, 0 }
 0x164   : > { %7150 = vmatpush3.msra.mxu1 %v1493_v0  ;;  %v8244_v21 = vand.u32 4294901760, %v8230_v60  ;;  %v3641_v0 = vld [vmem:[%s11158_s4 + $0x20] sm:$0xff]  ;;  %v8341_v34 = vand.u32 4294901760, %v2079_v54 }
 0x165   : > { %7142 = vmatmul.mubr.f32.gmra.mxu0 %v1427_v47  ;;  %7152 = vmatmul.mubr.f32.vlgmr.msra.gmra.mxu1 %v8075_v63  ;;  %v8318_v15 = vsub.f32 %v2067_v41, %v8285_v44 }
 0x166   : > { %7179 = vmatprep.subr.mxu1 %v8123_v52  ;;  %7144 = vmatprep.mubr.f32.mxu0 %v1437_v40  ;;  %v2269_v36 = vsub.f32 %v8230_v60, %v8244_v21  ;;  %v857_v40 = vld [vmem:[%s11156_s2 + $0x30] sm:$0xff]  ;;  %v8377_v12 = vsub.f32 %v2079_v54, %v8341_v34 }
 0x167   : > { %7180 = vmatpush3.msra.mxu1 %v8123_v52  ;;  %7154 = vmatprep.mubr.f32.mxu1 %v8082_v33  ;;  %v2159_v56 = vand.u32 4294901760, %v8318_v15  ;;  %v2085_v51 = vsel %vm1281_vm4, %v857_v40, 0 }
 0x168   : > { %7181 = vmatprep.subr.mxu1 %v8181_v49  ;;  %3667 = vperm.xlu1 %7636, %v3641_v0  }
 0x169   : > { %7182 = vmatpush3.msra.mxu1 %v8181_v49  ;;  %7145 = vmatmul.mubr.f32.gmra.mxu0 %v1447_v35  ;;  %v2160_v62 = vsub.f32 %v8318_v15, %v2159_v56 }
 0x16a   : > { %7155 = vmatmul.mubr.f32.gmra.mxu1 %v8108_v48  ;;  %7211 = vmatprep.subr.mxu1 %v8123_v52 }
 0x16b   : > { %7157 = vmatprep.mubr.f32.mxu1 %v8114_v50  ;;  %7167 = vmatprep.mubr.f32.mxu0 %v7957_v38  ;;  %v3643_v38 = vld [vmem:[%s11158_s4 + $0x30] sm:$0xff]  ;;  %v2161_v45 = vand.u32 4294901760, %v2160_v62  ;;  %v4534_v62 = vld [vmem:[%s11160_s6 + $0x8] sm:$0xff] }
 0x16c   : > { %3657 = vperm.xlu1 %7636, %v3639_v5  }
 0x16d   : > { %7168 = vmatmul.mubr.f32.vlgmr.msra.gmra.mxu0 %v8100_v46  ;;  %v854_v46 = vld [vmem:[%s11156_s2 + $0x18] sm:$0xff] }
 0x16e   : > { %7158 = vmatmul.mubr.f32.gmra.mxu1 %v8131_v59  ;;  %7196 = vmatpush3.msra.mxu0 %v8150_v10  ;;  %v3644_v10 = vld [vmem:[%s11158_s4 + $0x38] sm:$0xff]  ;;  %v2076_v47 = vsel %vm1281_vm4, %v854_v46, 0 }
 0x16f   : > { %7197 = vmatprep.subr.mxu0 %v1491_v7  ;;  %7160 = vmatprep.mubr.f32.mxu1 %v8143_v4 }
 0x170   : > { %7198 = vmatpush3.msra.mxu0 %v1491_v7  ;;  %7170 = vmatprep.mubr.f32.mxu0 %v8106_v20  ;;  %v852_v7 = vld [vmem:[%s11156_s2 + $0x8] sm:$0xff] }
 0x171   : > { %7227 = vmatprep.subr.mxu0 %v8221_v9  ;;  %7171 = vmatmul.mubr.f32.gmra.mxu0 %v8129_v57  ;;  %v2070_v1 = vsel %vm1281_vm4, %v852_v7, 0  ;;  %v856_v57 = vld [vmem:[%s11156_s2 + $0x28] sm:$0xff] }
 0x172   : > { %7161 = vmatmul.mubr.f32.gmra.mxu1 %v8172_v29  ;;  %7173 = vmatprep.mubr.f32.mxu0 %v8140_v3  ;;  %v8298_v20 = vand.u32 4294901760, %v2070_v1  ;;  %v2082_v35 = vsel %vm1281_vm4, %v856_v57, 0 }
 0x173   : > { %7183 = vmatprep.mubr.f32.mxu1 %v1375_v39  ;;  %3682 = vperm.xlu0 %7635, %v3644_v10   ;;  %v8273_v39 = vand.u32 4294901760, %v962_v13  ;;  %v8366_v23 = vand.u32 4294901760, %v2082_v35 }
 0x174   : > { %v8331_v3 = vsub.f32 %v2070_v1, %v8298_v20 }
 0x175   : > { %7174 = vmatmul.mubr.f32.gmra.mxu0 %v8161_v18  ;;  %v858_v18 = vld [vmem:[%s11156_s2 + $0x38] sm:$0xff]  ;;  %v8393_v41 = vsub.f32 %v2082_v35, %v8366_v23 }
 0x176   : > { %7184 = vmatmul.mubr.f32.vlgmr.msra.gmra.mxu1 %v1385_v53  ;;  %7176 = vmatprep.mubr.f32.mxu0 %v8170_v27  ;;  %v8291_v53 = vand.u32 4294901760, %v2269_v36  ;;  %v3638_v27 = vld [vmem:[%s11158_s4 + $0x8] sm:$0xff]  ;;  %v2088_v7 = vsel %vm1281_vm4, %v858_v18, 0 }
 0x177   : > { %7212 = vmatpush3.msra.mxu1 %v8123_v52  ;;  %7186 = vmatprep.mubr.f32.mxu1 %v1395_v55  ;;  %v2073_v52 = vsel %vm1281_vm4, %v853_v43, 0  ;;  %v3640_v55 = vld [vmem:[%s11158_s4 + $0x18] sm:$0xff]  ;;  %v2199_v43 = vand.u32 4294901760, %v8377_v12  ;;  %v2209_v0 = vand.u32 4294901760, %v8393_v41 }
 0x178   : > { %7213 = vmatprep.subr.mxu1 %v8181_v49  ;;  %3677 = vperm.xlu0 %7635, %v3643_v38   ;;  %v4540_v38 = vld [vmem:[%s11160_s6 + $0x38] sm:$0xff] }
 0x179   : > { %7214 = vmatpush3.msra.mxu1 %v8181_v49  ;;  %7177 = vmatmul.mubr.f32.gmra.mxu0 %v8188_v8  ;;  %v8311_v49 = vsub.f32 %v962_v13, %v8273_v39  ;;  %v8379_v13 = vand.u32 4294901760, %v2085_v51  ;;  %v2200_v54 = vsub.f32 %v8377_v12, %v2199_v43 }
 0x17a   : > { %7243 = vmatprep.subr.mxu1 %v8291_v53  ;;  %7187 = vmatmul.mubr.f32.gmra.mxu1 %v1405_v16  ;;  %v8324_v16 = vand.u32 4294901760, %v2073_v52 }
 0x17b   : > { %7189 = vmatprep.mubr.f32.mxu1 %v1415_v24  ;;  %7199 = vmatprep.mubr.f32.mxu0 %v7954_v37  ;;  %v8333_v24 = vand.u32 4294901760, %v2076_v47  ;;  %v8339_v31 = vand.u32 4294901760, %v8311_v49  ;;  %v8404_v46 = vsub.f32 %v2085_v51, %v8379_v13  ;;  %v2210_v51 = vsub.f32 %v8393_v41, %v2209_v0 }
 0x17c   : > { %3662 = vperm.xlu0 %7635, %v3640_v55   ;;  %v2201_v18 = vand.u32 4294901760, %v2200_v54 }
 0x17d   : > { %7200 = vmatmul.mubr.f32.vlgmr.msra.gmra.mxu0 %v8075_v63  ;;  %v8364_v6 = vsub.f32 %v2076_v47, %v8333_v24  ;;  %v2276_v10 = vsub.f32 %v8311_v49, %v8339_v31  ;;  %v3637_v47 = vld [vmem:[%s11158_s4] sm:$0xff]  ;;  %v2219_v57 = vand.u32 4294901760, %v8404_v46 }
 0x17e   : > { %7190 = vmatmul.mubr.f32.gmra.mxu1 %v1425_v19  ;;  %7228 = vmatpush3.msra.mxu0 %v8221_v9  ;;  %v8355_v19 = vsub.f32 %v2073_v52, %v8324_v16 }
 0x17f   : > { %7229 = vmatprep.subr.mxu0 %v8273_v39  ;;  %7192 = vmatprep.mubr.f32.mxu1 %v1435_v61  ;;  %v2169_v61 = vand.u32 4294901760, %v8331_v3  ;;  %v2189_v36 = vand.u32 4294901760, %v8364_v6  ;;  %v2277_v1 = vand.u32 4294901760, %v2276_v10  ;;  %v2852_v10 = vld [vmem:[%s11155_s1 + $0x10] sm:$0xff] }
 0x180   : > { %7230 = vmatpush3.msra.mxu0 %v8273_v39  ;;  %7202 = vmatprep.mubr.f32.mxu0 %v8082_v33  ;;  %v2179_v8 = vand.u32 4294901760, %v8355_v19 }
 0x181   : > { %7259 = vmatprep.subr.mxu0 %v8230_v60  ;;  %7203 = vmatmul.mubr.f32.gmra.mxu0 %v8108_v48  ;;  %v2190_v55 = vsub.f32 %v8364_v6, %v2189_v36 }
 0x182   : > { %7193 = vmatmul.mubr.f32.gmra.mxu1 %v1445_v58  ;;  %7205 = vmatprep.mubr.f32.mxu0 %v8114_v50  ;;  %v2170_v58 = vsub.f32 %v8331_v3, %v2169_v61  ;;  %v2180_v52 = vsub.f32 %v8355_v19, %v2179_v8 }
 0x183   : > { %7215 = vmatprep.mubr.f32.mxu1 %v7954_v37  ;;  %3652 = vperm.xlu0 %7635, %v3638_v27   ;;  %v8395_v37 = vand.u32 4294901760, %v2088_v7  ;;  %v2191_v35 = vand.u32 4294901760, %v2190_v55  ;;  %v2211_v27 = vand.u32 4294901760, %v2210_v51 }
 0x184   : > { %v2181_v40 = vand.u32 4294901760, %v2180_v52  ;;  %3647 = vperm.xlu1 %7636, %v3637_v47   ;;  %v4535_v52 = vld [vmem:[%s11160_s6 + $0x10] sm:$0xff]  ;;  %v6821_v47 = vld [vmem:[%s11160_s6 + $0x68] sm:$0xff] }
 0x185   : > { %7206 = vmatmul.mubr.f32.gmra.mxu0 %v8131_v59 }
 0x186   : > { %7216 = vmatmul.mubr.f32.vlgmr.msra.gmra.mxu1 %v8075_v63  ;;  %7208 = vmatprep.mubr.f32.mxu0 %v8143_v4  ;;  %v2171_v63 = vand.u32 4294901760, %v2170_v58  ;;  %v2853_v58 = vld [vmem:[%s11155_s1 + $0x18] sm:$0xff] }
 0x187   : > { %7244 = vmatpush3.msra.mxu1 %v8291_v53  ;;  %7218 = vmatprep.mubr.f32.mxu1 %v8082_v33  ;;  %v8417_v53 = vsub.f32 %v2088_v7, %v8395_v37  ;;  %v4538_v33 = vld [vmem:[%s11160_s6 + $0x28] sm:$0xff] }
 0x188   : > { %7245 = vmatprep.subr.mxu1 %v2277_v1  ;;  %4578 = vperm.xlu0 %7635, %v4540_v38   ;;  %v2868_v38 = vsel %vm351_vm2, %v2853_v58, 0 }
 0x189   : > { %7246 = vmatpush3.msra.mxu1 %v2277_v1  ;;  %7209 = vmatmul.mubr.f32.gmra.mxu0 %v8172_v29 }
 0x18a   : > { %7275 = vmatprep.subr.mxu1 %v8221_v9  ;;  %7219 = vmatmul.mubr.f32.gmra.mxu1 %v8108_v48  ;;  %v2229_v48 = vand.u32 4294901760, %v8417_v53 }
 0x18b   : > { %7221 = vmatprep.mubr.f32.mxu1 %v8114_v50  ;;  %7231 = vmatprep.mubr.f32.mxu0 %v2161_v45  ;;  %v2220_v50 = vsub.f32 %v8404_v46, %v2219_v57  ;;  %v2855_v45 = vld [vmem:[%s11155_s1 + $0x28] sm:$0xff] }
 0x18c   : > { %4568 = vperm.xlu0 %7635, %v4538_v33   ;;  %v2874_v33 = vsel %vm351_vm2, %v2855_v45, 0 }
 0x18d   : > { %7232 = vmatmul.mubr.f32.vlgmr.msra.gmra.mxu0 %v2171_v63 }
 0x18e   : > { %7222 = vmatmul.mubr.f32.gmra.mxu1 %v8131_v59  ;;  %7260 = vmatpush3.msra.mxu0 %v8230_v60  ;;  %v2230_v59 = vsub.f32 %v8417_v53, %v2229_v48  ;;  %v2221_v60 = vand.u32 4294901760, %v2220_v50 }
 0x18f   : > { %7261 = vmatprep.subr.mxu0 %v8311_v49  ;;  %7224 = vmatprep.mubr.f32.mxu1 %v8143_v4  ;;  %v2850_v4 = vld [vmem:[%s11155_s1] sm:$0xff] }
 0x190   : > { %7262 = vmatpush3.msra.mxu0 %v8311_v49  ;;  %7234 = vmatprep.mubr.f32.mxu0 %v2181_v40  ;;  %v2231_v5 = vand.u32 4294901760, %v2230_v59  ;;  %v2859_v49 = vsel %vm351_vm2, %v2850_v4, 0  ;;  %v8576_v40 = vand.u32 4294901760, %v2874_v33  ;;  %v6819_v59 = vld [vmem:[%s11160_s6 + $0x58] sm:$0xff]  ;;  %v6822_v4 = vld [vmem:[%s11160_s6 + $0x70] sm:$0xff] }
 0x191   : > { %7291 = vmatprep.subr.mxu0 %v8244_v21  ;;  %7235 = vmatmul.mubr.f32.gmra.mxu0 %v2191_v35  ;;  %v8489_v7 = vand.u32 4294901760, %v2859_v49  ;;  %v4533_v35 = vld [vmem:[%s11160_s6] sm:$0xff] }
 0x192   : > { %7225 = vmatmul.mubr.f32.gmra.mxu1 %v8172_v29  ;;  %7237 = vmatprep.mubr.f32.mxu0 %v2201_v18  ;;  %v4536_v29 = vld [vmem:[%s11160_s6 + $0x18] sm:$0xff] }
 0x193   : > { %7247 = vmatprep.mubr.f32.mxu1 %v8285_v44  ;;  %4558 = vperm.xlu0 %7635, %v4536_v29  }
 0x195   : > { %7238 = vmatmul.mubr.f32.gmra.mxu0 %v2211_v27 }
 0x196   : > { %7248 = vmatmul.mubr.f32.vlgmr.msra.gmra.mxu1 %v8298_v20  ;;  %7240 = vmatprep.mubr.f32.mxu0 %v2221_v60  ;;  %v8601_v60 = vsub.f32 %v2874_v33, %v8576_v40 }
 0x197   : > { %7276 = vmatpush3.msra.mxu1 %v8221_v9  ;;  %7250 = vmatprep.mubr.f32.mxu1 %v8324_v16 }
 0x198   : > { %7277 = vmatprep.subr.mxu1 %v8273_v39  ;;  %4548 = vperm.xlu0 %7635, %v4534_v62   ;;  %v3000_v62 = vand.u32 4294901760, %v8601_v60 }
 0x199   : > { %7278 = vmatpush3.msra.mxu1 %v8273_v39  ;;  %7241 = vmatmul.mubr.f32.gmra.mxu0 %v2231_v5 }
 0x19a   : > { %7307 = vmatprep.subr.mxu1 %v8221_v9  ;;  %7251 = vmatmul.mubr.f32.gmra.mxu1 %v8333_v24 }
 0x19b   : > { %7253 = vmatprep.mubr.f32.mxu1 %v8341_v34  ;;  %7263 = vmatprep.mubr.f32.mxu0 %v8318_v15 }
 0x19d   : > { %7264 = vmatmul.mubr.f32.vlgmr.msra.gmra.mxu0 %v8331_v3  ;;  %v2854_v3 = vld [vmem:[%s11155_s1 + $0x20] sm:$0xff] }
 0x19e   : > { %7254 = vmatmul.mubr.f32.gmra.mxu1 %v8366_v23  ;;  %7292 = vmatpush3.msra.mxu0 %v8244_v21  ;;  %v4539_v21 = vld [vmem:[%s11160_s6 + $0x30] sm:$0xff]  ;;  %v2871_v1 = vsel %vm351_vm2, %v2854_v3, 0  ;;  %v6563_v3 = vld [vmem:[#allocation2] sm:$0x1] }
 0x19f   : > { %7293 = vmatprep.subr.mxu0 %v8339_v31  ;;  %7256 = vmatprep.mubr.f32.mxu1 %v8379_v13  ;;  %v8554_v55 = vand.u32 4294901760, %v2871_v1 }
 0x1a0   : > { %7294 = vmatpush3.msra.mxu0 %v8339_v31  ;;  %7266 = vmatprep.mubr.f32.mxu0 %v8355_v19  ;;  %v2851_v31 = vld [vmem:[%s11155_s1 + $0x8] sm:$0xff] }
 0x1a1   : > { %7267 = vmatmul.mubr.f32.gmra.mxu0 %v8364_v6  ;;  %7323 = vmatprep.subr.mxu0 %v7924_v11  ;;  %v2862_v15 = vsel %vm351_vm2, %v2851_v31, 0  ;;  %v2856_v6 = vld [vmem:[%s11155_s1 + $0x30] sm:$0xff]  ;;  %v8586_v18 = vsub.f32 %v2871_v1, %v8554_v55  ;;  %v6817_v31 = vld [vmem:[%s11160_s6 + $0x48] sm:$0xff] }
 0x1a2   : > { %7257 = vmatmul.mubr.f32.gmra.mxu1 %v8395_v37  ;;  %7269 = vmatprep.mubr.f32.mxu0 %v8377_v12  ;;  %v8514_v19 = vand.u32 4294901760, %v2862_v15 }
 0x1a3   : > { %7279 = vmatprep.mubr.f32.mxu1 %v2159_v56  ;;  %4573 = vperm.xlu1 %7636, %v4539_v21   ;;  %v2865_v56 = vsel %vm351_vm2, %v2852_v10, 0  ;;  %v2990_v21 = vand.u32 4294901760, %v8586_v18 }
 0x1a4   : > { %v8541_v12 = vsub.f32 %v2862_v15, %v8514_v19 }
 0x1a5   : > { %7270 = vmatmul.mubr.f32.gmra.mxu0 %v8393_v41  ;;  %v2877_v41 = vsel %vm351_vm2, %v2856_v6, 0 }
 0x1a6   : > { %7280 = vmatmul.mubr.f32.vlgmr.msra.gmra.mxu1 %v2169_v61  ;;  %7272 = vmatprep.mubr.f32.mxu0 %v8404_v46  ;;  %v4537_v61 = vld [vmem:[%s11160_s6 + $0x20] sm:$0xff]  ;;  %v2960_v46 = vand.u32 4294901760, %v8541_v12  ;;  %v8588_v50 = vand.u32 4294901760, %v2877_v41 }
 0x1a7   : > { %7308 = vmatpush3.msra.mxu1 %v8221_v9  ;;  %7282 = vmatprep.mubr.f32.mxu1 %v2179_v8  ;;  %v8512_v9 = vsub.f32 %v2859_v49, %v8489_v7  ;;  %v6823_v8 = vld [vmem:[%s11160_s6 + $0x78] sm:$0xff] }
 0x1a8   : > { %7309 = vmatprep.subr.mxu1 %v8273_v39  ;;  %4563 = vperm.xlu1 %7636, %v4537_v61   ;;  %v8615_v49 = vsub.f32 %v2877_v41, %v8588_v50 }
 0x1a9   : > { %7310 = vmatpush3.msra.mxu1 %v8273_v39  ;;  %7273 = vmatmul.mubr.f32.gmra.mxu0 %v8417_v53  ;;  %v8525_v39 = vand.u32 4294901760, %v2865_v56  ;;  %v2961_v53 = vsub.f32 %v8541_v12, %v2960_v46 }
 0x1aa   : > { %7283 = vmatmul.mubr.f32.gmra.mxu1 %v2189_v36  ;;  %7295 = vmatprep.mubr.f32.mxu0 %v8285_v44  ;;  %v2950_v36 = vand.u32 4294901760, %v8512_v9  ;;  %v3010_v58 = vand.u32 4294901760, %v8615_v49 }
 0x1ab   : > { %7285 = vmatprep.mubr.f32.mxu1 %v2199_v43  ;;  %7337 = vmatprep.subr.mxu1 %v7939_v25  ;;  %v8543_v43 = vand.u32 4294901760, %v2868_v38  ;;  %v8552_v63 = vsub.f32 %v2865_v56, %v8525_v39  ;;  %v2991_v56 = vsub.f32 %v8586_v18, %v2990_v21 }
 0x1ac   : > { %5598 = vperm.xlu0 %7635, %v6823_v8   ;;  %4553 = vperm.xlu1 %7636, %v4535_v52   ;;  %v2951_v54 = vsub.f32 %v8512_v9, %v2950_v36  ;;  %v3001_v8 = vsub.f32 %v8601_v60, %v3000_v62  ;;  %v6816_v52 = vld [vmem:[%s11160_s6 + $0x40] sm:$0xff] }
 0x1ad   : > { %7296 = vmatmul.mubr.f32.vlgmr.msra.gmra.mxu0 %v8298_v20  ;;  %v2970_v51 = vand.u32 4294901760, %v8552_v63  ;;  %v2992_v1 = vand.u32 4294901760, %v2991_v56 }
 0x1ae   : > { %7286 = vmatmul.mubr.f32.gmra.mxu1 %v2209_v0  ;;  %7298 = vmatprep.mubr.f32.mxu0 %v8324_v16  ;;  %v2857_v0 = vld [vmem:[%s11155_s1 + $0x38] sm:$0xff]  ;;  %v3002_v45 = vand.u32 4294901760, %v3001_v8 }
 0x1af   : > { %7288 = vmatprep.mubr.f32.mxu1 %v2219_v57  ;;  %7324 = vmatpush3.msra.mxu0 %v7924_v11  ;;  %v8574_v57 = vsub.f32 %v2868_v38, %v8543_v43  ;;  %v2880_v27 = vsel %vm351_vm2, %v2857_v0, 0  ;;  %v2971_v29 = vsub.f32 %v8552_v63, %v2970_v51  ;;  %v6818_v38 = vld [vmem:[%s11160_s6 + $0x50] sm:$0xff] }
 0x1b0   : > { %7351 = vmatprep.subr.mxu0 %v7928_v14  ;;  %5588 = vperm.xlu0 %7635, %v6821_v47   ;;  %v8603_v5 = vand.u32 4294901760, %v2880_v27 }
 0x1b1   : > { %7299 = vmatmul.mubr.f32.gmra.mxu0 %v8333_v24  ;;  %4543 = vperm.xlu1 %7636, %v4533_v35  }
 0x1b2   : > { %7289 = vmatmul.mubr.f32.gmra.mxu1 %v2229_v48  ;;  %7301 = vmatprep.mubr.f32.mxu0 %v8341_v34  ;;  %v2980_v48 = vand.u32 4294901760, %v8574_v57  ;;  %v8629_v15 = vsub.f32 %v2880_v27, %v8603_v5 }
 0x1b3   : > { %7311 = vmatprep.mubr.f32.mxu1 %v8285_v44  ;;  %v2952_v44 = vand.u32 4294901760, %v2951_v54 }
 0x1b4   : > { %5578 = vperm.xlu0 %7635, %v6819_v59   ;;  %v2981_v10 = vsub.f32 %v8574_v57, %v2980_v48 }
 0x1b5   : > { %7302 = vmatmul.mubr.f32.gmra.mxu0 %v8366_v23  ;;  %5593 = vperm.xlu1 %7636, %v6822_v4  }
 0x1b6   : > { %7312 = vmatmul.mubr.f32.vlgmr.msra.gmra.mxu1 %v8298_v20  ;;  %7304 = vmatprep.mubr.f32.mxu0 %v8379_v13  ;;  %v2962_v20 = vand.u32 4294901760, %v2961_v53  ;;  %v2982_v61 = vand.u32 4294901760, %v2981_v10 }
 0x1b7   : > { %7338 = vmatpush3.msra.mxu1 %v7939_v25  ;;  %7314 = vmatprep.mubr.f32.mxu1 %v8324_v16  ;;  %v6820_v25 = vld [vmem:[%s11160_s6 + $0x60] sm:$0xff]  ;;  %v2972_v16 = vand.u32 4294901760, %v2971_v29 }
 0x1b8   : > { %7365 = vmatprep.subr.mxu1 %v7924_v11  ;;  %5568 = vperm.xlu0 %7635, %v6817_v31  }
 0x1b9   : > { %7305 = vmatmul.mubr.f32.gmra.mxu0 %v8395_v37  ;;  %5583 = vperm.xlu1 %7636, %v6820_v25  }
 0x1ba   : > { %7315 = vmatmul.mubr.f32.gmra.mxu1 %v8333_v24  ;;  %7325 = vmatprep.mubr.f32.mxu0 %v2952_v44  ;;  %v3020_v24 = vand.u32 4294901760, %v8629_v15 }
 0x1bb   : > { %7317 = vmatprep.mubr.f32.mxu1 %v8341_v34  ;;  %v3011_v34 = vsub.f32 %v8615_v49, %v3010_v58 }
 0x1bc   : > { %6566 = vperm.xlu0 %7635, %v6563_v3   ;;  %v3021_v6 = vsub.f32 %v8629_v15, %v3020_v24 }
 0x1bd   : > { %7326 = vmatmul.mubr.f32.vlgmr.msra.gmra.mxu0 %v2962_v20  ;;  %5573 = vperm.xlu1 %7636, %v6818_v38  }
 0x1be   : > { %7318 = vmatmul.mubr.f32.gmra.mxu1 %v8366_v23  ;;  %7328 = vmatprep.mubr.f32.mxu0 %v2972_v16  ;;  %v3012_v23 = vand.u32 4294901760, %v3011_v34 }
 0x1bf   : > { %7320 = vmatprep.mubr.f32.mxu1 %v8379_v13  ;;  %7352 = vmatpush3.msra.mxu0 %v7928_v14  ;;  %v3022_v14 = vand.u32 4294901760, %v3021_v6 }
 0x1c0   : > { %7379 = vmatprep.subr.mxu0 %v7932_v17 }
 0x1c1   : > { %7329 = vmatmul.mubr.f32.gmra.mxu0 %v2982_v61  ;;  %5563 = vperm.xlu1 %7636, %v6816_v52  }
 0x1c2   : > { %7321 = vmatmul.mubr.f32.gmra.mxu1 %v8395_v37  ;;  %7331 = vmatprep.mubr.f32.mxu0 %v2992_v1 }
 0x1c3   : > { %7339 = vmatprep.mubr.f32.mxu1 %v8489_v7 }
 0x1c5   : > { %7332 = vmatmul.mubr.f32.gmra.mxu0 %v3002_v45 }
 0x1c6   : > { %7340 = vmatmul.mubr.f32.vlgmr.msra.gmra.mxu1 %v8514_v19  ;;  %7334 = vmatprep.mubr.f32.mxu0 %v3012_v23 }
 0x1c7   : > { %7366 = vmatpush3.msra.mxu1 %v7924_v11  ;;  %7342 = vmatprep.mubr.f32.mxu1 %v8525_v39 }
 0x1c8   : > { %7393 = vmatprep.subr.mxu1 %v7924_v11 }
 0x1c9   : > { %7335 = vmatmul.mubr.f32.gmra.mxu0 %v3022_v14 }
 0x1ca   : > { %7343 = vmatmul.mubr.f32.gmra.mxu1 %v8543_v43  ;;  %7353 = vmatprep.mubr.f32.mxu0 %v8512_v9 }
 0x1cb   : > { %7345 = vmatprep.mubr.f32.mxu1 %v8554_v55 }
 0x1cd   : > { %7354 = vmatmul.mubr.f32.vlgmr.msra.gmra.mxu0 %v8541_v12 }
 0x1ce   : > { %7346 = vmatmul.mubr.f32.gmra.mxu1 %v8576_v40  ;;  %7356 = vmatprep.mubr.f32.mxu0 %v8552_v63 }
 0x1cf   : > { %7348 = vmatprep.mubr.f32.mxu1 %v8588_v50  ;;  %7380 = vmatpush3.msra.mxu0 %v7932_v17 }
 0x1d1   : > { %7357 = vmatmul.mubr.f32.gmra.mxu0 %v8574_v57 }
 0x1d2   : > { %7349 = vmatmul.mubr.f32.gmra.mxu1 %v8603_v5  ;;  %7359 = vmatprep.mubr.f32.mxu0 %v8586_v18 }
 0x1d3   : > { %7367 = vmatprep.mubr.f32.mxu1 %v2950_v36 }
 0x1d5   : > { %7360 = vmatmul.mubr.f32.gmra.mxu0 %v8601_v60 }
 0x1d6   : > { %7368 = vmatmul.mubr.f32.vlgmr.msra.gmra.mxu1 %v2960_v46  ;;  %7362 = vmatprep.mubr.f32.mxu0 %v8615_v49 }
 0x1d7   : > { %7394 = vmatpush3.msra.mxu1 %v7924_v11  ;;  %7370 = vmatprep.mubr.f32.mxu1 %v2970_v51 }
 0x1d9   : > { %7363 = vmatmul.mubr.f32.gmra.mxu0 %v8629_v15 }
 0x1da   : > { %7371 = vmatmul.mubr.f32.gmra.mxu1 %v2980_v48  ;;  %7381 = vmatprep.mubr.f32.mxu0 %v8489_v7 }
 0x1db   : > { %7373 = vmatprep.mubr.f32.mxu1 %v2990_v21 }
 0x1dd   : > { %7382 = vmatmul.mubr.f32.vlgmr.msra.gmra.mxu0 %v8514_v19 }
 0x1de   : > { %7374 = vmatmul.mubr.f32.gmra.mxu1 %v3000_v62  ;;  %7384 = vmatprep.mubr.f32.mxu0 %v8525_v39 }
 0x1df   : > { %7376 = vmatprep.mubr.f32.mxu1 %v3010_v58 }
 0x1e1   : > { %7385 = vmatmul.mubr.f32.gmra.mxu0 %v8543_v43 }
 0x1e2   : > { %7377 = vmatmul.mubr.f32.gmra.mxu1 %v3020_v24  ;;  %7387 = vmatprep.mubr.f32.mxu0 %v8554_v55 }
 0x1e3   : > { %7395 = vmatprep.mubr.f32.mxu1 %v8489_v7 }
 0x1e5   : > { %7388 = vmatmul.mubr.f32.gmra.mxu0 %v8576_v40 }
 0x1e6   : > { %7396 = vmatmul.mubr.f32.vlgmr.msra.gmra.mxu1 %v8514_v19  ;;  %7390 = vmatprep.mubr.f32.mxu0 %v8588_v50 }
 0x1e7   : > { %7398 = vmatprep.mubr.f32.mxu1 %v8525_v39 }
 0x1e9   : > { %7391 = vmatmul.mubr.f32.gmra.mxu0 %v8603_v5 }
 0x1ea   : > { %7399 = vmatmul.mubr.f32.gmra.mxu1 %v8543_v43 }
 0x1eb   : > { %7401 = vmatprep.mubr.f32.mxu1 %v8554_v55 }
 0x1ee   : > { %7402 = vmatmul.mubr.f32.gmra.mxu1 %v8576_v40 }
 0x1ef   : > { %7404 = vmatprep.mubr.f32.mxu1 %v8588_v50 }
 0x1f2   : > { %7405 = vmatmul.mubr.f32.gmra.mxu1 %v8603_v5 }
 0x21d   : > { %v7137_v11 = vpop.f32.mrf.mxu0 }
 0x21f   : > { %v1379_v17 = vpop.f32.mrf.mxu0 }
 0x221   : > { %v7140_v13 = vpop.f32.mrf.mxu0 }
 0x223   : > { %v1399_v37 = vpop.f32.mrf.mxu0 }
 0x225   : > { %v7143_v7 = vpop.f32.mrf.mxu0  ;;  %v7153_v9 = vpop.f32.mrf.mxu1 }
 0x226   : > { %v1537_v19 = vadd.f32 %v7153_v9, %v7137_v11 }
 0x227   : > { %v1419_v39 = vpop.f32.mrf.mxu0  ;;  %v1530_v36 = vpop.f32.mrf.mxu1 }
 0x228   : > { %v1531_v12 = vadd.f32 %v1530_v36, %v1379_v17 }
 0x229   : > { %v7146_v63 = vpop.f32.mrf.mxu0 }
 0x22a   : > { %v7156_v43 = vpop.f32.mrf.mxu1 }
 0x22b   : > { %v1549_v33 = vadd.f32 %v7156_v43, %v7140_v13  ;;  %v1439_v55 = vpop.f32.mrf.mxu0 }
 0x22c   : > { %v1542_v47 = vpop.f32.mrf.mxu1 }
 0x22d   : > { %v1543_v41 = vadd.f32 %v1542_v47, %v1399_v37  ;;  %v7169_v0 = vpop.f32.mrf.mxu0 }
 0x22e   : > { %v7159_v54 = vpop.f32.mrf.mxu1  ;;  %v1656_v46 = vadd.f32 %v7169_v0, %v1537_v19 }
 0x22f   : > { %v1561_v57 = vadd.f32 %v7159_v54, %v7143_v7  ;;  %v1648_v40 = vpop.f32.mrf.mxu0 }
 0x230   : > { %v1554_v35 = vpop.f32.mrf.mxu1  ;;  %v1649_v51 = vadd.f32 %v1648_v40, %v1531_v12 }
 0x231   : > { %v1555_v18 = vadd.f32 %v1554_v35, %v1419_v39  ;;  %v7172_v50 = vpop.f32.mrf.mxu0 }
 0x232   : > { %v7162_v27 = vpop.f32.mrf.mxu1  ;;  %v1670_v59 = vadd.f32 %v7172_v50, %v1549_v33 }
 0x233   : > { %v1573_v53 = vadd.f32 %v7162_v27, %v7146_v63  ;;  %v1662_v48 = vpop.f32.mrf.mxu0 }
 0x234   : > { %v1566_v60 = vpop.f32.mrf.mxu1  ;;  %v1663_v5 = vadd.f32 %v1662_v48, %v1543_v41 }
 0x235   : > { %v1567_v4 = vadd.f32 %v1566_v60, %v1439_v55  ;;  %v7175_v44 = vpop.f32.mrf.mxu0 }
 0x236   : > { %v1684_v29 = vadd.f32 %v7175_v44, %v1561_v57  ;;  %v7185_v21 = vpop.f32.mrf.mxu1 }
 0x237   : > { %v1781_v49 = vadd.f32 %v7185_v21, %v1656_v46  ;;  %v1676_v31 = vpop.f32.mrf.mxu0 }
 0x238   : > { %v1677_v20 = vadd.f32 %v1676_v31, %v1555_v18  ;;  %v1772_v10 = vpop.f32.mrf.mxu1 }
 0x239   : > { %v1773_v62 = vadd.f32 %v1772_v10, %v1649_v51  ;;  %v7178_v15 = vpop.f32.mrf.mxu0 }
 0x23a   : > { %v1698_v25 = vadd.f32 %v7178_v15, %v1573_v53  ;;  %v7188_v16 = vpop.f32.mrf.mxu1 }
 0x23b   : > { %v1797_v56 = vadd.f32 %v7188_v16, %v1670_v59  ;;  %v1690_v58 = vpop.f32.mrf.mxu0 }
 0x23c   : > { %v1691_v3 = vadd.f32 %v1690_v58, %v1567_v4  ;;  %v1788_v61 = vpop.f32.mrf.mxu1 }
 0x23d   : > { %v1789_v8 = vadd.f32 %v1788_v61, %v1663_v5  ;;  %v7201_v24 = vpop.f32.mrf.mxu0 }
 0x23e   : > { %v7191_v38 = vpop.f32.mrf.mxu1  ;;  %v1912_v1 = vadd.f32 %v7201_v24, %v1781_v49 }
 0x23f   : > { %v1813_v34 = vadd.f32 %v7191_v38, %v1684_v29  ;;  %v1905_v45 = vpop.f32.mrf.mxu0 }
 0x240   : > { %v1804_v6 = vpop.f32.mrf.mxu1  ;;  %v1906_v52 = vadd.f32 %v1905_v45, %v1773_v62 }
 0x241   : > { %v1805_v23 = vadd.f32 %v1804_v6, %v1677_v20  ;;  %v7204_v14 = vpop.f32.mrf.mxu0 }
 0x242   : > { %v7194_v11 = vpop.f32.mrf.mxu1  ;;  %v1924_v17 = vadd.f32 %v7204_v14, %v1797_v56 }
 0x243   : > { %v1829_v13 = vadd.f32 %v7194_v11, %v1698_v25  ;;  %v1917_v37 = vpop.f32.mrf.mxu0 }
 0x244   : > { %v1820_v7 = vpop.f32.mrf.mxu1  ;;  %v1918_v9 = vadd.f32 %v1917_v37, %v1789_v8 }
 0x245   : > { %v1821_v19 = vadd.f32 %v1820_v7, %v1691_v3  ;;  %v7207_v39 = vpop.f32.mrf.mxu0 }
 0x246   : > { %v1936_v36 = vadd.f32 %v7207_v39, %v1813_v34  ;;  %v7217_v12 = vpop.f32.mrf.mxu1 }
 0x247   : > { %v2027_v63 = vadd.f32 %v7217_v12, %v1912_v1  ;;  %v1929_v43 = vpop.f32.mrf.mxu0 }
 0x248   : > { %v1930_v33 = vadd.f32 %v1929_v43, %v1805_v23  ;;  %v2020_v55 = vpop.f32.mrf.mxu1 }
 0x249   : > { %v2021_v47 = vadd.f32 %v2020_v55, %v1906_v52  ;;  %v7210_v41 = vpop.f32.mrf.mxu0 }
 0x24a   : > { %v1948_v0 = vadd.f32 %v7210_v41, %v1829_v13  ;;  %v7220_v54 = vpop.f32.mrf.mxu1 }
 0x24b   : > { %v2039_v46 = vadd.f32 %v7220_v54, %v1924_v17  ;;  %v1941_v57 = vpop.f32.mrf.mxu0 }
 0x24c   : > { %v1942_v40 = vadd.f32 %v1941_v57, %v1821_v19  ;;  %v2032_v35 = vpop.f32.mrf.mxu1 }
 0x24d   : > { %v2033_v51 = vadd.f32 %v2032_v35, %v1918_v9  ;;  %v7233_v18 = vpop.f32.mrf.mxu0 }
 0x24e   : > { %v7223_v50 = vpop.f32.mrf.mxu1  ;;  %v2174_v27 = vadd.f32 %v7233_v18, %v2027_v63 }
 0x24f   : > { %v2051_v59 = vadd.f32 %v7223_v50, %v1936_v36  ;;  %v2163_v53 = vpop.f32.mrf.mxu0 }
 0x250   : > { %v2044_v48 = vpop.f32.mrf.mxu1  ;;  %v2164_v60 = vadd.f32 %v2163_v53, %v2021_v47 }
 0x251   : > { %v2045_v5 = vadd.f32 %v2044_v48, %v1930_v33  ;;  %v7236_v4 = vpop.f32.mrf.mxu0 }
 0x252   : > { %v7226_v44 = vpop.f32.mrf.mxu1  ;;  %v2194_v29 = vadd.f32 %v7236_v4, %v2039_v46 }
 0x253   : > { %v2063_v21 = vadd.f32 %v7226_v44, %v1948_v0  ;;  %v2183_v49 = vpop.f32.mrf.mxu0 }
 0x254   : > { %v2056_v31 = vpop.f32.mrf.mxu1  ;;  %v2184_v20 = vadd.f32 %v2183_v49, %v2033_v51 }
 0x255   : > { %v2057_v10 = vadd.f32 %v2056_v31, %v1942_v40  ;;  %v7239_v62 = vpop.f32.mrf.mxu0 }
 0x256   : > { %v2214_v15 = vadd.f32 %v7239_v62, %v2051_v59  ;;  %v7249_v25 = vpop.f32.mrf.mxu1 }
 0x257   : > { %v2321_v16 = vadd.f32 %v7249_v25, %v2174_v27  ;;  %v2203_v56 = vpop.f32.mrf.mxu0 }
 0x258   : > { %v2204_v58 = vadd.f32 %v2203_v56, %v2045_v5  ;;  %v2314_v3 = vpop.f32.mrf.mxu1 }
 0x259   : > { %v2315_v61 = vadd.f32 %v2314_v3, %v2164_v60  ;;  %v7242_v8 = vpop.f32.mrf.mxu0 }
 0x25a   : > { %v2234_v24 = vadd.f32 %v7242_v8, %v2063_v21  ;;  %v7252_v38 = vpop.f32.mrf.mxu1 }
 0x25b   : > { %v2333_v1 = vadd.f32 %v7252_v38, %v2194_v29  ;;  %v2223_v34 = vpop.f32.mrf.mxu0 }
 0x25c   : > { %v2224_v45 = vadd.f32 %v2223_v34, %v2057_v10  ;;  %v2326_v6 = vpop.f32.mrf.mxu1 }
 0x25d   : > { %v2327_v52 = vadd.f32 %v2326_v6, %v2184_v20  ;;  %v7265_v23 = vpop.f32.mrf.mxu0 }
 0x25e   : > { %v7255_v14 = vpop.f32.mrf.mxu1  ;;  %v2440_v11 = vadd.f32 %v7265_v23, %v2321_v16 }
 0x25f   : > { %v2345_v17 = vadd.f32 %v7255_v14, %v2214_v15  ;;  %v2432_v13 = vpop.f32.mrf.mxu0 }
 0x260   : > { %v2338_v37 = vpop.f32.mrf.mxu1  ;;  %v2433_v7 = vadd.f32 %v2432_v13, %v2315_v61 }
 0x261   : > { %v2339_v9 = vadd.f32 %v2338_v37, %v2204_v58  ;;  %v7268_v19 = vpop.f32.mrf.mxu0 }
 0x262   : > { %v7258_v39 = vpop.f32.mrf.mxu1  ;;  %v2454_v36 = vadd.f32 %v7268_v19, %v2333_v1 }
 0x263   : > { %v8705_v12 = vadd.f32 %v7258_v39, %v2234_v24  ;;  %v2446_v63 = vpop.f32.mrf.mxu0 }
 0x264   : > { %v2350_v43 = vpop.f32.mrf.mxu1  ;;  %v2447_v33 = vadd.f32 %v2446_v63, %v2327_v52 }
 0x265   : > { %v2351_v55 = vadd.f32 %v2350_v43, %v2224_v45  ;;  %v7271_v47 = vpop.f32.mrf.mxu0 }
 0x266   : > { %v2468_v41 = vadd.f32 %v7271_v47, %v2345_v17  ;;  %v7281_v0 = vpop.f32.mrf.mxu1 }
 0x267   : > { %v2565_v54 = vadd.f32 %v7281_v0, %v2440_v11  ;;  %v2460_v46 = vpop.f32.mrf.mxu0 }
 0x268   : > { %v2461_v57 = vadd.f32 %v2460_v46, %v2339_v9  ;;  %v2556_v40 = vpop.f32.mrf.mxu1 }
 0x269   : > { %v2557_v35 = vadd.f32 %v2556_v40, %v2433_v7  ;;  %v8707_v51 = vpop.f32.mrf.mxu0 }
 0x26a   : > { %v7284_v18 = vpop.f32.mrf.mxu1 }
 0x26b   : > { %v2581_v50 = vadd.f32 %v7284_v18, %v2454_v36  ;;  %v2474_v27 = vpop.f32.mrf.mxu0 }
 0x26c   : > { %v2475_v59 = vadd.f32 %v2474_v27, %v2351_v55  ;;  %v2572_v53 = vpop.f32.mrf.mxu1 }
 0x26d   : > { %v2573_v48 = vadd.f32 %v2572_v53, %v2447_v33  ;;  %v7297_v60 = vpop.f32.mrf.mxu0 }
 0x26e   : > { %v7287_v5 = vpop.f32.mrf.mxu1  ;;  %v2696_v4 = vadd.f32 %v7297_v60, %v2565_v54 }
 0x26f   : > { %v2597_v44 = vadd.f32 %v7287_v5, %v2468_v41  ;;  %v2689_v29 = vpop.f32.mrf.mxu0 }
 0x270   : > { %v2588_v21 = vpop.f32.mrf.mxu1  ;;  %v2690_v49 = vadd.f32 %v2689_v29, %v2557_v35 }
 0x271   : > { %v2589_v31 = vadd.f32 %v2588_v21, %v2461_v57  ;;  %v7300_v20 = vpop.f32.mrf.mxu0 }
 0x272   : > { %v8709_v10 = vpop.f32.mrf.mxu1  ;;  %v2708_v62 = vadd.f32 %v7300_v20, %v2581_v50 }
 0x273   : > { %v2701_v15 = vpop.f32.mrf.mxu0 }
 0x274   : > { %v2604_v25 = vpop.f32.mrf.mxu1  ;;  %v2702_v16 = vadd.f32 %v2701_v15, %v2573_v48 }
 0x275   : > { %v8711_v56 = vadd.f32 %v2604_v25, %v2475_v59  ;;  %v7303_v58 = vpop.f32.mrf.mxu0 }
 0x276   : > { %v2720_v3 = vadd.f32 %v7303_v58, %v2597_v44  ;;  %v7313_v61 = vpop.f32.mrf.mxu1 }
 0x277   : > { %v8713_v8 = vadd.f32 %v7313_v61, %v2696_v4  ;;  %v2713_v24 = vpop.f32.mrf.mxu0 }
 0x278   : > { %v2714_v38 = vadd.f32 %v2713_v24, %v2589_v31  ;;  %v2804_v1 = vpop.f32.mrf.mxu1 }
 0x279   : > { %v8715_v34 = vadd.f32 %v2804_v1, %v2690_v49  ;;  %v8717_v45 = vpop.f32.mrf.mxu0 }
 0x27a   : > { %v7316_v6 = vpop.f32.mrf.mxu1 }
 0x27b   : > { %v8719_v52 = vadd.f32 %v7316_v6, %v2708_v62  ;;  %v8721_v23 = vpop.f32.mrf.mxu0 }
 0x27c   : > { %v2816_v14 = vpop.f32.mrf.mxu1 }
 0x27d   : > { %v8723_v11 = vadd.f32 %v2816_v14, %v2702_v16  ;;  %v7327_v17 = vpop.f32.mrf.mxu0  ;;  %v8739_v14 = vpop.permute.xlu0 %3682 }
 0x27e   : > { %v7319_v13 = vpop.f32.mrf.mxu1 }
 0x27f   : > { %v8725_v37 = vadd.f32 %v7319_v13, %v2720_v3  ;;  %v2954_v7 = vpop.f32.mrf.mxu0 }
 0x280   : > { %v2828_v9 = vpop.f32.mrf.mxu1 }
 0x281   : > { %v8727_v19 = vadd.f32 %v2828_v9, %v2714_v38  ;;  %v7330_v39 = vpop.f32.mrf.mxu0 }
 0x282   : > { %v8729_v36 = vpop.f32.mrf.mxu1 }
 0x283   : > { %v2974_v63 = vpop.f32.mrf.mxu0 }
 0x284   : > { %v8731_v43 = vpop.f32.mrf.mxu1 }
 0x285   : > { %v7333_v33 = vpop.f32.mrf.mxu0 }
 0x286   : > { %v7341_v55 = vpop.f32.mrf.mxu1 }
 0x287   : > { %v3107_v47 = vadd.f32 %v7341_v55, %v7327_v17  ;;  %v2994_v41 = vpop.f32.mrf.mxu0 }
 0x288   : > { %v3100_v0 = vpop.f32.mrf.mxu1 }
 0x289   : > { %v3101_v54 = vadd.f32 %v3100_v0, %v2954_v7  ;;  %v7336_v46 = vpop.f32.mrf.mxu0 }
 0x28a   : > { %v7344_v57 = vpop.f32.mrf.mxu1 }
 0x28b   : > { %v3119_v40 = vadd.f32 %v7344_v57, %v7330_v39  ;;  %v8733_v35 = vpop.f32.mrf.mxu0 }
 0x28c   : > { %v3112_v18 = vpop.f32.mrf.mxu1 }
 0x28d   : > { %v3113_v50 = vadd.f32 %v3112_v18, %v2974_v63  ;;  %v7355_v27 = vpop.f32.mrf.mxu0 }
 0x28e   : > { %v7347_v59 = vpop.f32.mrf.mxu1  ;;  %v3224_v53 = vadd.f32 %v7355_v27, %v3107_v47 }
 0x28f   : > { %v3216_v48 = vpop.f32.mrf.mxu0 }
 0x290   : > { %v3124_v60 = vpop.f32.mrf.mxu1  ;;  %v3217_v5 = vadd.f32 %v3216_v48, %v3101_v54  ;;  %v8741_v54 = vpop.permute.xlu0 %3677 }
 0x291   : > { %v3125_v4 = vadd.f32 %v3124_v60, %v2994_v41  ;;  %v7358_v44 = vpop.f32.mrf.mxu0  ;;  %v3673_v48 = vpop.permute.xlu1 %3672 }
 0x292   : > { %v7350_v29 = vpop.f32.mrf.mxu1  ;;  %v3238_v21 = vadd.f32 %v7358_v44, %v3119_v40  ;;  %v3131_v44 = vadd.f32 %v7347_v59, %v7333_v33 }
 0x293   : > { %v3230_v49 = vpop.f32.mrf.mxu0 }
 0x294   : > { %v8735_v31 = vpop.f32.mrf.mxu1  ;;  %v3231_v20 = vadd.f32 %v3230_v49, %v3113_v50 }
 0x295   : > { %v7361_v62 = vpop.f32.mrf.mxu0 }
 0x296   : > { %v7369_v15 = vpop.f32.mrf.mxu1 }
 0x297   : > { %v3348_v25 = vadd.f32 %v7369_v15, %v3224_v53  ;;  %v3244_v16 = vpop.f32.mrf.mxu0  ;;  %v3252_v15 = vadd.f32 %v7361_v62, %v3131_v44 }
 0x298   : > { %v3245_v58 = vadd.f32 %v3244_v16, %v3125_v4  ;;  %v3339_v3 = vpop.f32.mrf.mxu1  ;;  %v3663_v4 = vpop.permute.xlu0 %3662 }
 0x299   : > { %v3340_v61 = vadd.f32 %v3339_v3, %v3217_v5  ;;  %v7364_v24 = vpop.f32.mrf.mxu0 }
 0x29a   : > { %v7372_v38 = vpop.f32.mrf.mxu1 }
 0x29b   : > { %v3364_v1 = vadd.f32 %v7372_v38, %v3238_v21  ;;  %v8737_v6 = vpop.f32.mrf.mxu0 }
 0x29c   : > { %v3355_v17 = vpop.f32.mrf.mxu1 }
 0x29d   : > { %v3356_v13 = vadd.f32 %v3355_v17, %v3231_v20  ;;  %v7383_v7 = vpop.f32.mrf.mxu0  ;;  %v3668_v17 = vpop.permute.xlu1 %3667 }
 0x29e   : > { %v7375_v9 = vpop.f32.mrf.mxu1  ;;  %v3476_v39 = vadd.f32 %v7383_v7, %v3348_v25 }
 0x29f   : > { %v3469_v63 = vpop.f32.mrf.mxu0  ;;  %v3380_v38 = vadd.f32 %v7375_v9, %v3252_v15 }
 0x2a0   : > { %v3371_v55 = vpop.f32.mrf.mxu1  ;;  %v3470_v47 = vadd.f32 %v3469_v63, %v3340_v61  ;;  %v3143_v61 = vadd.f32 %v7350_v29, %v7336_v46 }
 0x2a1   : > { %v3372_v41 = vadd.f32 %v3371_v55, %v3245_v58  ;;  %v7386_v0 = vpop.f32.mrf.mxu0 }
 0x2a2   : > { %v7378_v57 = vpop.f32.mrf.mxu1  ;;  %v3488_v40 = vadd.f32 %v7386_v0, %v3364_v1  ;;  %v3266_v63 = vadd.f32 %v7364_v24, %v3143_v61 }
 0x2a3   : > { %v3481_v18 = vpop.f32.mrf.mxu0 }
 0x2a4   : > { %v3387_v50 = vpop.f32.mrf.mxu1  ;;  %v3482_v27 = vadd.f32 %v3481_v18, %v3356_v13  ;;  %v3396_v46 = vadd.f32 %v7378_v57, %v3266_v63 }
 0x2a5   : > { %v7389_v60 = vpop.f32.mrf.mxu0 }
 0x2a6   : > { %v7397_v53 = vpop.f32.mrf.mxu1  ;;  %v3500_v33 = vadd.f32 %v7389_v60, %v3380_v38 }
 0x2a7   : > { %v3590_v5 = vadd.f32 %v7397_v53, %v3476_v39  ;;  %v3493_v16 = vpop.f32.mrf.mxu0  ;;  %v3653_v39 = vpop.permute.xlu0 %3652 }
 0x2a8   : > { %v3583_v21 = vpop.f32.mrf.mxu1  ;;  %v3494_v29 = vadd.f32 %v3493_v16, %v3372_v41  ;;  %v3658_v53 = vpop.permute.xlu1 %3657 }
 0x2a9   : > { %v3630_v49 = vadd.f32 %v3590_v5, %v8713_v8  ;;  %v3584_v20 = vadd.f32 %v3583_v21, %v3470_v47  ;;  %v2482_v8 = vadd.f32 %v8707_v51, %v8705_v12  ;;  %v7392_v55 = vpop.f32.mrf.mxu0 }
 0x2aa   : > { %v7400_v25 = vpop.f32.mrf.mxu1 }
 0x2ab   : > { %v3629_v58 = vadd.f32 %v3584_v20, %v8715_v34  ;;  %v3602_v3 = vadd.f32 %v7400_v25, %v3488_v40  ;;  %v8748_v62 = vadd.f32 %v3653_v39, %v3630_v49  ;;  %v3512_v40 = vadd.f32 %v7392_v55, %v3396_v46  ;;  %v3505_v49 = vpop.f32.mrf.mxu0 }
 0x2ac   : > { %v3595_v1 = vpop.f32.mrf.mxu1 }
 0x2ad   : > { %v3632_v13 = vadd.f32 %v3602_v3, %v8719_v52  ;;  %v3596_v7 = vadd.f32 %v3595_v1, %v3482_v27  ;;  %v2613_v52 = vadd.f32 %v8709_v10, %v2482_v8  ;;  %v3800_v60 = vand.u32 2139095040, %v8748_v62 }
 0x2ae   : > { %v7403_v59 = vpop.f32.mrf.mxu1 }
 0x2af   : > { %v8750_v47 = vadd.f32 %v3663_v4, %v3632_v13  ;;  %v3631_v34 = vadd.f32 %v3596_v7, %v8723_v11  ;;  %v3614_v9 = vadd.f32 %v7403_v59, %v3500_v33  ;;  %v2732_v51 = vadd.f32 %v8717_v45, %v2613_v52 }
 0x2b0   : > { %v3607_v0 = vpop.f32.mrf.mxu1  ;;  %v3137_v11 = vadd.f32 %v8735_v31, %v8733_v35  ;;  %v3801_v45 = vshrl.u32 %v3800_v60, 23  ;;  %v3648_v31 = vpop.permute.xlu1 %3647 }
 0x2b1   : > { %v4008_v24 = vand.u32 2139095040, %v8750_v47  ;;  %v3634_v18 = vadd.f32 %v3614_v9, %v8725_v37  ;;  %v3608_v27 = vadd.f32 %v3607_v0, %v3494_v29  ;;  %v2847_v4 = vadd.f32 %v8729_v36, %v2732_v51 }
 0x2b2   : > { %v7406_v12 = vpop.f32.mrf.mxu1  ;;  %v3259_v37 = vadd.f32 %v8737_v6, %v3137_v11  ;;  %v8766_v20 = vadd.f32 %v3658_v53, %v3631_v34  ;;  %v2726_v6 = vadd.f32 %v8721_v23, %v8711_v56  ;;  %v6740_v38 = vadd.s32 4294967169, %v3801_v45 }
 0x2b3   : > { %v4009_v5 = vshrl.u32 %v4008_v24, 23  ;;  %v8760_v41 = vadd.f32 %v3673_v48, %v3634_v18  ;;  %v3633_v10 = vadd.f32 %v3608_v27, %v8727_v19  ;;  %v3626_v57 = vadd.f32 %v7406_v12, %v3512_v40 }
 0x2b4   : > { %v3388_v25 = vadd.f32 %v3387_v50, %v3259_v37  ;;  %v3619_v48 = vpop.f32.mrf.mxu1  ;;  %v8770_v19 = vadd.f32 %v3648_v31, %v3629_v58  ;;  %v3904_v1 = vand.u32 2139095040, %v8766_v20  ;;  %v2841_v39 = vadd.f32 %v8731_v43, %v2726_v6 }
 0x2b5   : > { %v6748_v44 = vadd.s32 4294967169, %v4009_v5  ;;  %v4216_v21 = vand.u32 2139095040, %v8760_v41  ;;  %v3636_v15 = vadd.f32 %v3626_v57, %v2847_v4  ;;  %v8768_v35 = vadd.f32 %v3668_v17, %v3633_v10 }
 0x2b6   : > { %v3506_v36 = vadd.f32 %v3505_v49, %v3388_v25  ;;  %v3696_v63 = vand.u32 2139095040, %v8770_v19  ;;  %v3807_v23 = vadd.s32 1, %v6740_v38  ;;  %v3905_v33 = vshrl.u32 %v3904_v1, 23 }
 0x2b7   : > { %v4217_v16 = vshrl.u32 %v4216_v21, 23  ;;  %v4015_v3 = vadd.s32 1, %v6748_v44  ;;  %v8776_v13 = vadd.f32 %v8739_v14, %v3636_v15  ;;  %v4112_v17 = vand.u32 2139095040, %v8768_v35 }
 0x2b8   : > { %v3620_v7 = vadd.f32 %v3619_v48, %v3506_v36  ;;  %v3697_v43 = vshrl.u32 %v3696_v63, 23  ;;  %vm3808_vm9 = vcmp.gt.s32.totalorder %v3807_v23, 0  ;;  %v6744_v0 = vadd.s32 4294967169, %v3905_v33 }
 0x2b9   : > { %v6756_v61 = vadd.s32 4294967169, %v4217_v16  ;;  %v4424_v58 = vand.u32 2139095040, %v8776_v13  ;;  %vm4016_vm2 = vcmp.gt.s32.totalorder %v4015_v3, 0  ;;  %v4421_v56 = vand.u32 2147483647, %v8776_v13 }
 0x2ba   : > { %v3635_v8 = vadd.f32 %v3620_v7, %v2841_v39  ;;  %v4113_v14 = vshrl.u32 %v4112_v17, 23  ;;  %v4017_v55 = vsel %vm4016_vm2, %v4015_v3, 0  ;;  %v8797_v53 = vsel %vm3808_vm9, %v3807_v23, 0 }
 0x2bb   : > { %v4223_v50 = vadd.s32 1, %v6756_v61  ;;  %v4425_v59 = vshrl.u32 %v4424_v58, 23  ;;  %v4428_v9 = vand.u32 8388607, %v4421_v56  ;;  %v8791_v40 = vand.u32 31, %v4017_v55 }
 0x2bc   : > { %v8786_v29 = vadd.f32 %v8741_v54, %v3635_v8  ;;  %v6752_v27 = vadd.s32 4294967169, %v4113_v14  ;;  %v8799_v60 = vadd.s32 4294967169, %v3697_v43  ;;  %v4005_v11 = vand.u32 2147483647, %v8750_v47 }
 0x2bd   : > { %vm4224_vm4 = vcmp.gt.s32.totalorder %v4223_v50, 0  ;;  %v6764_v46 = vadd.s32 4294967169, %v4425_v59  ;;  %v4429_v51 = vor.u32 8388608, %v4428_v9  ;;  %v8802_v10 = vshrl.u32 %v4017_v55, 5 }
 0x2be   : > { %v8783_v34 = vsel %vm4224_vm4, %v4223_v50, 0  ;;  %v4320_v24 = vand.u32 2139095040, %v8786_v29  ;;  %v4317_v12 = vand.u32 2147483647, %v8786_v29  ;;  %v8804_v57 = vadd.s32 1, %v6744_v0 }
 0x2bf   : > { %v4431_v52 = vadd.s32 1, %v6764_v46  ;;  %v8794_v18 = vand.u32 31, %v8783_v34  ;;  %v8807_v44 = vsub.s32 32, %v8791_v40  ;;  %v8812_v45 = vadd.s32 1, %v6752_v27 }
 0x2c0   : > { %v4321_v54 = vshrl.u32 %v4320_v24, 23  ;;  %v8816_v49 = vand.u32 8388607, %v4317_v12  ;;  %v8818_v31 = vshll.u32 %v4429_v51, 8  ;;  %vm8912_vm2 = vcmp.le.f32.partialorder %v4421_v56, 0.7853982 }
 0x2c1   : > { %vm4432_vm10 = vcmp.gt.s32.totalorder %v4431_v52, 0  ;;  %v8810_v21 = vsub.s32 32, %v8794_v18  ;;  %vm4120_vm7 = vcmp.gt.s32.totalorder %v8812_v45, 0  ;;  %vm4423_vm4 = vcmp.lt.s32.totalorder %v8776_v13, 0 }
 0x2c2   : > { %v4433_v5 = vsel %vm4432_vm10, %v4431_v52, 0  ;;  %v6760_v37 = vadd.s32 4294967169, %v4321_v54  ;;  %vm3912_vm9 = vcmp.gt.s32.totalorder %v8804_v57, 0 }
 0x2c3   : > { %v4435_v4 = vand.u32 31, %v4433_v5  ;;  %v4434_v15 = vshrl.u32 %v4433_v5, 5 }
 0x2c4   : > { %v4327_v16 = vadd.s32 1, %v6760_v37 }
 0x2c5   : > { %v4436_v25 = vsub.s32 32, %v4435_v4  ;;  %v4438_v48 = vshll.u32 %v11180_v22, %v4435_v4  ;;  %v4441_v3 = vshll.u32 %v11177_v26, %v4435_v4  ;;  %v4444_v36 = vshll.u32 %v11175_v28, %v4435_v4 }
 0x2c6   : > { %v4447_v61 = vshll.u32 %v11173_v30, %v4435_v4  ;;  %vm4328_vm11 = vcmp.gt.s32.totalorder %v4327_v16, 0  ;;  %v4450_v1 = vshll.u32 %v11195_v32, %v4435_v4  ;;  %vm4453_vm12 = vcmp.lt.s32.totalorder %v4434_v15, 1 }
 0x2c7   : > { %v4439_v6 = vshrl.u32 %v11177_v26, %v4436_v25  ;;  %v4442_v38 = vshrl.u32 %v11175_v28, %v4436_v25  ;;  %v4329_v50 = vsel %vm4328_vm11, %v4327_v16, 0  ;;  %v4445_v17 = vshrl.u32 %v11173_v30, %v4436_v25 }
 0x2c8   : > { %v4448_v7 = vshrl.u32 %v11195_v32, %v4436_v25  ;;  %v4451_v39 = vshrl.u32 %v11165_v42, %v4436_v25  ;;  %v4331_v58 = vand.u32 31, %v4329_v50  ;;  %v4437_v63 = vshrl.u32 %v11180_v22, %v4436_v25 }
 0x2c9   : > { %v4440_v23 = vor.u32 %v4439_v6, %v4438_v48  ;;  %v4443_v33 = vor.u32 %v4442_v38, %v4441_v3  ;;  %v4446_v59 = vor.u32 %v4445_v17, %v4444_v36  ;;  %vm4455_vm13 = vcmp.lt.s32.totalorder %v4434_v15, 3 }
 0x2ca   : > { %v4449_v8 = vor.u32 %v4448_v7, %v4447_v61  ;;  %v4452_v14 = vor.u32 %v4451_v39, %v4450_v1  ;;  %v4332_v55 = vsub.s32 32, %v4331_v58  ;;  %vm4456_vm14 = vcmp.lt.s32.totalorder %v4434_v15, 4 }
 0x2cb   : > { %v4457_v46 = vsel %vm4453_vm12, %v4437_v63, %v4440_v23  ;;  %v4458_v43 = vsel %vm4456_vm14, %v4446_v59, 2102212464  ;;  %v4461_v9 = vsel %vm4453_vm12, %v4440_v23, %v4443_v33  ;;  %v4465_v52 = vsel %vm4453_vm12, %v4443_v33, %v4446_v59 }
 0x2cc   : > { %v4462_v0 = vsel %vm4456_vm14, %v4449_v8, 920167782  ;;  %vm4454_vm15 = vcmp.lt.s32.totalorder %v4434_v15, 2  ;;  %v4459_v24 = vsel %vm4455_vm13, %v4443_v33, %v4458_v43  ;;  %v4466_v54 = vsel %vm4456_vm14, %v4452_v14, 1326507024 }
 0x2cd   : > { %v4463_v27 = vsel %vm4455_vm13, %v4446_v59, %v4462_v0  ;;  %v4330_v51 = vshrl.u32 %v4329_v50, 5  ;;  %v4460_v5 = vsel %vm4454_vm15, %v4457_v46, %v4459_v24  ;;  %v4467_v37 = vsel %vm4455_vm13, %v4449_v8, %v4466_v54 }
 0x2ce   : > { %v4464_v4 = vsel %vm4454_vm15, %v4461_v9, %v4463_v27  ;;  %v4468_v25 = vsel %vm4454_vm15, %v4465_v52, %v4467_v37  ;;  %v4334_v3 = vshll.u32 %v11180_v22, %v4331_v58  ;;  %v4335_v15 = vshrl.u32 %v11177_v26, %v4332_v55 }
 0x2cf   : > { %v8832_v16 = vmul.u32.u64.low %v8818_v31, %v4464_v4  ;;  %v8833_v48 = vmul.u32.u64.high %v8818_v31, %v4464_v4, %v8832_v16  ;;  %v8838_v36 = vmul.u32.u64.low %v8818_v31, %v4468_v25  ;;  %v8839_v61 = vmul.u32.u64.high %v8818_v31, %v4468_v25, %v8838_v36 }
 0x2d0   : > { %v4337_v6 = vshll.u32 %v11177_v26, %v4331_v58  ;;  %v4338_v38 = vshrl.u32 %v11175_v28, %v4332_v55  ;;  %v4340_v1 = vshll.u32 %v11175_v28, %v4331_v58  ;;  %v4341_v50 = vshrl.u32 %v11173_v30, %v4332_v55 }
 0x2d1   : > { %v4343_v17 = vshll.u32 %v11173_v30, %v4331_v58  ;;  %v4336_v7 = vor.u32 %v4335_v15, %v4334_v3  ;;  %v4344_v39 = vshrl.u32 %v11195_v32, %v4332_v55  ;;  %v4346_v63 = vshll.u32 %v11195_v32, %v4331_v58 }
 0x2d2   : > { %v4347_v23 = vshrl.u32 %v11165_v42, %v4332_v55  ;;  %v4479_v33 = vadd.s32 1, %v8833_v48  ;;  %v4339_v59 = vor.u32 %v4338_v38, %v4337_v6  ;;  %v4342_v8 = vor.u32 %v4341_v50, %v4340_v1 }
 0x2d3   : > { %v4213_v14 = vand.u32 2147483647, %v8760_v41  ;;  %v4476_v46 = vmul.u32 %v8818_v31, %v4460_v5  ;;  %vm4478_vm0 = vc.u32 %v8839_v61, %v8832_v16  ;;  %v4345_v43 = vor.u32 %v4344_v39, %v4343_v17 }
 0x2d4   : > { %v4348_v9 = vor.u32 %v4347_v23, %v4346_v63  ;;  %v4480_v0 = vsel %vm4478_vm0, %v4479_v33, %v8833_v48  ;;  %v4325_v52 = vor.u32 8388608, %v8816_v49  ;;  %v4333_v58 = vshrl.u32 %v11180_v22, %v4332_v55 }
 0x2d5   : > { %vm4349_vm1 = vcmp.lt.s32.totalorder %v4330_v51, 1  ;;  %v4481_v24 = vadd.s32 %v4480_v0, %v4476_v46  ;;  %vm4351_vm3 = vcmp.lt.s32.totalorder %v4330_v51, 3  ;;  %vm4352_vm5 = vcmp.lt.s32.totalorder %v4330_v51, 4 }
 0x2d6   : > { %v4357_v27 = vsel %vm4349_vm1, %v4336_v7, %v4339_v59  ;;  %v4354_v54 = vsel %vm4352_vm5, %v4342_v8, 2102212464  ;;  %v4358_v4 = vsel %vm4352_vm5, %v4345_v43, 920167782  ;;  %v4361_v31 = vsel %vm4349_vm1, %v4339_v59, %v4342_v8 }
 0x2d7   : > { %v4362_v5 = vsel %vm4352_vm5, %v4348_v9, 1326507024  ;;  %v4482_v37 = vadd.s32 536870912, %v4481_v24  ;;  %vm4350_vm6 = vcmp.lt.s32.totalorder %v4330_v51, 2  ;;  %v4359_v25 = vsel %vm4351_vm3, %v4342_v8, %v4358_v4 }
 0x2d8   : > { %v4363_v48 = vsel %vm4351_vm3, %v4345_v43, %v4362_v5  ;;  %v4360_v49 = vsel %vm4350_vm6, %v4357_v27, %v4359_v25  ;;  %v4365_v3 = vshll.u32 %v4325_v52, 8  ;;  %v8866_v36 = vshrl.u32 %v8783_v34, 5 }
 0x2d9   : > { %v4364_v55 = vsel %vm4350_vm6, %v4361_v31, %v4363_v48  ;;  %v4483_v15 = vshrl.u32 %v4482_v37, 30  ;;  %v4353_v6 = vsel %vm4349_vm1, %v4333_v58, %v4336_v7  ;;  %v4355_v38 = vsel %vm4351_vm3, %v4339_v59, %v4354_v54 }
 0x2da   : > { %v8870_v1 = vmul.u32.u64.low %v4365_v3, %v4364_v55  ;;  %v8871_v50 = vmul.u32.u64.high %v4365_v3, %v4364_v55, %v8870_v1  ;;  %v8873_v17 = vmul.u32.u64.low %v4365_v3, %v4360_v49  ;;  %v8874_v39 = vmul.u32.u64.high %v4365_v3, %v4360_v49, %v8873_v17 }
 0x2db   : > { %v8878_v63 = vsel %vm4120_vm7, %v8812_v45, 0  ;;  %v4484_v23 = vshll.u32 %v4483_v15, 30  ;;  %v4220_v34 = vand.u32 8388607, %v4213_v14  ;;  %v4234_v33 = vshrl.u32 %v11175_v28, %v8810_v21 }
 0x2dc   : > { %v4356_v7 = vsel %vm4350_vm6, %v4353_v6, %v4355_v38  ;;  %v4230_v59 = vshll.u32 %v11180_v22, %v8794_v18  ;;  %v4231_v8 = vshrl.u32 %v11177_v26, %v8810_v21  ;;  %v4237_v46 = vshrl.u32 %v11173_v30, %v8810_v21 }
 0x2dd   : > { %v8891_v45 = vsub.s32 %v4481_v24, %v4484_v23  ;;  %v4507_v43 = vsub.s32 4, %v4483_v15  ;;  %v4233_v9 = vshll.u32 %v11177_v26, %v8794_v18  ;;  %v4240_v0 = vshrl.u32 %v11195_v32, %v8810_v21 }
 0x2de   : > { %vm4374_vm8 = vc.u32 %v8871_v50, %v8873_v17  ;;  %v4375_v51 = vadd.s32 1, %v8874_v39  ;;  %v4236_v52 = vshll.u32 %v11175_v28, %v8794_v18  ;;  %v4239_v58 = vshll.u32 %v11173_v30, %v8794_v18 }
 0x2df   : > { %v4487_v24 = vsub.s32 0, %v8891_v45  ;;  %v4372_v27 = vmul.u32 %v4365_v3, %v4356_v7  ;;  %v4235_v54 = vor.u32 %v4234_v33, %v4233_v9  ;;  %v4242_v4 = vshll.u32 %v11195_v32, %v8794_v18 }
 0x2e0   : > { %v4376_v31 = vsel %vm4374_vm8, %v4375_v51, %v8874_v39  ;;  %v4238_v5 = vor.u32 %v4237_v46, %v4236_v52  ;;  %v4241_v37 = vor.u32 %v4240_v0, %v4239_v58  ;;  %v4243_v25 = vshrl.u32 %v11165_v42, %v8810_v21 }
 0x2e1   : > { %v6765_v49 = vmin.u32 %v4487_v24, %v8891_v45  ;;  %v4377_v55 = vadd.s32 %v4376_v31, %v4372_v27  ;;  %v8920_v18 = vand.u32 31, %v8878_v63  ;;  %v4229_v3 = vshrl.u32 %v11180_v22, %v8810_v21 }
 0x2e2   : > { %v4232_v6 = vor.u32 %v4231_v8, %v4230_v59  ;;  %v4244_v38 = vor.u32 %v4243_v25, %v4242_v4  ;;  %v4221_v56 = vor.u32 8388608, %v4220_v34  ;;  %vm4245_vm10 = vcmp.lt.s32.totalorder %v8866_v36, 1 }
 0x2e3   : > { %v4489_v1 = vclz %v6765_v49  ;;  %vm4248_vm11 = vcmp.lt.s32.totalorder %v8866_v36, 4  ;;  %v4508_v39 = vsel %vm4423_vm4, %v4507_v43, %v4483_v15  ;;  %v4378_v23 = vadd.s32 536870912, %v4377_v55 }
 0x2e4   : > { %v4254_v33 = vsel %vm4248_vm11, %v4241_v37, 920167782  ;;  %v4257_v7 = vsel %vm4245_vm10, %v4235_v54, %v4238_v5  ;;  %vm4246_vm12 = vcmp.lt.s32.totalorder %v8866_v36, 2  ;;  %vm4247_vm13 = vcmp.lt.s32.totalorder %v8866_v36, 3 }
 0x2e5   : > { %v6766_v46 = vadd.s32 4294967294, %v4489_v1  ;;  %v4258_v21 = vsel %vm4248_vm11, %v4244_v38, 1326507024  ;;  %v4379_v34 = vshrl.u32 %v4378_v23, 30  ;;  %v4253_v59 = vsel %vm4245_vm10, %v4232_v6, %v4235_v54 }
 0x2e6   : > { %v4255_v15 = vsel %vm4247_vm13, %v4238_v5, %v4254_v33  ;;  %v4259_v8 = vsel %vm4247_vm13, %v4241_v37, %v4258_v21  ;;  %v4477_v43 = vadd.s32 %v8832_v16, %v8839_v61  ;;  %v4510_v9 = vsel %vm8912_vm2, 0, %v4508_v39 }
 0x2e7   : > { %vm6767_vm14 = vcmp.lt.s32.totalorder %v6766_v46, 0  ;;  %v4260_v0 = vsel %vm4246_vm12, %v4257_v7, %v4259_v8  ;;  %v4380_v52 = vshll.u32 %v4379_v34, 30  ;;  %v4249_v58 = vsel %vm4245_vm10, %v4229_v3, %v4232_v6 }
 0x2e8   : > { %v4492_v51 = vsel %vm6767_vm14, 0, %v6766_v46  ;;  %v4261_v24 = vshll.u32 %v4221_v56, 8  ;;  %v4250_v31 = vsel %vm4248_vm11, %v4238_v5, 2102212464  ;;  %v4256_v16 = vsel %vm4246_vm12, %v4253_v59, %v4255_v15 }
 0x2e9   : > { %v4493_v27 = vsub.s32 32, %v4492_v51  ;;  %v4497_v4 = vsub.s32 4294967266, %v4492_v51  ;;  %v8954_v61 = vsub.s32 %v4377_v55, %v4380_v52  ;;  %v11164_v49 = vand.u32 2147483647, %v8768_v35 }
 0x2ea   : > { %v8956_v37 = vmul.u32.u64.low %v4261_v24, %v4260_v0  ;;  %v8957_v25 = vmul.u32.u64.high %v4261_v24, %v4260_v0, %v8956_v37  ;;  %v4494_v38 = vshll.u32 %v8891_v45, %v4492_v51  ;;  %v4403_v6 = vsub.s32 4, %v4379_v34 }
 0x2eb   : > { %v4495_v1 = vshrl.u32 %v4477_v43, %v4493_v27  ;;  %v4498_v3 = vadd.s32 127, %v4497_v4  ;;  %v4383_v56 = vsub.s32 0, %v8954_v61  ;;  %v4251_v5 = vsel %vm4247_vm13, %v4235_v54, %v4250_v31 }
 0x2ec   : > { %v8964_v39 = vmul.u32.u64.low %v4261_v24, %v4256_v16  ;;  %v8965_v23 = vmul.u32.u64.high %v4261_v24, %v4256_v16, %v8964_v39  ;;  %v8971_v55 = vsel %vm3912_vm9, %v8804_v57, 0  ;;  %v4514_v45 = vadd.s32 3, %v4510_v9 }
 0x2ed   : > { %v4496_v33 = vor.u32 %v4495_v1, %v4494_v38  ;;  %v4499_v7 = vshll.u32 %v4498_v3, 23  ;;  %v8974_v46 = vshrl.u32 %v8878_v63, 5  ;;  %vm4319_vm15 = vcmp.lt.s32.totalorder %v8786_v29, 0 }
 0x2ee   : > { %v6761_v21 = vmin.u32 %v4383_v56, %v8954_v61  ;;  %v8980_v54 = vand.u32 8388607, %v11164_v49  ;;  %v8983_v59 = vsub.s32 32, %v8920_v18  ;;  %v8987_v57 = vsel %vm4319_vm15, %v4403_v6, %v4379_v34 }
 0x2ef   : > { %v4500_v15 = vor.u32 4788187, %v4499_v7  ;;  %v4252_v63 = vsel %vm4246_vm12, %v4249_v58, %v4251_v5  ;;  %vm8993_vm0 = vcmp.le.f32.partialorder %v4317_v12, 0.7853982  ;;  %v4373_v43 = vadd.s32 %v8873_v17, %v8871_v50 }
 0x2f0   : > { %v4385_v9 = vclz %v6761_v21  ;;  %vm4270_vm1 = vc.u32 %v8957_v25, %v8964_v39  ;;  %v4503_v51 = vcvt.s32.f32 %v4496_v33  ;;  %v9001_v34 = vand.u32 3, %v4514_v45 }
 0x2f1   : > { %v4501_v0 = vand.u32 2147483647, %v4500_v15  ;;  %v4271_v36 = vadd.s32 1, %v8965_v23  ;;  %v4406_v12 = vsel %vm8993_vm0, 0, %v8987_v57  ;;  %v4268_v58 = vmul.u32 %v4261_v24, %v4252_v63 }
 0x2f2   : > { %v6762_v52 = vadd.s32 4294967294, %v4385_v9  ;;  %v4117_v27 = vor.u32 8388608, %v8980_v54  ;;  %v4126_v17 = vshll.u32 %v11180_v22, %v8920_v18  ;;  %v4127_v31 = vshrl.u32 %v11177_v26, %v8983_v59 }
 0x2f3   : > { %v4504_v4 = vmul.f32 %v4503_v51, %v4501_v0  ;;  %v4272_v50 = vsel %vm4270_vm1, %v4271_v36, %v8965_v23  ;;  %vm4215_vm5 = vcmp.lt.s32.totalorder %v8760_v41, 0  ;;  %v4129_v37 = vshll.u32 %v11177_v26, %v8920_v18 }
 0x2f4   : > { %vm6763_vm3 = vcmp.lt.s32.totalorder %v6762_v52, 0  ;;  %v4273_v16 = vadd.s32 %v4272_v50, %v4268_v58  ;;  %v4130_v24 = vshrl.u32 %v11175_v28, %v8983_v59  ;;  %v4133_v3 = vshrl.u32 %v11173_v30, %v8983_v59 }
 0x2f5   : > { %v4505_v38 = vxor.u32 2147483648, %v4504_v4  ;;  %v4388_v1 = vsel %vm6763_vm3, 0, %v6762_v52  ;;  %v4136_v6 = vshrl.u32 %v11195_v32, %v8983_v59  ;;  %v4132_v33 = vshll.u32 %v11175_v28, %v8920_v18 }
 0x2f6   : > { %v4389_v56 = vsub.s32 32, %v4388_v1  ;;  %v4393_v5 = vsub.s32 4294967266, %v4388_v1  ;;  %v4274_v23 = vadd.s32 536870912, %v4273_v16  ;;  %v4390_v45 = vshll.u32 %v8954_v61, %v4388_v1 }
 0x2f7   : > { %v4506_v7 = vsel %vm4423_vm4, %v4505_v38, %v4504_v4  ;;  %vm9029_vm6 = vcmp.le.f32.partialorder %v4213_v14, 0.7853982  ;;  %v4135_v15 = vshll.u32 %v11173_v30, %v8920_v18  ;;  %v4139_v57 = vshrl.u32 %v11165_v42, %v8983_v59 }
 0x2f8   : > { %v4509_v63 = vsel %vm8912_vm2, %v8776_v13, %v4506_v7  ;;  %v4391_v9 = vshrl.u32 %v4373_v43, %v4389_v56  ;;  %v4394_v0 = vadd.s32 127, %v4393_v5  ;;  %v4275_v51 = vshrl.u32 %v4274_v23, 30 }
 0x2f9   : > { %7645 = vcosq.f32 %v4509_v63  ;;  %v4134_v61 = vor.u32 %v4133_v3, %v4132_v33  ;;  %v4137_v36 = vor.u32 %v4136_v6, %v4135_v15  ;;  %v4138_v14 = vshll.u32 %v11195_v32, %v8920_v18 }
 0x2fa   : > { %7647 = vsinq.f32 %v4509_v63  ;;  %v4392_v52 = vor.u32 %v4391_v9, %v4390_v45  ;;  %v4395_v58 = vshll.u32 %v4394_v0, 23  ;;  %v4276_v4 = vshll.u32 %v4275_v51, 30 }
 0x2fb   : > { %v4299_v50 = vsub.s32 4, %v4275_v51  ;;  %v4128_v38 = vor.u32 %v4127_v31, %v4126_v17  ;;  %v4131_v1 = vor.u32 %v4130_v24, %v4129_v37  ;;  %v4140_v49 = vor.u32 %v4139_v57, %v4138_v14 }
 0x2fc   : > { %v4396_v42 = vor.u32 4788187, %v4395_v58  ;;  %v9042_v48 = vsub.s32 %v4273_v16, %v4276_v4  ;;  %vm4141_vm7 = vcmp.lt.s32.totalorder %v8974_v46, 1  ;;  %vm4144_vm8 = vcmp.lt.s32.totalorder %v8974_v46, 4 }
 0x2fd   : > { %v4300_v43 = vsel %vm4215_vm5, %v4299_v50, %v4275_v51  ;;  %vm4142_vm2 = vcmp.lt.s32.totalorder %v8974_v46, 2  ;;  %vm4143_vm4 = vcmp.lt.s32.totalorder %v8974_v46, 3  ;;  %v4150_v18 = vsel %vm4144_vm8, %v4137_v36, 920167782 }
 0x2fe   : > { %v4397_v3 = vand.u32 2147483647, %v4396_v42  ;;  %v4399_v6 = vcvt.s32.f32 %v4392_v52  ;;  %v4279_v17 = vsub.s32 0, %v9042_v48  ;;  %v4146_v31 = vsel %vm4144_vm8, %v4134_v61, 2102212464 }
 0x2ff   : > { %v4149_v16 = vsel %vm4141_vm7, %v4128_v38, %v4131_v1  ;;  %v4151_v37 = vsel %vm4143_vm4, %v4134_v61, %v4150_v18  ;;  %v4153_v24 = vsel %vm4141_vm7, %v4131_v1, %v4134_v61  ;;  %v4154_v56 = vsel %vm4144_vm8, %v4140_v49, 1326507024 }
 0x300   : > { %v4400_v5 = vmul.f32 %v4399_v6, %v4397_v3  ;;  %v6757_v23 = vmin.u32 %v4279_v17, %v9042_v48  ;;  %v4302_v42 = vsel %vm9029_vm6, 0, %v4300_v43  ;;  %v4155_v33 = vsel %vm4143_vm4, %v4137_v36, %v4154_v56 }
 0x301   : > { %v9063_v7 = vand.u32 31, %v8971_v55  ;;  %v4410_v45 = vadd.s32 3, %v4406_v12  ;;  %v4125_v15 = vshrl.u32 %v11180_v22, %v8983_v59  ;;  %v4156_v57 = vsel %vm4142_vm2, %v4153_v24, %v4155_v33 }
 0x302   : > { %vm4516_vm9 = vcmp.lt.s32.totalorder %v9001_v34, 2  ;;  %v4401_v49 = vxor.u32 2147483648, %v4400_v5  ;;  %v4281_v63 = vclz %v6757_v23  ;;  %v4152_v9 = vsel %vm4142_vm2, %v4149_v16, %v4151_v37 }
 0x303   : > { %v4157_v0 = vshll.u32 %v4117_v27, 8  ;;  %vm4513_vm10 = vweird.f32 %v8776_v13  ;;  %vm4517_vm11 = vcmp.eq.s32.totalorder %v9001_v34, 0  ;;  %v4306_v12 = vadd.s32 3, %v4302_v42 }
 0x304   : > { %v4145_v59 = vsel %vm4141_vm7, %v4125_v15, %v4128_v38  ;;  %v4147_v51 = vsel %vm4143_vm4, %v4131_v1, %v4146_v31  ;;  %v4402_v61 = vsel %vm4319_vm15, %v4401_v49, %v4400_v5  ;;  %v6758_v36 = vadd.s32 4294967294, %v4281_v63 }
 0x305   : > { %v9082_v14 = vmul.u32.u64.low %v4157_v0, %v4156_v57  ;;  %v9083_v52 = vmul.u32.u64.high %v4157_v0, %v4156_v57, %v9082_v14  ;;  %vm4520_vm12 = vcmp.eq.s32.totalorder %v9001_v34, 2  ;;  %v4405_v54 = vsel %vm8993_vm0, %v8786_v29, %v4402_v61 }
 0x306   : > { %v9089_v27 = vmul.u32.u64.low %v4157_v0, %v4152_v9  ;;  %v9090_v58 = vmul.u32.u64.high %v4157_v0, %v4152_v9, %v9089_v27  ;;  %v7646_v4 = vpop.eup %7645  ;;  %7649 = vcosq.f32 %v4405_v54  ;;  %v9093_v50 = vand.u32 3, %v4410_v45 }
 0x307   : > { %vm6759_vm13 = vcmp.lt.s32.totalorder %v6758_v36, 0  ;;  %v4148_v38 = vsel %vm4142_vm2, %v4145_v59, %v4147_v51  ;;  %v7648_v1 = vpop.eup %7647  ;;  %v4521_v43 = vxor.u32 2147483648, %v7646_v4  ;;  %7651 = vsinq.f32 %v4405_v54 }
 0x308   : > { %v4269_v18 = vadd.s32 %v8964_v39, %v8957_v25  ;;  %v4284_v8 = vsel %vm6759_vm13, 0, %v6758_v36  ;;  %v4518_v3 = vxor.u32 2147483648, %v7648_v1  ;;  %v9099_v31 = vand.u32 3, %v4306_v12 }
 0x309   : > { %v4285_v6 = vsub.s32 32, %v4284_v8  ;;  %v4289_v17 = vsub.s32 4294967266, %v4284_v8  ;;  %v4522_v16 = vsel %vm4520_vm12, %v4521_v43, %v7648_v1  ;;  %v4164_v37 = vmul.u32 %v4157_v0, %v4148_v38 }
 0x30a   : > { %vm4166_vm14 = vc.u32 %v9083_v52, %v9089_v27  ;;  %v4167_v46 = vadd.s32 1, %v9090_v58  ;;  %v4519_v24 = vsel %vm4517_vm11, %v7646_v4, %v4518_v3  ;;  %v4286_v25 = vshll.u32 %v9042_v48, %v4284_v8 }
 0x30b   : > { %v4287_v39 = vshrl.u32 %v4269_v18, %v4285_v6  ;;  %v4290_v56 = vadd.s32 127, %v4289_v17  ;;  %v4523_v5 = vsel %vm4516_vm9, %v4519_v24, %v4522_v16  ;;  %v9114_v42 = vand.u32 8388607, %v4005_v11 }
 0x30c   : > { %v4168_v23 = vsel %vm4166_vm14, %v4167_v46, %v9090_v58  ;;  %v4023_v33 = vshrl.u32 %v11177_v26, %v8807_v44  ;;  %v4524_v45 = vsel %vm4513_vm10, nan, %v4523_v5  ;;  %vm4416_vm15 = vcmp.eq.s32.totalorder %v9093_v50, 2 }
 0x30d   : > { %v4288_v15 = vor.u32 %v4287_v39, %v4286_v25  ;;  %v4291_v57 = vshll.u32 %v4290_v56, 23  ;;  %v4169_v48 = vadd.s32 %v4168_v23, %v4164_v37  ;;  %7407 = vmatprep.subr.mxu0 %v4524_v45  ;;  %v4026_v34 = vshrl.u32 %v11175_v28, %v8807_v44 }
 0x30e   : > { %v4029_v49 = vshrl.u32 %v11173_v30, %v8807_v44  ;;  %v4031_v63 = vshll.u32 %v11173_v30, %v8791_v40  ;;  %v4032_v9 = vshrl.u32 %v11195_v32, %v8807_v44  ;;  %7408 = vmatpush3.msra.mxu0 %v4524_v45  ;;  %vm4413_vm0 = vcmp.eq.s32.totalorder %v9093_v50, 0 }
 0x30f   : > { %v4292_v13 = vor.u32 4788187, %v4291_v57  ;;  %v4170_v0 = vadd.s32 536870912, %v4169_v48  ;;  %v4022_v12 = vshll.u32 %v11180_v22, %v8791_v40  ;;  %v4025_v59 = vshll.u32 %v11177_v26, %v8791_v40 }
 0x310   : > { %vm4412_vm1 = vcmp.lt.s32.totalorder %v9093_v50, 2  ;;  %v4028_v51 = vshll.u32 %v11175_v28, %v8791_v40  ;;  %v4033_v61 = vor.u32 %v4032_v9, %v4031_v63  ;;  %v4034_v36 = vshll.u32 %v11195_v32, %v8791_v40 }
 0x311   : > { %v11226_v14 = vmov 1326507024   ;;  %vm4409_vm3 = vweird.f32 %v8786_v29  ;;  %v4293_v58 = vand.u32 2147483647, %v4292_v13  ;;  %v4295_v4 = vcvt.s32.f32 %v4288_v15 }
 0x312   : > { %v4035_v54 = vshrl.u32 %v11226_v14, %v8807_v44  ;;  %v4171_v38 = vshrl.u32 %v4170_v0, 30  ;;  %v4021_v1 = vshrl.u32 %v11180_v22, %v8807_v44  ;;  %vm4111_vm7 = vcmp.lt.s32.totalorder %v8768_v35, 0 }
 0x313   : > { %v4024_v43 = vor.u32 %v4023_v33, %v4022_v12  ;;  %v4027_v18 = vor.u32 %v4026_v34, %v4025_v59  ;;  %v4030_v8 = vor.u32 %v4029_v49, %v4028_v51  ;;  %v4296_v6 = vmul.f32 %v4295_v4, %v4293_v58  ;;  %v7650_v16 = vpop.eup %7649 }
 0x314   : > { %v4036_v3 = vor.u32 %v4035_v54, %v4034_v36  ;;  %v4172_v17 = vshll.u32 %v4171_v38, 30  ;;  %v4013_v40 = vor.u32 8388608, %v9114_v42  ;;  %vm4040_vm8 = vcmp.lt.s32.totalorder %v8802_v10, 4  ;;  %v7652_v37 = vpop.eup %7651 }
 0x315   : > { %vm4037_vm2 = vcmp.lt.s32.totalorder %v8802_v10, 1  ;;  %vm4038_vm4 = vcmp.lt.s32.totalorder %v8802_v10, 2  ;;  %vm4039_vm9 = vcmp.lt.s32.totalorder %v8802_v10, 3  ;;  %v4046_v44 = vsel %vm4040_vm8, %v4033_v61, 920167782 }
 0x316   : > { %v4417_v46 = vxor.u32 2147483648, %v7650_v16  ;;  %v4297_v24 = vxor.u32 2147483648, %v4296_v6  ;;  %v9152_v25 = vsub.s32 %v4169_v48, %v4172_v17  ;;  %v4050_v39 = vsel %vm4040_vm8, %v4036_v3, 1326507024 }
 0x317   : > { %v4414_v56 = vxor.u32 2147483648, %v7652_v37  ;;  %v4195_v5 = vsub.s32 4, %v4171_v38  ;;  %v4045_v23 = vsel %vm4037_vm2, %v4024_v43, %v4027_v18  ;;  %v4047_v42 = vsel %vm4039_vm9, %v4030_v8, %v4046_v44 }
 0x318   : > { %v4418_v33 = vsel %vm4416_vm15, %v4417_v46, %v7652_v37  ;;  %v4298_v45 = vsel %vm4215_vm5, %v4297_v24, %v4296_v6  ;;  %v4175_v15 = vsub.s32 0, %v9152_v25  ;;  %v4049_v57 = vsel %vm4037_vm2, %v4027_v18, %v4030_v8 }
 0x319   : > { %v4415_v48 = vsel %vm4413_vm0, %v7650_v16, %v4414_v56  ;;  %v4301_v34 = vsel %vm9029_vm6, %v8760_v41, %v4298_v45  ;;  %v4042_v49 = vsel %vm4040_vm8, %v4030_v8, 2102212464  ;;  %v4051_v63 = vsel %vm4039_vm9, %v4033_v61, %v4050_v39 }
 0x31a   : > { %v4419_v9 = vsel %vm4412_vm1, %v4415_v48, %v4418_v33  ;;  %7653 = vcosq.f32 %v4301_v34  ;;  %v6753_v13 = vmin.u32 %v4175_v15, %v9152_v25  ;;  %v4048_v0 = vsel %vm4038_vm4, %v4045_v23, %v4047_v42 }
 0x31b   : > { %v4420_v12 = vsel %vm4409_vm3, nan, %v4419_v9  ;;  %7655 = vsinq.f32 %v4301_v34  ;;  %v4052_v21 = vsel %vm4038_vm4, %v4049_v57, %v4051_v63  ;;  %v4053_v59 = vshll.u32 %v4013_v40, 8 }
 0x31c   : > { %7409 = vmatprep.subr.mxu0 %v4420_v12  ;;  %v4177_v51 = vclz %v6753_v13  ;;  %v4196_v50 = vsel %vm4111_vm7, %v4195_v5, %v4171_v38  ;;  %v4041_v61 = vsel %vm4037_vm2, %v4021_v1, %v4024_v43  ;;  %v4043_v36 = vsel %vm4039_vm9, %v4027_v18, %v4042_v49 }
 0x31d   : > { %7410 = vmatpush3.msra.mxu0 %v4420_v12  ;;  %v9191_v54 = vmul.u32.u64.low %v4053_v59, %v4052_v21  ;;  %v9192_v29 = vmul.u32.u64.high %v4053_v59, %v4052_v21, %v9191_v54  ;;  %v9194_v58 = vmul.u32.u64.low %v4053_v59, %v4048_v0  ;;  %v9195_v4 = vmul.u32.u64.high %v4053_v59, %v4048_v0, %v9194_v58 }
 0x31e   : > { %v6754_v8 = vadd.s32 4294967294, %v4177_v51  ;;  %v3901_v3 = vand.u32 2147483647, %v8766_v20  ;;  %v9200_v6 = vadd.s32 1, %v8799_v60  ;;  %v3916_v38 = vsub.s32 32, %v9063_v7 }
 0x31f   : > { %v11227_v1 = vand.u32 2147483647, %v8768_v35  ;;  %v4044_v18 = vsel %vm4038_vm4, %v4041_v61, %v4043_v36  ;;  %v9212_v17 = vand.u32 31, %v8797_v53  ;;  %v9215_v40 = vshrl.u32 %v8971_v55, 5 }
 0x320   : > { %vm6755_vm6 = vcmp.lt.s32.totalorder %v6754_v8, 0  ;;  %vm4312_vm10 = vcmp.eq.s32.totalorder %v9099_v31, 2  ;;  %v4165_v16 = vadd.s32 %v9089_v27, %v9083_v52  ;;  %vm4062_vm11 = vc.u32 %v9192_v29, %v9194_v58 }
 0x321   : > { %vm9205_vm5 = vcmp.le.f32.partialorder %v11227_v1, 0.7853982  ;;  %v4180_v44 = vsel %vm6755_vm6, 0, %v6754_v8  ;;  %v4063_v10 = vadd.s32 1, %v9195_v4  ;;  %vm4309_vm12 = vcmp.eq.s32.totalorder %v9099_v31, 0 }
 0x322   : > { %v4198_v60 = vsel %vm9205_vm5, 0, %v4196_v50  ;;  %v4181_v37 = vsub.s32 32, %v4180_v44  ;;  %v4185_v55 = vsub.s32 4294967266, %v4180_v44  ;;  %v4060_v46 = vmul.u32 %v4053_v59, %v4044_v18 }
 0x323   : > { %v3908_v24 = vand.u32 8388607, %v3901_v3  ;;  %vm4308_vm13 = vcmp.lt.s32.totalorder %v9099_v31, 2  ;;  %v9229_v39 = vadd.s32 3, %v4198_v60  ;;  %v4064_v52 = vsel %vm4062_vm11, %v4063_v10, %v9195_v4 }
 0x324   : > { %v9233_v27 = vshrl.u32 %v11180_v22, %v3916_v38  ;;  %v3919_v56 = vshrl.u32 %v11177_v26, %v3916_v38  ;;  %vm4305_vm14 = vweird.f32 %v8760_v41  ;;  %v4182_v5 = vshll.u32 %v9152_v25, %v4180_v44 }
 0x325   : > { %v4183_v23 = vshrl.u32 %v4165_v16, %v4181_v37  ;;  %v4186_v42 = vadd.s32 127, %v4185_v55  ;;  %v4065_v33 = vadd.s32 %v4064_v52, %v4060_v46  ;;  %v3918_v45 = vshll.u32 %v11180_v22, %v9063_v7 }
 0x326   : > { %v3921_v15 = vshll.u32 %v11177_v26, %v9063_v7  ;;  %v3922_v57 = vshrl.u32 %v11175_v28, %v3916_v38  ;;  %v3928_v48 = vshrl.u32 %v11195_v32, %v3916_v38  ;;  %v3909_v9 = vor.u32 8388608, %v3908_v24 }
 0x327   : > { %v4184_v34 = vor.u32 %v4183_v23, %v4182_v5  ;;  %v4187_v49 = vshll.u32 %v4186_v42, 23  ;;  %v4066_v63 = vadd.s32 536870912, %v4065_v33  ;;  %v7654_v13 = vpop.eup %7653  ;;  %v3920_v0 = vor.u32 %v3919_v56, %v3918_v45 }
 0x328   : > { %v3925_v25 = vshrl.u32 %v11173_v30, %v3916_v38  ;;  %v3927_v12 = vshll.u32 %v11173_v30, %v9063_v7  ;;  %v3931_v21 = vshrl.u32 %v11226_v14, %v3916_v38  ;;  %v7656_v59 = vpop.eup %7655  ;;  %vm3704_vm15 = vcmp.gt.s32.totalorder %v9200_v6, 0 }
 0x329   : > { %v4313_v51 = vxor.u32 2147483648, %v7654_v13  ;;  %v4188_v50 = vor.u32 4788187, %v4187_v49  ;;  %v4067_v61 = vshrl.u32 %v4066_v63, 30  ;;  %v3924_v36 = vshll.u32 %v11175_v28, %v9063_v7 }
 0x32a   : > { %v4310_v54 = vxor.u32 2147483648, %v7656_v59  ;;  %v3923_v4 = vor.u32 %v3922_v57, %v3921_v15  ;;  %v3929_v8 = vor.u32 %v3928_v48, %v3927_v12  ;;  %v3930_v1 = vshll.u32 %v11195_v32, %v9063_v7 }
 0x32b   : > { %v4314_v18 = vsel %vm4312_vm10, %v4313_v51, %v7656_v59  ;;  %v4189_v60 = vand.u32 2147483647, %v4188_v50  ;;  %v4191_v38 = vcvt.s32.f32 %v4184_v34  ;;  %v4068_v16 = vshll.u32 %v4067_v61, 30 }
 0x32c   : > { %v4311_v44 = vsel %vm4309_vm12, %v7654_v13, %v4310_v54  ;;  %v3926_v10 = vor.u32 %v3925_v25, %v3924_v36  ;;  %v3932_v37 = vor.u32 %v3931_v21, %v3930_v1  ;;  %vm3933_vm0 = vcmp.lt.s32.totalorder %v9215_v40, 1 }
 0x32d   : > { %v4315_v55 = vsel %vm4308_vm13, %v4311_v44, %v4314_v18  ;;  %v4192_v46 = vmul.f32 %v4191_v38, %v4189_v60  ;;  %v9260_v24 = vsub.s32 %v4065_v33, %v4068_v16  ;;  %vm3936_vm1 = vcmp.lt.s32.totalorder %v9215_v40, 4 }
 0x32e   : > { %v4316_v7 = vsel %vm4305_vm14, nan, %v4315_v55  ;;  %vm3934_vm3 = vcmp.lt.s32.totalorder %v9215_v40, 2  ;;  %v3941_v52 = vsel %vm3933_vm0, %v3920_v0, %v3923_v4  ;;  %v3942_v56 = vsel %vm3936_vm1, %v3929_v8, 920167782 }
 0x32f   : > { %7411 = vmatprep.subr.mxu0 %v4316_v7  ;;  %v4193_v5 = vxor.u32 2147483648, %v4192_v46  ;;  %v4071_v23 = vsub.s32 0, %v9260_v24  ;;  %v4091_v31 = vsub.s32 4, %v4067_v61  ;;  %vm3935_vm8 = vcmp.lt.s32.totalorder %v9215_v40, 3 }
 0x330   : > { %7412 = vmatpush3.msra.mxu0 %v4316_v7  ;;  %v3938_v42 = vsel %vm3936_vm1, %v3926_v10, 2102212464  ;;  %v3943_v33 = vsel %vm3935_vm8, %v3926_v10, %v3942_v56  ;;  %v3946_v41 = vsel %vm3936_vm1, %v3932_v37, 1326507024  ;;  %v3949_v45 = vshll.u32 %v3909_v9, 8 }
 0x331   : > { %v4194_v15 = vsel %vm4111_vm7, %v4193_v5, %v4192_v46  ;;  %v6749_v57 = vmin.u32 %v4071_v23, %v9260_v24  ;;  %v3944_v48 = vsel %vm3934_vm3, %v3941_v52, %v3943_v33  ;;  %v3945_v34 = vsel %vm3933_vm0, %v3923_v4, %v3926_v10 }
 0x332   : > { %v4197_v49 = vsel %vm9205_vm5, %v8768_v35, %v4194_v15  ;;  %v3947_v63 = vsel %vm3935_vm8, %v3929_v8, %v3946_v41  ;;  %v9284_v13 = vmul.u32.u64.low %v3949_v45, %v3944_v48  ;;  %v9285_v9 = vmul.u32.u64.high %v3949_v45, %v3944_v48, %v9284_v13 }
 0x333   : > { %7657 = vcosq.f32 %v4197_v49  ;;  %v4073_v25 = vclz %v6749_v57  ;;  %v3937_v12 = vsel %vm3933_vm0, %v9233_v27, %v3920_v0  ;;  %v3939_v21 = vsel %vm3935_vm8, %v3923_v4, %v3938_v42 }
 0x334   : > { %v9296_v43 = vsel %vm3704_vm15, %v9200_v6, 0  ;;  %7659 = vsinq.f32 %v4197_v49  ;;  %vm4007_vm7 = vcmp.lt.s32.totalorder %v8750_v47, 0  ;;  %v3948_v59 = vsel %vm3934_vm3, %v3945_v34, %v3947_v63 }
 0x335   : > { %v6750_v51 = vadd.s32 4294967294, %v4073_v25  ;;  %v4092_v50 = vsel %vm4007_vm7, %v4091_v31, %v4067_v61  ;;  %v9303_v36 = vmul.u32.u64.low %v3949_v45, %v3948_v59  ;;  %v9304_v27 = vmul.u32.u64.high %v3949_v45, %v3948_v59, %v9303_v36 }
 0x336   : > { %v9307_v0 = vsub.s32 32, %v9212_v17  ;;  %v9310_v54 = vand.u32 3, %v9229_v39  ;;  %vm9314_vm2 = vcmp.le.f32.partialorder %v4005_v11, 0.7853982  ;;  %v3940_v4 = vsel %vm3934_vm3, %v3937_v12, %v3939_v21 }
 0x337   : > { %v9321_v61 = vshrl.u32 %v8797_v53, 5  ;;  %v9324_v8 = vand.u32 31, %v9296_v43  ;;  %vm6751_vm4 = vcmp.lt.s32.totalorder %v6750_v51, 0  ;;  %v3959_v1 = vadd.s32 1, %v9285_v9 }
 0x338   : > { %v4061_v39 = vadd.s32 %v9194_v58, %v9192_v29  ;;  %v4076_v18 = vsel %vm6751_vm4, 0, %v6750_v51  ;;  %v4094_v11 = vsel %vm9314_vm2, 0, %v4092_v50  ;;  %v3797_v60 = vand.u32 2147483647, %v8748_v62 }
 0x339   : > { %v4077_v40 = vsub.s32 32, %v4076_v18  ;;  %v4081_v38 = vsub.s32 4294967266, %v4076_v18  ;;  %v3956_v16 = vmul.u32 %v3949_v45, %v3940_v4  ;;  %v3814_v53 = vshll.u32 %v11180_v22, %v9212_v17 }
 0x33a   : > { %vm4208_vm9 = vcmp.eq.s32.totalorder %v9310_v54, 2  ;;  %vm3958_vm5 = vc.u32 %v9304_v27, %v9284_v13  ;;  %v3815_v29 = vshrl.u32 %v11177_v26, %v9307_v0  ;;  %v3817_v58 = vshll.u32 %v11177_v26, %v9212_v17 }
 0x33b   : > { %v3818_v44 = vshrl.u32 %v11175_v28, %v9307_v0  ;;  %vm4205_vm6 = vcmp.eq.s32.totalorder %v9310_v54, 0  ;;  %v4078_v10 = vshll.u32 %v9260_v24, %v4076_v18  ;;  %v4079_v37 = vshrl.u32 %v4061_v39, %v4077_v40 }
 0x33c   : > { %v4082_v55 = vadd.s32 127, %v4081_v38  ;;  %v3960_v46 = vsel %vm3958_vm5, %v3959_v1, %v9285_v9  ;;  %vm4204_vm10 = vcmp.lt.s32.totalorder %v9310_v54, 2  ;;  %v3804_v52 = vand.u32 8388607, %v3797_v60 }
 0x33d   : > { %v3961_v7 = vadd.s32 %v3960_v46, %v3956_v16  ;;  %v3821_v56 = vshrl.u32 %v11173_v30, %v9307_v0  ;;  %v3824_v5 = vshrl.u32 %v11195_v32, %v9307_v0  ;;  %vm4201_vm11 = vweird.f32 %v8768_v35 }
 0x33e   : > { %v4080_v23 = vor.u32 %v4079_v37, %v4078_v10  ;;  %v4083_v24 = vshll.u32 %v4082_v55, 23  ;;  %v3823_v31 = vshll.u32 %v11173_v30, %v9212_v17  ;;  %v3827_v42 = vshrl.u32 %v11226_v14, %v9307_v0 }
 0x33f   : > { %v4098_v33 = vadd.s32 3, %v4094_v11  ;;  %v3962_v41 = vadd.s32 536870912, %v3961_v7  ;;  %v3816_v45 = vor.u32 %v3815_v29, %v3814_v53  ;;  %v3820_v15 = vshll.u32 %v11175_v28, %v9212_v17 }
 0x340   : > { %v4084_v57 = vor.u32 4788187, %v4083_v24  ;;  %v3819_v48 = vor.u32 %v3818_v44, %v3817_v58  ;;  %v3825_v34 = vor.u32 %v3824_v5, %v3823_v31  ;;  %v3826_v49 = vshll.u32 %v11195_v32, %v9212_v17  ;;  %v7658_v63 = vpop.eup %7657 }
 0x341   : > { %v9362_v9 = vshrl.u32 %v3962_v41, 30  ;;  %v3805_v25 = vor.u32 8388608, %v3804_v52  ;;  %v3822_v12 = vor.u32 %v3821_v56, %v3820_v15  ;;  %vm3829_vm12 = vcmp.lt.s32.totalorder %v9321_v61, 1  ;;  %v7660_v21 = vpop.eup %7659 }
 0x342   : > { %v4209_v59 = vxor.u32 2147483648, %v7658_v63  ;;  %v4085_v51 = vand.u32 2147483647, %v4084_v57  ;;  %v4087_v50 = vcvt.s32.f32 %v4080_v23  ;;  %v3828_v36 = vor.u32 %v3827_v42, %v3826_v49 }
 0x343   : > { %v4206_v4 = vxor.u32 2147483648, %v7660_v21  ;;  %v3964_v1 = vshll.u32 %v9362_v9, 30  ;;  %vm3831_vm13 = vcmp.lt.s32.totalorder %v9321_v61, 3  ;;  %vm3832_vm14 = vcmp.lt.s32.totalorder %v9321_v61, 4 }
 0x344   : > { %v4210_v17 = vsel %vm4208_vm9, %v4209_v59, %v7660_v21  ;;  %v4088_v39 = vmul.f32 %v4087_v50, %v4085_v51  ;;  %v3837_v18 = vsel %vm3829_vm12, %v3816_v45, %v3819_v48  ;;  %v3838_v11 = vsel %vm3832_vm14, %v3825_v34, 920167782 }
 0x345   : > { %v4207_v40 = vsel %vm4205_vm6, %v7658_v63, %v4206_v4  ;;  %v3965_v38 = vsub.s32 %v3961_v7, %v3964_v1  ;;  %v3813_v16 = vshrl.u32 %v11180_v22, %v9307_v0  ;;  %v3839_v53 = vsel %vm3831_vm13, %v3822_v12, %v3838_v11 }
 0x346   : > { %v4211_v29 = vsel %vm4204_vm10, %v4207_v40, %v4210_v17  ;;  %v4089_v58 = vxor.u32 2147483648, %v4088_v39  ;;  %vm3830_vm15 = vcmp.lt.s32.totalorder %v9321_v61, 2  ;;  %v3834_v44 = vsel %vm3832_vm14, %v3822_v12, 2102212464 }
 0x347   : > { %v4212_v10 = vsel %vm4201_vm11, nan, %v4211_v29  ;;  %v3967_v37 = vsub.s32 0, %v3965_v38  ;;  %v3840_v55 = vsel %vm3830_vm15, %v3837_v18, %v3839_v53  ;;  %v3841_v0 = vsel %vm3829_vm12, %v3819_v48, %v3822_v12 }
 0x348   : > { %7413 = vmatprep.subr.mxu0 %v4212_v10  ;;  %v4090_v54 = vsel %vm4007_vm7, %v4089_v58, %v4088_v39  ;;  %v3833_v46 = vsel %vm3829_vm12, %v3813_v16, %v3816_v45  ;;  %v3842_v7 = vsel %vm3832_vm14, %v3828_v36, 1326507024  ;;  %v3845_v52 = vshll.u32 %v3805_v25, 8 }
 0x349   : > { %7414 = vmatpush3.msra.mxu0 %v4212_v10  ;;  %v4093_v35 = vsel %vm9314_vm2, %v8750_v47, %v4090_v54  ;;  %v6745_v56 = vmin.u32 %v3967_v37, %v3965_v38  ;;  %v3835_v5 = vsel %vm3831_vm13, %v3819_v48, %v3834_v44  ;;  %v3843_v23 = vsel %vm3831_vm13, %v3825_v34, %v3842_v7 }
 0x34a   : > { %7661 = vcosq.f32 %v4093_v35  ;;  %v3844_v24 = vsel %vm3830_vm15, %v3841_v0, %v3843_v23  ;;  %v9406_v31 = vmul.u32.u64.low %v3845_v52, %v3840_v55  ;;  %v9407_v42 = vmul.u32.u64.high %v3845_v52, %v3840_v55, %v9406_v31 }
 0x34b   : > { %7663 = vsinq.f32 %v4093_v35  ;;  %v3969_v41 = vclz %v6745_v56  ;;  %v9410_v45 = vmul.u32.u64.low %v3845_v52, %v3844_v24  ;;  %v9411_v6 = vmul.u32.u64.high %v3845_v52, %v3844_v24, %v9410_v45 }
 0x34c   : > { %v3836_v57 = vsel %vm3830_vm15, %v3833_v46, %v3835_v5  ;;  %v9416_v48 = vsub.s32 32, %v9324_v8  ;;  %v4099_v34 = vand.u32 3, %v4098_v33  ;;  %v3855_v49 = vadd.s32 1, %v9407_v42 }
 0x34d   : > { %v6746_v15 = vadd.s32 4294967294, %v3969_v41  ;;  %v9420_v63 = vshrl.u32 %v9296_v43, 5  ;;  %vm3903_vm0 = vcmp.lt.s32.totalorder %v8766_v20, 0  ;;  %v3987_v12 = vsub.s32 4, %v9362_v9 }
 0x34e   : > { %v3852_v21 = vmul.u32 %v3845_v52, %v3836_v57  ;;  %vm3854_vm3 = vc.u32 %v9411_v6, %v9406_v31  ;;  %v3957_v61 = vadd.s32 %v9284_v13, %v9304_v27  ;;  %vm4101_vm8 = vcmp.eq.s32.totalorder %v4099_v34, 0 }
 0x34f   : > { %vm6747_vm1 = vcmp.lt.s32.totalorder %v6746_v15, 0  ;;  %v3856_v51 = vsel %vm3854_vm3, %v3855_v49, %v9407_v42  ;;  %vm4104_vm7 = vcmp.eq.s32.totalorder %v4099_v34, 2  ;;  %v3693_v50 = vand.u32 2147483647, %v8770_v19 }
 0x350   : > { %v3972_v25 = vsel %vm6747_vm1, 0, %v6746_v15  ;;  %v3857_v43 = vadd.s32 %v3856_v51, %v3852_v21  ;;  %v3711_v36 = vshrl.u32 %v11177_v26, %v9416_v48  ;;  %vm4100_vm2 = vcmp.lt.s32.totalorder %v4099_v34, 2 }
 0x351   : > { %v3973_v59 = vsub.s32 32, %v3972_v25  ;;  %v3977_v33 = vsub.s32 4294967266, %v3972_v25  ;;  %v3974_v4 = vshll.u32 %v3965_v38, %v3972_v25  ;;  %v3714_v39 = vshrl.u32 %v11175_v28, %v9416_v48 }
 0x352   : > { %vm4097_vm4 = vweird.f32 %v8750_v47  ;;  %v9438_v13 = vsel %vm3903_vm0, %v3987_v12, %v9362_v9  ;;  %v3858_v27 = vadd.s32 536870912, %v3857_v43  ;;  %v3710_v18 = vshll.u32 %v11180_v22, %v9324_v8 }
 0x353   : > { %v3975_v1 = vshrl.u32 %v3957_v61, %v3973_v59  ;;  %v3978_v17 = vadd.s32 127, %v3977_v33  ;;  %v3720_v11 = vshrl.u32 %v11195_v32, %v9416_v48  ;;  %v3713_v16 = vshll.u32 %v11177_v26, %v9324_v8 }
 0x354   : > { %v3717_v53 = vshrl.u32 %v11173_v30, %v9416_v48  ;;  %v9448_v29 = vshrl.u32 %v3858_v27, 30  ;;  %v3700_v9 = vand.u32 8388607, %v3693_v50  ;;  %v3719_v58 = vshll.u32 %v11173_v30, %v9324_v8 }
 0x355   : > { %v3976_v40 = vor.u32 %v3975_v1, %v3974_v4  ;;  %v3979_v38 = vshll.u32 %v3978_v17, 23  ;;  %v3723_v44 = vshrl.u32 %v11226_v14, %v9416_v48  ;;  %vm9458_vm9 = vcmp.le.f32.partialorder %v3901_v3, 0.7853982 }
 0x356   : > { %v3712_v0 = vor.u32 %v3711_v36, %v3710_v18  ;;  %v3715_v54 = vor.u32 %v3714_v39, %v3713_v16  ;;  %v3716_v46 = vshll.u32 %v11175_v28, %v9324_v8  ;;  %v3860_v35 = vshll.u32 %v9448_v29, 30  ;;  %v4525_v16 = vld [vmem:[%s11159_s5] sm:$0xff] }
 0x357   : > { %v7662_v10 = vpop.eup %7661  ;;  %v3980_v55 = vor.u32 4788187, %v3979_v38  ;;  %v3721_v56 = vor.u32 %v3720_v11, %v3719_v58  ;;  %v3722_v5 = vshll.u32 %v11195_v32, %v9324_v8  ;;  %v3983_v3 = vcvt.s32.f32 %v3976_v40 }
 0x358   : > { %v7664_v7 = vpop.eup %7663  ;;  %v4105_v52 = vxor.u32 2147483648, %v7662_v10  ;;  %v3718_v42 = vor.u32 %v3717_v53, %v3716_v46  ;;  %v3861_v45 = vsub.s32 %v3857_v43, %v3860_v35  ;;  %v3701_v15 = vor.u32 8388608, %v3700_v9 }
 0x359   : > { %v4102_v23 = vxor.u32 2147483648, %v7664_v7  ;;  %v3981_v24 = vand.u32 2147483647, %v3980_v55  ;;  %v3724_v57 = vor.u32 %v3723_v44, %v3722_v5  ;;  %vm3725_vm5 = vcmp.lt.s32.totalorder %v9420_v63, 1 }
 0x35a   : > { %v4106_v41 = vsel %vm4104_vm7, %v4105_v52, %v7664_v7  ;;  %vm3728_vm6 = vcmp.lt.s32.totalorder %v9420_v63, 4  ;;  %v3863_v21 = vsub.s32 0, %v3861_v45  ;;  %vm3727_vm10 = vcmp.lt.s32.totalorder %v9420_v63, 3 }
 0x35b   : > { %v4103_v49 = vsel %vm4101_vm8, %v7662_v10, %v4102_v23  ;;  %v3984_v25 = vmul.f32 %v3983_v3, %v3981_v24  ;;  %v3734_v8 = vsel %vm3728_vm6, %v3721_v56, 920167782  ;;  %v3733_v33 = vsel %vm3725_vm5, %v3712_v0, %v3715_v54 }
 0x35c   : > { %v4107_v12 = vsel %vm4100_vm2, %v4103_v49, %v4106_v41  ;;  %v3735_v51 = vsel %vm3727_vm10, %v3718_v42, %v3734_v8  ;;  %v6741_v43 = vmin.u32 %v3863_v21, %v3861_v45  ;;  %v3730_v36 = vsel %vm3728_vm6, %v3718_v42, 2102212464 }
 0x35d   : > { %v4108_v61 = vsel %vm4097_vm4, nan, %v4107_v12  ;;  %v3985_v59 = vxor.u32 2147483648, %v3984_v25  ;;  %v3737_v34 = vsel %vm3725_vm5, %v3715_v54, %v3718_v42  ;;  %v3738_v4 = vsel %vm3728_vm6, %v3724_v57, 1326507024 }
 0x35e   : > { %7415 = vmatprep.subr.mxu0 %v4108_v61  ;;  %v3709_v47 = vshrl.u32 %v11180_v22, %v9416_v48  ;;  %vm3726_vm11 = vcmp.lt.s32.totalorder %v9420_v63, 2  ;;  %v3739_v17 = vsel %vm3727_vm10, %v3721_v56, %v3738_v4  ;;  %v3865_v27 = vclz %v6741_v43 }
 0x35f   : > { %7416 = vmatpush3.msra.mxu0 %v4108_v61  ;;  %v3986_v1 = vsel %vm3903_vm0, %v3985_v59, %v3984_v25  ;;  %v3736_v18 = vsel %vm3726_vm11, %v3733_v33, %v3735_v51  ;;  %v3741_v11 = vshll.u32 %v3701_v15, 8  ;;  %v3731_v48 = vsel %vm3727_vm10, %v3715_v54, %v3730_v36 }
 0x360   : > { %v3989_v39 = vsel %vm9458_vm9, %v8766_v20, %v3986_v1  ;;  %v3729_v40 = vsel %vm3725_vm5, %v3709_v47, %v3712_v0  ;;  %v3740_v38 = vsel %vm3726_vm11, %v3737_v34, %v3739_v17  ;;  %v6742_v53 = vadd.s32 4294967294, %v3865_v27 }
 0x361   : > { %7665 = vcosq.f32 %v3989_v39  ;;  %v9502_v9 = vmul.u32.u64.low %v3741_v11, %v3740_v38  ;;  %v9503_v58 = vmul.u32.u64.high %v3741_v11, %v3740_v38, %v9502_v9  ;;  %vm4581_vm12 = vcmask 523264  }
 0x362   : > { %7667 = vsinq.f32 %v3989_v39  ;;  %v9505_v44 = vmul.u32.u64.low %v3741_v11, %v3736_v18  ;;  %v9506_v10 = vmul.u32.u64.high %v3741_v11, %v3736_v18, %v9505_v44  ;;  %v3990_v55 = vsel %vm9458_vm9, 0, %v9438_v13  ;;  %7423 = vmatprep.mubr.msk.f32.mxu0 %vm4581_vm12, %v4525_v16 }
 0x363   : > { %vm6743_vm13 = vcmp.lt.s32.totalorder %v6742_v53, 0  ;;  %v3732_v54 = vsel %vm3726_vm11, %v3729_v40, %v3731_v48  ;;  %v3853_v46 = vadd.s32 %v9406_v31, %v9411_v6  ;;  %v3994_v35 = vadd.s32 3, %v3990_v55 }
 0x364   : > { %v3868_v0 = vsel %vm6743_vm13, 0, %v6742_v53  ;;  %vm3750_vm14 = vc.u32 %v9503_v58, %v9505_v44  ;;  %v3751_v56 = vadd.s32 1, %v9506_v10  ;;  %v3748_v23 = vmul.u32 %v3741_v11, %v3732_v54 }
 0x365   : > { %v3869_v7 = vsub.s32 32, %v3868_v0  ;;  %v3873_v52 = vsub.s32 4294967266, %v3868_v0  ;;  %v3870_v37 = vshll.u32 %v3861_v45, %v3868_v0  ;;  %v3995_v41 = vand.u32 3, %v3994_v35 }
 0x366   : > { %v3752_v24 = vsel %vm3750_vm14, %v3751_v56, %v9506_v10  ;;  %vm3993_vm3 = vweird.f32 %v8766_v20  ;;  %vm3799_vm8 = vcmp.lt.s32.totalorder %v8748_v62, 0  ;;  %v3883_v34 = vsub.s32 4, %v9448_v29 }
 0x367   : > { %v3871_v13 = vshrl.u32 %v3853_v46, %v3869_v7  ;;  %v3874_v5 = vadd.s32 127, %v3873_v52  ;;  %v3753_v42 = vadd.s32 %v3752_v24, %v3748_v23  ;;  %vm4000_vm15 = vcmp.eq.s32.totalorder %v3995_v41, 2 }
 0x368   : > { %vm3997_vm0 = vcmp.eq.s32.totalorder %v3995_v41, 0  ;;  %vm3996_vm1 = vcmp.lt.s32.totalorder %v3995_v41, 2  ;;  %vm3798_vm7 = vcmp.le.f32.partialorder %v3797_v60, 0.7853982  ;;  %v3884_v27 = vsel %vm3799_vm8, %v3883_v34, %v9448_v29  ;;  %v9571_v34 = vpop.permute.xlu1 %4573 }
 0x369   : > { %v3872_v3 = vor.u32 %v3871_v13, %v3870_v37  ;;  %v3875_v63 = vshll.u32 %v3874_v5, 23  ;;  %v3754_v31 = vadd.s32 536870912, %v3753_v42  ;;  %v3886_v18 = vsel %vm3798_vm7, 0, %v3884_v27 }
 0x36a   : > { %v3890_v40 = vadd.s32 3, %v3886_v18  ;;  %v3749_v60 = vadd.s32 %v9505_v44, %v9503_v58  ;;  %vm3889_vm6 = vweird.f32 %v8748_v62  ;;  %vm3695_vm10 = vcmp.lt.s32.totalorder %v8770_v19, 0 }
 0x36b   : > { %v3876_v15 = vor.u32 4788187, %v3875_v63  ;;  %v3879_v49 = vcvt.s32.f32 %v3872_v3  ;;  %v9521_v25 = vshrl.u32 %v3754_v31, 30  ;;  %vm3694_vm11 = vcmp.le.f32.partialorder %v3693_v50, 0.7853982 }
 0x36c   : > { %v3891_v55 = vand.u32 3, %v3890_v40 }
 0x36d   : > { %v3877_v57 = vand.u32 2147483647, %v3876_v15  ;;  %v3756_v61 = vshll.u32 %v9521_v25, 30  ;;  %v3779_v3 = vsub.s32 4, %v9521_v25 }
 0x36e   : > { %v7666_v6 = vpop.eup %7665  ;;  %vm3896_vm4 = vcmp.eq.s32.totalorder %v3891_v55, 2  ;;  %vm3893_vm9 = vcmp.eq.s32.totalorder %v3891_v55, 0  ;;  %vm3892_vm5 = vcmp.lt.s32.totalorder %v3891_v55, 2 }
 0x36f   : > { %v7668_v12 = vpop.eup %7667  ;;  %v4001_v21 = vxor.u32 2147483648, %v7666_v6  ;;  %v3880_v45 = vmul.f32 %v3879_v49, %v3877_v57  ;;  %v3757_v43 = vsub.s32 %v3753_v42, %v3756_v61  ;;  %v3780_v41 = vsel %vm3695_vm10, %v3779_v3, %v9521_v25  ;;  %v4526_v25 = vld [vmem:[%s11159_s5 + $0x8] sm:$0xff]  ;;  %v4527_v61 = vld [vmem:[%s11159_s5 + $0x10] sm:$0xff] }
 0x370   : > { %v3998_v8 = vxor.u32 2147483648, %v7668_v12 }
 0x371   : > { %v4002_v59 = vsel %vm4000_vm15, %v4001_v21, %v7668_v12  ;;  %v3881_v51 = vxor.u32 2147483648, %v3880_v45  ;;  %v3759_v47 = vsub.s32 0, %v3757_v43 }
 0x372   : > { %v3999_v33 = vsel %vm3997_vm0, %v7666_v6, %v3998_v8  ;;  %vm3785_vm0 = vweird.f32 %v8770_v19 }
 0x373   : > { %v4003_v36 = vsel %vm3996_vm1, %v3999_v33, %v4002_v59  ;;  %v3882_v1 = vsel %vm3799_vm8, %v3881_v51, %v3880_v45  ;;  %v6737_v39 = vmin.u32 %v3759_v47, %v3757_v43  ;;  %v4529_v59 = vld [vmem:[%s11159_s5 + $0x20] sm:$0xff]  ;;  %v4530_v33 = vld [vmem:[%s11159_s5 + $0x28] sm:$0xff]  ;;  %v4531_v51 = vld [vmem:[%s11159_s5 + $0x30] sm:$0xff] }
 0x374   : > { %v4004_v4 = vsel %vm3993_vm3, nan, %v4003_v36  ;;  %v3885_v17 = vsel %vm3798_vm7, %v8748_v62, %v3882_v1  ;;  %v3782_v62 = vsel %vm3694_vm11, 0, %v3780_v41  ;;  %v9569_v36 = vpop.permute.xlu0 %4578  ;;  %v9575_v1 = vpop.permute.xlu1 %4563 }
 0x375   : > { %7417 = vmatprep.subr.mxu0 %v4004_v4  ;;  %7669 = vcosq.f32 %v3885_v17  ;;  %v3761_v20 = vclz %v6737_v39  ;;  %v3786_v15 = vadd.s32 3, %v3782_v62 }
 0x376   : > { %7418 = vmatpush3.msra.mxu0 %v4004_v4  ;;  %7671 = vsinq.f32 %v3885_v17 }
 0x377   : > { %v6738_v11 = vadd.s32 4294967294, %v3761_v20  ;;  %v3787_v31 = vand.u32 3, %v3786_v15 }
 0x378   : > { %v9573_v4 = vpop.permute.xlu0 %4568  ;;  %v9577_v17 = vpop.permute.xlu1 %4553 }
 0x379   : > { %vm6739_vm2 = vcmp.lt.s32.totalorder %v6738_v11, 0  ;;  %vm3792_vm13 = vcmp.eq.s32.totalorder %v3787_v31, 2  ;;  %vm3789_vm14 = vcmp.eq.s32.totalorder %v3787_v31, 0  ;;  %vm3788_vm15 = vcmp.lt.s32.totalorder %v3787_v31, 2 }
 0x37a   : > { %v3764_v48 = vsel %vm6739_vm2, 0, %v6738_v11 }
 0x37b   : > { %v3765_v38 = vsub.s32 32, %v3764_v48  ;;  %v3769_v16 = vsub.s32 4294967266, %v3764_v48  ;;  %v3766_v53 = vshll.u32 %v3757_v43, %v3764_v48  ;;  %v4532_v43 = vld [vmem:[%s11159_s5 + $0x38] sm:$0xff] }
 0x37c   : > { %v4559_v47 = vpop.permute.xlu0 %4558  ;;  %v4544_v18 = vpop.permute.xlu1 %4543 }
 0x37d   : > { %v3767_v9 = vshrl.u32 %v3749_v60, %v3765_v38  ;;  %v3770_v10 = vadd.s32 127, %v3769_v16 }
 0x37f   : > { %v3768_v0 = vor.u32 %v3767_v9, %v3766_v53  ;;  %v3771_v54 = vshll.u32 %v3770_v10, 23 }
 0x380   : > { %v4549_v39 = vpop.permute.xlu0 %4548 }
 0x381   : > { %v3772_v52 = vor.u32 4788187, %v3771_v54  ;;  %v3775_v13 = vcvt.s32.f32 %v3768_v0 }
 0x382   : > { %v7670_v46 = vpop.eup %7669 }
 0x383   : > { %v7672_v29 = vpop.eup %7671  ;;  %v3897_v7 = vxor.u32 2147483648, %v7670_v46  ;;  %v3773_v37 = vand.u32 2147483647, %v3772_v52 }
 0x384   : > { %v3894_v35 = vxor.u32 2147483648, %v7672_v29 }
 0x385   : > { %v3898_v56 = vsel %vm3896_vm4, %v3897_v7, %v7672_v29  ;;  %v3776_v5 = vmul.f32 %v3775_v13, %v3773_v37 }
 0x386   : > { %v3895_v58 = vsel %vm3893_vm9, %v7670_v46, %v3894_v35 }
 0x387   : > { %v3899_v44 = vsel %vm3892_vm5, %v3895_v58, %v3898_v56  ;;  %v3777_v24 = vxor.u32 2147483648, %v3776_v5 }
 0x388   : > { %v3900_v23 = vsel %vm3889_vm6, nan, %v3899_v44 }
 0x389   : > { %7419 = vmatprep.subr.mxu0 %v3900_v23  ;;  %v3778_v63 = vsel %vm3695_vm10, %v3777_v24, %v3776_v5 }
 0x38a   : > { %7420 = vmatpush3.msra.mxu0 %v3900_v23  ;;  %v3781_v42 = vsel %vm3694_vm11, %v8770_v19, %v3778_v63  ;;  %v4528_v19 = vld [vmem:[%s11159_s5 + $0x18] sm:$0xff] }
 0x38b   : > { %7673 = vcosq.f32 %v3781_v42 }
 0x38c   : > { %7675 = vsinq.f32 %v3781_v42 }
 0x398   : > { %v7674_v6 = vpop.eup %7673 }
 0x399   : > { %v7676_v57 = vpop.eup %7675  ;;  %v3793_v49 = vxor.u32 2147483648, %v7674_v6 }
 0x39a   : > { %v3790_v12 = vxor.u32 2147483648, %v7676_v57 }
 0x39b   : > { %v3794_v21 = vsel %vm3792_vm13, %v3793_v49, %v7676_v57 }
 0x39c   : > { %v3791_v8 = vsel %vm3789_vm14, %v7674_v6, %v3790_v12 }
 0x39d   : > { %v3795_v50 = vsel %vm3788_vm15, %v3791_v8, %v3794_v21 }
 0x39e   : > { %v3796_v45 = vsel %vm3785_vm0, nan, %v3795_v50 }
 0x39f   : > { %7421 = vmatprep.subr.mxu0 %v3796_v45 }
 0x3a0   : > { %7422 = vmatpush3.msra.mxu0 %v3796_v45 }
 0x3a1   : > { %7424 = vmatmul.mubr.msk.f32.vlgmr.msra.gmra.mxu0 %vm4581_vm12, %v4526_v25 }
 0x3a2   : > { %7426 = vmatprep.mubr.msk.f32.mxu0 %vm4581_vm12, %v4527_v61 }
 0x3a5   : > { %7427 = vmatmul.mubr.msk.f32.gmra.mxu0 %vm4581_vm12, %v4528_v19 }
 0x3a6   : > { %7429 = vmatprep.mubr.msk.f32.mxu0 %vm4581_vm12, %v4529_v59 }
 0x3a9   : > { %7430 = vmatmul.mubr.msk.f32.gmra.mxu0 %vm4581_vm12, %v4530_v33 }
 0x3aa   : > { %7432 = vmatprep.mubr.msk.f32.mxu0 %vm4581_vm12, %v4531_v51 }
 0x3ad   : > { %7433 = vmatmul.mubr.msk.f32.gmra.mxu0 %vm4581_vm12, %v4532_v43 }
 0x461   : > { %v7425_v27 = vpop.f32.mrf.mxu0 }
 0x462   : > { %v9579_v20 = vadd.f32 %v7425_v27, %v4549_v39 }
 0x463   : > { %v4672_v11 = vpop.f32.mrf.mxu0 }
 0x464   : > { %v4818_v40 = vand.u32 2139095040, %v9579_v20  ;;  %v9582_v48 = vadd.f32 %v4672_v11, %v4544_v18  ;;  %v11168_v10 = vand.u32 2147483647, %v9579_v20 }
 0x465   : > { %v7428_v54 = vpop.f32.mrf.mxu0 }
 0x466   : > { %v4819_v60 = vshrl.u32 %v4818_v40, 23  ;;  %v4714_v38 = vand.u32 2139095040, %v9582_v48  ;;  %v4822_v29 = vand.u32 8388607, %v11168_v10  ;;  %v9588_v52 = vadd.f32 %v7428_v54, %v4559_v47 }
 0x468   : > { %v6780_v16 = vadd.s32 4294967169, %v4819_v60  ;;  %v4715_v53 = vshrl.u32 %v4714_v38, 23  ;;  %v4823_v57 = vor.u32 8388608, %v4822_v29  ;;  %v5026_v49 = vand.u32 2139095040, %v9588_v52 }
 0x46a   : > { %v4825_v9 = vadd.s32 1, %v6780_v16  ;;  %v6776_v0 = vadd.s32 4294967169, %v4715_v53  ;;  %v5027_v59 = vshrl.u32 %v5026_v49, 23  ;;  %v4863_v51 = vshll.u32 %v4823_v57, 8 }
 0x46c   : > { %vm4826_vm1 = vcmp.gt.s32.totalorder %v4825_v9, 0  ;;  %v4721_v13 = vadd.s32 1, %v6776_v0  ;;  %v6788_v40 = vadd.s32 4294967169, %v5027_v59  ;;  %v11167_v0 = vand.u32 2147483647, %v9582_v48 }
 0x46d   : > { %v4827_v55 = vsel %vm4826_vm1, %v4825_v9, 0  ;;  %v4682_v9 = vpop.f32.mrf.mxu0 }
 0x46e   : > { %v4829_v46 = vand.u32 31, %v4827_v55  ;;  %v4828_v35 = vshrl.u32 %v4827_v55, 5  ;;  %vm4722_vm3 = vcmp.gt.s32.totalorder %v4721_v13, 0  ;;  %v5033_v55 = vadd.s32 1, %v6788_v40 }
 0x46f   : > { %v4723_v61 = vsel %vm4722_vm3, %v4721_v13, 0 }
 0x470   : > { %v4830_v7 = vsub.s32 32, %v4829_v46  ;;  %v4832_v56 = vshll.u32 %v11180_v22, %v4829_v46  ;;  %v4835_v37 = vshll.u32 %v11177_v26, %v4829_v46  ;;  %v4838_v5 = vshll.u32 %v11175_v28, %v4829_v46 }
 0x471   : > { %v4841_v24 = vshll.u32 %v11173_v30, %v4829_v46  ;;  %v4844_v63 = vshll.u32 %v11195_v32, %v4829_v46  ;;  %vm4847_vm8 = vcmp.lt.s32.totalorder %v4828_v35, 1  ;;  %vm4850_vm7 = vcmp.lt.s32.totalorder %v4828_v35, 4 }
 0x472   : > { %v4833_v58 = vshrl.u32 %v11177_v26, %v4830_v7  ;;  %v4836_v44 = vshrl.u32 %v11175_v28, %v4830_v7  ;;  %v4839_v23 = vshrl.u32 %v11173_v30, %v4830_v7  ;;  %v4842_v3 = vshrl.u32 %v11195_v32, %v4830_v7 }
 0x473   : > { %v4845_v42 = vshrl.u32 %v11226_v14, %v4830_v7  ;;  %vm4849_vm2 = vcmp.lt.s32.totalorder %v4828_v35, 3  ;;  %vm4848_vm4 = vcmp.lt.s32.totalorder %v4828_v35, 2  ;;  %v4725_v43 = vand.u32 31, %v4723_v61 }
 0x474   : > { %v4834_v41 = vor.u32 %v4833_v58, %v4832_v56  ;;  %v4837_v62 = vor.u32 %v4836_v44, %v4835_v37  ;;  %v4840_v15 = vor.u32 %v4839_v23, %v4838_v5  ;;  %v4843_v31 = vor.u32 %v4842_v3, %v4841_v24 }
 0x475   : > { %v4846_v6 = vor.u32 %v4845_v42, %v4844_v63  ;;  %v4831_v60 = vshrl.u32 %v11180_v22, %v4830_v7  ;;  %v4726_v38 = vsub.s32 32, %v4725_v43  ;;  %v9623_v29 = vshrl.u32 %v4723_v61, 5 }
 0x476   : > { %v4855_v12 = vsel %vm4847_vm8, %v4834_v41, %v4837_v62  ;;  %v4856_v21 = vsel %vm4850_vm7, %v4843_v31, 920167782  ;;  %v4859_v45 = vsel %vm4847_vm8, %v4837_v62, %v4840_v15  ;;  %v4852_v27 = vsel %vm4850_vm7, %v4840_v15, 2102212464 }
 0x477   : > { %v4860_v8 = vsel %vm4850_vm7, %v4846_v6, 1326507024  ;;  %v4857_v50 = vsel %vm4849_vm2, %v4840_v15, %v4856_v21  ;;  %v4851_v16 = vsel %vm4847_vm8, %v4831_v60, %v4834_v41  ;;  %v4853_v53 = vsel %vm4849_vm2, %v4837_v62, %v4852_v27 }
 0x478   : > { %v4861_v25 = vsel %vm4849_vm2, %v4843_v31, %v4860_v8  ;;  %v4858_v19 = vsel %vm4848_vm4, %v4855_v12, %v4857_v50  ;;  %v4738_v54 = vshrl.u32 %v11195_v32, %v4726_v38  ;;  %v4854_v46 = vsel %vm4848_vm4, %v4851_v16, %v4853_v53 }
 0x479   : > { %v4862_v33 = vsel %vm4848_vm4, %v4859_v45, %v4861_v25  ;;  %v9609_v47 = vmul.u32.u64.low %v4863_v51, %v4858_v19  ;;  %v9610_v39 = vmul.u32.u64.high %v4863_v51, %v4858_v19, %v9609_v47  ;;  %v4741_v56 = vshrl.u32 %v11226_v14, %v4726_v38 }
 0x47a   : > { %v9614_v18 = vmul.u32.u64.low %v4863_v51, %v4862_v33  ;;  %v9615_v11 = vmul.u32.u64.high %v4863_v51, %v4862_v33, %v9614_v18  ;;  %v9627_v37 = vadd.f32 %v4682_v9, %v9577_v17  ;;  %v4729_v13 = vshrl.u32 %v11177_v26, %v4726_v38 }
 0x47b   : > { %v4873_v7 = vadd.s32 1, %v9610_v39  ;;  %v4732_v58 = vshrl.u32 %v11175_v28, %v4726_v38  ;;  %v4737_v44 = vshll.u32 %v11173_v30, %v4725_v43  ;;  %v4735_v35 = vshrl.u32 %v11173_v30, %v4726_v38 }
 0x47c   : > { %vm4872_vm9 = vc.u32 %v9615_v11, %v9609_v47  ;;  %v4740_v5 = vshll.u32 %v11195_v32, %v4725_v43  ;;  %vm5034_vm5 = vcmp.gt.s32.totalorder %v5033_v55, 0  ;;  %v4718_v17 = vand.u32 8388607, %v11167_v0 }
 0x47d   : > { %v4739_v23 = vor.u32 %v4738_v54, %v4737_v44  ;;  %v4728_v24 = vshll.u32 %v11180_v22, %v4725_v43  ;;  %v4731_v3 = vshll.u32 %v11177_v26, %v4725_v43  ;;  %v4734_v63 = vshll.u32 %v11175_v28, %v4725_v43 }
 0x47e   : > { %v4742_v42 = vor.u32 %v4741_v56, %v4740_v5  ;;  %v4870_v41 = vmul.u32 %v4863_v51, %v4854_v46  ;;  %v4874_v62 = vsel %vm4872_vm9, %v4873_v7, %v9610_v39  ;;  %v5035_v15 = vsel %vm5034_vm5, %v5033_v55, 0 }
 0x47f   : > { %v4922_v31 = vand.u32 2139095040, %v9627_v37  ;;  %v4730_v6 = vor.u32 %v4729_v13, %v4728_v24  ;;  %v4733_v57 = vor.u32 %v4732_v58, %v4731_v3  ;;  %v4736_v49 = vor.u32 %v4735_v35, %v4734_v63 }
 0x480   : > { %vm4746_vm6 = vcmp.lt.s32.totalorder %v9623_v29, 4  ;;  %v4875_v21 = vadd.s32 %v4874_v62, %v4870_v41  ;;  %v5037_v50 = vand.u32 31, %v5035_v15  ;;  %vm4743_vm10 = vcmp.lt.s32.totalorder %v9623_v29, 1  ;;  %v7431_v41 = vpop.f32.mrf.mxu0 }
 0x481   : > { %v4752_v12 = vsel %vm4746_vm6, %v4739_v23, 920167782  ;;  %v4756_v8 = vsel %vm4746_vm6, %v4742_v42, 1326507024  ;;  %vm4745_vm11 = vcmp.lt.s32.totalorder %v9623_v29, 3  ;;  %v4719_v45 = vor.u32 8388608, %v4718_v17 }
 0x482   : > { %v4751_v25 = vsel %vm4743_vm10, %v4730_v6, %v4733_v57  ;;  %v4753_v61 = vsel %vm4745_vm11, %v4736_v49, %v4752_v12  ;;  %v4923_v19 = vshrl.u32 %v4922_v31, 23  ;;  %v4755_v59 = vsel %vm4743_vm10, %v4733_v57, %v4736_v49 }
 0x483   : > { %v4757_v33 = vsel %vm4745_vm11, %v4739_v23, %v4756_v8  ;;  %v11170_v51 = vand.u32 2147483647, %v9588_v52  ;;  %v4876_v43 = vadd.s32 536870912, %v4875_v21  ;;  %vm4744_vm13 = vcmp.lt.s32.totalorder %v9623_v29, 2 }
 0x484   : > { %v9661_v39 = vsub.s32 32, %v5037_v50  ;;  %v4754_v27 = vsel %vm4744_vm13, %v4751_v25, %v4753_v61  ;;  %v4758_v18 = vsel %vm4744_vm13, %v4755_v59, %v4757_v33  ;;  %v9667_v40 = vshll.u32 %v4719_v45, 8 }
 0x485   : > { %v6784_v60 = vadd.s32 4294967169, %v4923_v19  ;;  %v4727_v16 = vshrl.u32 %v11180_v22, %v4726_v38  ;;  %v4748_v53 = vsel %vm4746_vm6, %v4736_v49, 2102212464  ;;  %v5030_v9 = vand.u32 8388607, %v11170_v51 }
 0x486   : > { %v11169_v55 = vand.u32 2147483647, %v9627_v37  ;;  %v9675_v54 = vshrl.u32 %v4876_v43, 30  ;;  %v9678_v46 = vmul.u32.u64.low %v9667_v40, %v4754_v27  ;;  %v9679_v56 = vmul.u32.u64.high %v9667_v40, %v4754_v27, %v9678_v46 }
 0x487   : > { %v5050_v7 = vshrl.u32 %v11195_v32, %v9661_v39  ;;  %v4747_v38 = vsel %vm4743_vm10, %v4727_v16, %v4730_v6  ;;  %v9687_v13 = vmul.u32.u64.low %v9667_v40, %v4758_v18  ;;  %v9688_v58 = vmul.u32.u64.high %v9667_v40, %v4758_v18, %v9687_v13 }
 0x488   : > { %11234 = vst [vmem:[#allocation7_spill] sm:$0xff] %v9675_v54  ;;  %v5053_v44 = vshrl.u32 %v11226_v14, %v9661_v39  ;;  %v4749_v35 = vsel %vm4745_vm11, %v4733_v57, %v4748_v53  ;;  %v9694_v5 = vshrl.u32 %v5035_v15, 5  ;;  %v5049_v17 = vshll.u32 %v11173_v30, %v5037_v50 }
 0x489   : > { %v4929_v23 = vadd.s32 1, %v6784_v60  ;;  %v5041_v24 = vshrl.u32 %v11177_v26, %v9661_v39  ;;  %v5044_v3 = vshrl.u32 %v11175_v28, %v9661_v39  ;;  %v5047_v63 = vshrl.u32 %v11173_v30, %v9661_v39 }
 0x48a   : > { %v5052_v42 = vshll.u32 %v11195_v32, %v5037_v50  ;;  %v4878_v62 = vshll.u32 %v9675_v54, 30  ;;  %v5040_v15 = vshll.u32 %v11180_v22, %v5037_v50  ;;  %v5051_v31 = vor.u32 %v5050_v7, %v5049_v17 }
 0x48b   : > { %vm4930_vm14 = vcmp.gt.s32.totalorder %v4929_v23, 0  ;;  %v5043_v6 = vshll.u32 %v11177_v26, %v5037_v50  ;;  %v5046_v57 = vshll.u32 %v11175_v28, %v5037_v50  ;;  %v4750_v8 = vsel %vm4744_vm13, %v4747_v38, %v4749_v35 }
 0x48c   : > { %v5054_v49 = vor.u32 %v5053_v44, %v5052_v42  ;;  %v4931_v12 = vsel %vm4930_vm14, %v4929_v23, 0  ;;  %v5031_v45 = vor.u32 8388608, %v5030_v9  ;;  %v9711_v61 = vadd.f32 %v7431_v41, %v9573_v4 }
 0x48d   : > { %v4933_v25 = vand.u32 31, %v4931_v12  ;;  %v9713_v19 = vor.u32 %v5041_v24, %v5040_v15  ;;  %v9715_v59 = vor.u32 %v5044_v3, %v5043_v6  ;;  %v5048_v33 = vor.u32 %v5047_v63, %v5046_v57 }
 0x48e   : > { %vm5058_vm15 = vcmp.lt.s32.totalorder %v9694_v5, 4  ;;  %v9718_v43 = vsub.s32 %v4875_v21, %v4878_v62  ;;  %v9726_v27 = vand.u32 8388607, %v11169_v55  ;;  %v4766_v18 = vmul.u32 %v9667_v40, %v4750_v8 }
 0x48f   : > { %v5064_v50 = vsel %vm5058_vm15, %v5051_v31, 920167782  ;;  %v5068_v29 = vsel %vm5058_vm15, %v5054_v49, 1326507024  ;;  %v9728_v4 = vsub.s32 32, %v4933_v25  ;;  %vm5055_vm0 = vcmp.lt.s32.totalorder %v9694_v5, 1 }
 0x490   : > { %vm5057_vm1 = vcmp.lt.s32.totalorder %v9694_v5, 3  ;;  %v9733_v21 = vshll.u32 %v5031_v45, 8  ;;  %v4769_v60 = vadd.s32 1, %v9679_v56  ;;  %v5063_v16 = vsel %vm5055_vm0, %v9713_v19, %v9715_v59 }
 0x491   : > { %v5065_v53 = vsel %vm5057_vm1, %v5048_v33, %v5064_v50  ;;  %v5234_v9 = vand.u32 2139095040, %v9711_v61  ;;  %v4881_v40 = vsub.s32 0, %v9718_v43  ;;  %vm4768_vm3 = vc.u32 %v9688_v58, %v9678_v46 }
 0x492   : > { %v5067_v7 = vsel %vm5055_vm0, %v9715_v59, %v5048_v33  ;;  %v5069_v38 = vsel %vm5057_vm1, %v5051_v31, %v5068_v29  ;;  %vm5056_vm8 = vcmp.lt.s32.totalorder %v9694_v5, 2  ;;  %v4937_v13 = vshrl.u32 %v11177_v26, %v9728_v4 }
 0x493   : > { %v4945_v44 = vshll.u32 %v11173_v30, %v4933_v25  ;;  %v4946_v35 = vshrl.u32 %v11195_v32, %v9728_v4  ;;  %v5066_v17 = vsel %vm5056_vm8, %v5063_v16, %v5065_v53  ;;  %v9759_v23 = vshrl.u32 %v4931_v12, 5 }
 0x494   : > { %v4940_v24 = vshrl.u32 %v11175_v28, %v9728_v4  ;;  %v4943_v3 = vshrl.u32 %v11173_v30, %v9728_v4  ;;  %v5070_v63 = vsel %vm5056_vm8, %v5067_v7, %v5069_v38  ;;  %v4936_v42 = vshll.u32 %v11180_v22, %v4933_v25 }
 0x495   : > { %v4947_v41 = vor.u32 %v4946_v35, %v4945_v44  ;;  %v5235_v62 = vshrl.u32 %v5234_v9, 23  ;;  %v4939_v15 = vshll.u32 %v11177_v26, %v4933_v25  ;;  %v4942_v31 = vshll.u32 %v11175_v28, %v4933_v25 }
 0x496   : > { %v4948_v6 = vshll.u32 %v11195_v32, %v4933_v25  ;;  %v4949_v57 = vshrl.u32 %v11226_v14, %v9728_v4  ;;  %v4770_v49 = vsel %vm4768_vm3, %v4769_v60, %v9679_v56  ;;  %v4938_v45 = vor.u32 %v4937_v13, %v4936_v42 }
 0x497   : > { %v9778_v12 = vmul.u32.u64.low %v9733_v21, %v5066_v17  ;;  %v9779_v8 = vmul.u32.u64.high %v9733_v21, %v5066_v17, %v9778_v12  ;;  %v4941_v50 = vor.u32 %v4940_v24, %v4939_v15  ;;  %v4944_v29 = vor.u32 %v4943_v3, %v4942_v31 }
 0x498   : > { %v4950_v16 = vor.u32 %v4949_v57, %v4948_v6  ;;  %vm4954_vm7 = vcmp.lt.s32.totalorder %v9759_v23, 4  ;;  %v9784_v25 = vmul.u32.u64.low %v9733_v21, %v5070_v63  ;;  %v9785_v53 = vmul.u32.u64.high %v9733_v21, %v5070_v63, %v9784_v25  ;;  %v4692_v57 = vpop.f32.mrf.mxu0 }
 0x499   : > { %v4960_v9 = vsel %vm4954_vm7, %v4947_v41, 920167782  ;;  %v6796_v7 = vadd.s32 4294967169, %v5235_v62  ;;  %v6781_v56 = vmin.u32 %v4881_v40, %v9718_v43  ;;  %v9790_v60 = vadd.s32 %v4770_v49, %v4766_v18 }
 0x49a   : > { %v5039_v38 = vshrl.u32 %v11180_v22, %v9661_v39  ;;  %v4927_v13 = vor.u32 8388608, %v9726_v27  ;;  %v5060_v44 = vsel %vm5058_vm15, %v5048_v33, 2102212464  ;;  %vm4951_vm2 = vcmp.lt.s32.totalorder %v9759_v23, 1 }
 0x49b   : > { %vm4953_vm4 = vcmp.lt.s32.totalorder %v9759_v23, 3  ;;  %v4964_v35 = vsel %vm4954_vm7, %v4950_v16, 1326507024  ;;  %v4959_v40 = vsel %vm4951_vm2, %v4938_v45, %v4941_v50  ;;  %v4963_v39 = vsel %vm4951_vm2, %v4941_v50, %v4944_v29 }
 0x49c   : > { %v4961_v18 = vsel %vm4953_vm4, %v4944_v29, %v4960_v9  ;;  %v4965_v27 = vsel %vm4953_vm4, %v4947_v41, %v4964_v35  ;;  %v5241_v33 = vadd.s32 1, %v6796_v7  ;;  %v4772_v17 = vadd.s32 536870912, %v9790_v60 }
 0x49d   : > { %v5059_v24 = vsel %vm5055_vm0, %v5039_v38, %v9713_v19  ;;  %v5061_v3 = vsel %vm5057_vm1, %v9715_v59, %v5060_v44  ;;  %vm4952_vm9 = vcmp.lt.s32.totalorder %v9759_v23, 2  ;;  %v4883_v63 = vclz %v6781_v56 }
 0x49e   : > { %v4962_v42 = vsel %vm4952_vm9, %v4959_v40, %v4961_v18  ;;  %v4966_v41 = vsel %vm4952_vm9, %v4963_v39, %v4965_v27  ;;  %vm5242_vm5 = vcmp.gt.s32.totalorder %v5241_v33, 0  ;;  %v9821_v62 = vshll.u32 %v4927_v13, 8 }
 0x49f   : > { %v11172_v15 = vand.u32 2147483647, %v9711_v61  ;;  %v5243_v31 = vsel %vm5242_vm5, %v5241_v33, 0  ;;  %v5062_v19 = vsel %vm5056_vm8, %v5059_v24, %v5061_v3  ;;  %vm5080_vm6 = vc.u32 %v9785_v53, %v9778_v12 }
 0x4a0   : > { %v5081_v59 = vadd.s32 1, %v9779_v8  ;;  %v5245_v6 = vand.u32 31, %v5243_v31  ;;  %v9830_v49 = vmul.u32.u64.low %v9821_v62, %v4966_v41  ;;  %v9831_v16 = vmul.u32.u64.high %v9821_v62, %v4966_v41, %v9830_v49 }
 0x4a1   : > { %v9834_v25 = vmul.u32.u64.low %v9821_v62, %v4962_v42  ;;  %v9835_v9 = vmul.u32.u64.high %v9821_v62, %v4962_v42, %v9834_v25  ;;  %v9838_v7 = vadd.s32 4294967294, %v4883_v63  ;;  %v9840_v5 = vshrl.u32 %v4772_v17, 30 }
 0x4a2   : > { %v4935_v56 = vshrl.u32 %v11180_v22, %v9728_v4  ;;  %v5246_v38 = vsub.s32 32, %v5245_v6  ;;  %v5078_v13 = vmul.u32 %v9733_v21, %v5062_v19  ;;  %v4956_v44 = vsel %vm4954_vm7, %v4944_v29, 2102212464 }
 0x4a3   : > { %11235 = vst [vmem:[#allocation8_spill] sm:$0xff] %v9840_v5  ;;  %v5238_v35 = vand.u32 8388607, %v11172_v15  ;;  %v9850_v40 = vadd.f32 %v4692_v57, %v9575_v1  ;;  %v5082_v18 = vsel %vm5080_vm6, %v5081_v59, %v9779_v8  ;;  %v5248_v21 = vshll.u32 %v11180_v22, %v5245_v6 }
 0x4a4   : > { %v4955_v39 = vsel %vm4951_vm2, %v4935_v56, %v4938_v45  ;;  %v5249_v27 = vshrl.u32 %v11177_v26, %v5246_v38  ;;  %v5252_v4 = vshrl.u32 %v11175_v28, %v5246_v38  ;;  %v5251_v33 = vshll.u32 %v11177_v26, %v5245_v6 }
 0x4a5   : > { %v5254_v29 = vshll.u32 %v11175_v28, %v5245_v6  ;;  %v5255_v17 = vshrl.u32 %v11173_v30, %v5246_v38  ;;  %v4957_v1 = vsel %vm4953_vm4, %v4941_v50, %v4956_v44  ;;  %v5244_v24 = vshrl.u32 %v5243_v31, 5 }
 0x4a6   : > { %v5257_v8 = vshll.u32 %v11173_v30, %v5245_v6  ;;  %v5258_v45 = vshrl.u32 %v11195_v32, %v5246_v38  ;;  %v9865_v3 = vadd.s32 %v5082_v18, %v5078_v13  ;;  %v5250_v63 = vor.u32 %v5249_v27, %v5248_v21 }
 0x4a7   : > { %v5253_v42 = vor.u32 %v5252_v4, %v5251_v33  ;;  %v5256_v41 = vor.u32 %v5255_v17, %v5254_v29  ;;  %v5239_v19 = vor.u32 8388608, %v5238_v35  ;;  %v5260_v57 = vshll.u32 %v11195_v32, %v5245_v6 }
 0x4a8   : > { %v5259_v59 = vor.u32 %v5258_v45, %v5257_v8  ;;  %v5261_v49 = vshrl.u32 %v11226_v14, %v5246_v38  ;;  %v4958_v56 = vsel %vm4952_vm9, %v4955_v39, %v4957_v1  ;;  %vm4976_vm10 = vc.u32 %v9831_v16, %v9834_v25 }
 0x4a9   : > { %v4977_v50 = vadd.s32 1, %v9835_v9  ;;  %v5130_v31 = vand.u32 2139095040, %v9850_v40  ;;  %v5247_v13 = vshrl.u32 %v11180_v22, %v5246_v38  ;;  %vm5263_vm11 = vcmp.lt.s32.totalorder %v5244_v24, 1 }
 0x4aa   : > { %v5262_v44 = vor.u32 %v5261_v49, %v5260_v57  ;;  %vm5266_vm13 = vcmp.lt.s32.totalorder %v5244_v24, 4  ;;  %vm5265_vm14 = vcmp.lt.s32.totalorder %v5244_v24, 3  ;;  %v5271_v6 = vsel %vm5263_vm11, %v5250_v63, %v5253_v42 }
 0x4ab   : > { %v5268_v35 = vsel %vm5266_vm13, %v5256_v41, 2102212464  ;;  %v5272_v18 = vsel %vm5266_vm13, %v5259_v59, 920167782  ;;  %vm5264_vm15 = vcmp.lt.s32.totalorder %v5244_v24, 2  ;;  %v5275_v23 = vsel %vm5263_vm11, %v5253_v42, %v5256_v41 }
 0x4ac   : > { %v5273_v27 = vsel %vm5265_vm14, %v5256_v41, %v5272_v18  ;;  %v5279_v39 = vshll.u32 %v5239_v19, 8  ;;  %v4978_v4 = vsel %vm4976_vm10, %v4977_v50, %v9835_v9  ;;  %v5267_v21 = vsel %vm5263_vm11, %v5247_v13, %v5250_v63  ;;  %v7434_v19 = vpop.f32.mrf.mxu0 }
 0x4ad   : > { %v5274_v33 = vsel %vm5264_vm15, %v5271_v6, %v5273_v27  ;;  %v5276_v29 = vsel %vm5266_vm13, %v5262_v44, 1326507024  ;;  %v5269_v17 = vsel %vm5265_vm14, %v5253_v42, %v5268_v35  ;;  %v4774_v45 = vshll.u32 %v9840_v5, 30 }
 0x4ae   : > { %v5277_v1 = vsel %vm5265_vm14, %v5259_v59, %v5276_v29  ;;  %v9878_v38 = vmul.u32.u64.low %v5279_v39, %v5274_v33  ;;  %v9879_v8 = vmul.u32.u64.high %v5279_v39, %v5274_v33, %v9878_v38  ;;  %v4974_v57 = vmul.u32 %v9821_v62, %v4958_v56 }
 0x4af   : > { %v5278_v49 = vsel %vm5264_vm15, %v5275_v23, %v5277_v1  ;;  %v5131_v41 = vshrl.u32 %v5130_v31, 23  ;;  %v5084_v9 = vadd.s32 536870912, %v9865_v3  ;;  %vm6783_vm0 = vcmp.lt.s32.totalorder %v9838_v7, 0 }
 0x4b0   : > { %v9886_v63 = vmul.u32.u64.low %v5279_v39, %v5278_v49  ;;  %v9887_v50 = vmul.u32.u64.high %v5279_v39, %v5278_v49, %v9886_v63  ;;  %v9890_v42 = vadd.s32 %v4978_v4, %v4974_v57  ;;  %v5270_v59 = vsel %vm5264_vm15, %v5267_v21, %v5269_v17 }
 0x4b1   : > { %v6792_v13 = vadd.s32 4294967169, %v5131_v41  ;;  %v5289_v44 = vadd.s32 1, %v9879_v8  ;;  %v9895_v62 = vadd.f32 %v7434_v19, %v9569_v36  ;;  %v9898_v56 = vsub.s32 %v9790_v60, %v4774_v45 }
 0x4b2   : > { %v9901_v35 = vsel %vm6783_vm0, 0, %v9838_v7  ;;  %v9903_v6 = vshrl.u32 %v5084_v9, 30  ;;  %v5286_v18 = vmul.u32 %v5279_v39, %v5270_v59  ;;  %vm5288_vm1 = vc.u32 %v9887_v50, %v9878_v38  ;;  %v6808_v9 = vld [vmem:[%s11159_s5 + $0x40] sm:$0xff] }
 0x4b3   : > { %v5137_v31 = vadd.s32 1, %v6792_v13  ;;  %v4980_v24 = vadd.s32 536870912, %v9890_v42  ;;  %v5290_v27 = vsel %vm5288_vm1, %v5289_v44, %v9879_v8  ;;  %v11171_v36 = vand.u32 2147483647, %v9850_v40  ;;  %7451 = vmatprep.mubr.msk.f32.mxu1 %vm4581_vm12, %v6808_v9 }
 0x4b4   : > { %11236 = vst [vmem:[#allocation9_spill] sm:$0xff] %v9903_v6  ;;  %v5291_v23 = vadd.s32 %v5290_v27, %v5286_v18  ;;  %v5442_v4 = vand.u32 2139095040, %v9895_v62  ;;  %v4887_v7 = vsub.s32 32, %v9901_v35  ;;  %v4891_v33 = vsub.s32 4294967266, %v9901_v35 }
 0x4b5   : > { %vm5138_vm3 = vcmp.gt.s32.totalorder %v5137_v31, 0  ;;  %v4777_v39 = vsub.s32 0, %v9898_v56  ;;  %v5086_v17 = vshll.u32 %v9903_v6, 30  ;;  %v9915_v1 = vshrl.u32 %v4980_v24, 30 }
 0x4b6   : > { %v5139_v60 = vsel %vm5138_vm3, %v5137_v31, 0  ;;  %v5292_v29 = vadd.s32 536870912, %v5291_v23  ;;  %v5134_v8 = vand.u32 8388607, %v11171_v36  ;;  %v5443_v19 = vshrl.u32 %v5442_v4, 23 }
 0x4b7   : > { %v5141_v21 = vand.u32 31, %v5139_v60  ;;  %11237 = vst [vmem:[#allocation10_spill] sm:$0xff] %v9915_v1  ;;  %v5140_v18 = vshrl.u32 %v5139_v60, 5  ;;  %v9934_v4 = vadd.s32 127, %v4891_v33  ;;  %v6777_v55 = vmin.u32 %v4777_v39, %v9898_v56 }
 0x4b8   : > { %v9919_v57 = vshrl.u32 %v5292_v29, 30  ;;  %v9938_v51 = vsub.s32 %v9865_v3, %v5086_v17  ;;  %v5135_v36 = vor.u32 8388608, %v5134_v8  ;;  %v4982_v9 = vshll.u32 %v9915_v1, 30 }
 0x4b9   : > { %v5142_v45 = vsub.s32 32, %v5141_v21  ;;  %v5144_v49 = vshll.u32 %v11180_v22, %v5141_v21  ;;  %v5147_v41 = vshll.u32 %v11177_v26, %v5141_v21  ;;  %v5150_v13 = vshll.u32 %v11175_v28, %v5141_v21 }
 0x4ba   : > { %v5294_v31 = vshll.u32 %v9919_v57, 30  ;;  %v5153_v24 = vshll.u32 %v11173_v30, %v5141_v21  ;;  %v5156_v60 = vshll.u32 %v11195_v32, %v5141_v21  ;;  %vm5159_vm8 = vcmp.lt.s32.totalorder %v5140_v18, 1 }
 0x4bb   : > { %v5145_v63 = vshrl.u32 %v11177_v26, %v5142_v45  ;;  %v5148_v59 = vshrl.u32 %v11175_v28, %v5142_v45  ;;  %v5151_v44 = vshrl.u32 %v11173_v30, %v5142_v45  ;;  %v5154_v27 = vshrl.u32 %v11195_v32, %v5142_v45 }
 0x4bc   : > { %v5157_v30 = vshrl.u32 %v11226_v14, %v5142_v45  ;;  %v6804_v28 = vadd.s32 4294967169, %v5443_v19  ;;  %v9943_v26 = vsub.s32 %v5291_v23, %v5294_v31  ;;  %vm5161_vm7 = vcmp.lt.s32.totalorder %v5140_v18, 3 }
 0x4bd   : > { %v5146_v29 = vor.u32 %v5145_v63, %v5144_v49  ;;  %v5149_v0 = vor.u32 %v5148_v59, %v5147_v41  ;;  %v5152_v10 = vor.u32 %v5151_v44, %v5150_v13  ;;  %v5155_v15 = vor.u32 %v5154_v27, %v5153_v24 }
 0x4be   : > { %vm5162_vm2 = vcmp.lt.s32.totalorder %v5140_v18, 4  ;;  %v5158_v33 = vor.u32 %v5157_v30, %v5156_v60  ;;  %v5143_v17 = vshrl.u32 %v11180_v22, %v5142_v45  ;;  %vm5160_vm4 = vcmp.lt.s32.totalorder %v5140_v18, 2  ;;  %v4702_v45 = vpop.f32.mrf.mxu0 }
 0x4bf   : > { %v5164_v49 = vsel %vm5162_vm2, %v5152_v10, 2102212464  ;;  %v5167_v39 = vsel %vm5159_vm8, %v5146_v29, %v5149_v0  ;;  %v5168_v3 = vsel %vm5162_vm2, %v5155_v15, 920167782  ;;  %v5175_v41 = vshll.u32 %v5135_v36, 8 }
 0x4c0   : > { %v5169_v8 = vsel %vm5161_vm7, %v5152_v10, %v5168_v3  ;;  %v5171_v19 = vsel %vm5159_vm8, %v5149_v0, %v5152_v10  ;;  %v5172_v23 = vsel %vm5162_vm2, %v5158_v33, 1326507024  ;;  %v11179_v63 = vand.u32 2147483647, %v9895_v62 }
 0x4c1   : > { %v5170_v21 = vsel %vm5160_vm4, %v5167_v39, %v5169_v8  ;;  %v5297_v59 = vsub.s32 0, %v9943_v26  ;;  %v5163_v30 = vsel %vm5159_vm8, %v5143_v17, %v5146_v29  ;;  %v5165_v13 = vsel %vm5161_vm7, %v5149_v0, %v5164_v49 }
 0x4c2   : > { %v5173_v44 = vsel %vm5161_vm7, %v5155_v15, %v5172_v23  ;;  %v9956_v24 = vmul.u32.u64.low %v5175_v41, %v5170_v21  ;;  %v9957_v36 = vmul.u32.u64.high %v5175_v41, %v5170_v21, %v9956_v24  ;;  %v5449_v27 = vadd.s32 1, %v6804_v28 }
 0x4c3   : > { %v5174_v31 = vsel %vm5160_vm4, %v5171_v19, %v5173_v44  ;;  %v4779_v10 = vclz %v6777_v55  ;;  %v5089_v60 = vsub.s32 0, %v9938_v51  ;;  %v4871_v29 = vadd.s32 %v9609_v47, %v9615_v11 }
 0x4c4   : > { %v9961_v33 = vmul.u32.u64.low %v5175_v41, %v5174_v31  ;;  %v9962_v39 = vmul.u32.u64.high %v5175_v41, %v5174_v31, %v9961_v33  ;;  %v9967_v0 = vsub.s32 %v9890_v42, %v4982_v9  ;;  %vm5450_vm9 = vcmp.gt.s32.totalorder %v5449_v27, 0 }
 0x4c5   : > { %v9970_v15 = vadd.f32 %v4702_v45, %v9571_v34  ;;  %v6797_v49 = vmin.u32 %v5297_v59, %v9943_v26  ;;  %v5166_v28 = vsel %vm5160_vm4, %v5163_v30, %v5165_v13  ;;  %v5446_v55 = vand.u32 8388607, %v11179_v63 }
 0x4c6   : > { %v5451_v3 = vsel %vm5450_vm9, %v5449_v27, 0  ;;  %v5185_v47 = vadd.s32 1, %v9957_v36  ;;  %v9981_v42 = vshrl.u32 %v4871_v29, %v4887_v7  ;;  %v9984_v9 = vadd.s32 4294967294, %v4779_v10 }
 0x4c7   : > { %v5453_v11 = vand.u32 31, %v5451_v3  ;;  %v6789_v18 = vmin.u32 %v5089_v60, %v9938_v51  ;;  %v4985_v8 = vsub.s32 0, %v9967_v0  ;;  %v5182_v21 = vmul.u32 %v5175_v41, %v5166_v28 }
 0x4c8   : > { %vm5184_vm5 = vc.u32 %v9962_v39, %v9956_v24  ;;  %v5299_v23 = vclz %v6797_v49  ;;  %v5447_v30 = vor.u32 8388608, %v5446_v55  ;;  %v5338_v7 = vand.u32 2139095040, %v9970_v15 }
 0x4c9   : > { %v5454_v19 = vsub.s32 32, %v5453_v11  ;;  %v5186_v59 = vsel %vm5184_vm5, %v5185_v47, %v9957_v36  ;;  %v5452_v44 = vshrl.u32 %v5451_v3, 5  ;;  %v11238_v45 = vmov 2475754826  }
 0x4ca   : > { %v5187_v13 = vadd.s32 %v5186_v59, %v5182_v21  ;;  %v11239_v27 = vmov 2131351028   ;;  %v5456_v60 = vshll.u32 %v11180_v22, %v5453_v11  ;;  %v5459_v41 = vshll.u32 %v11238_v45, %v5453_v11 }
 0x4cb   : > { %v5457_v31 = vshrl.u32 %v11238_v45, %v5454_v19  ;;  %v5460_v10 = vshrl.u32 %v11239_v27, %v5454_v19  ;;  %v5462_v33 = vshll.u32 %v11239_v27, %v5453_v11  ;;  %v11240_v29 = vmov 2102212464  }
 0x4cc   : > { %v5463_v28 = vshrl.u32 %v11240_v29, %v5454_v19  ;;  %v5091_v49 = vclz %v6789_v18  ;;  %v5188_v63 = vadd.s32 536870912, %v5187_v13  ;;  %v5465_v36 = vshll.u32 %v11240_v29, %v5453_v11 }
 0x4cd   : > { %v5466_v55 = vshrl.u32 %v11195_v32, %v5454_v19  ;;  %v6785_v3 = vmin.u32 %v4985_v8, %v9967_v0  ;;  %v5458_v47 = vor.u32 %v5457_v31, %v5456_v60  ;;  %v5461_v21 = vor.u32 %v5460_v10, %v5459_v41 }
 0x4ce   : > { %v5464_v59 = vor.u32 %v5463_v28, %v5462_v33  ;;  %v10001_v34 = vshrl.u32 %v5188_v63, 30  ;;  %v5468_v22 = vshll.u32 %v11195_v32, %v5453_v11  ;;  %v5469_v2 = vshrl.u32 %v11226_v14, %v5454_v19 }
 0x4cf   : > { %v5467_v17 = vor.u32 %v5466_v55, %v5465_v36  ;;  %v6798_v5 = vadd.s32 4294967294, %v5299_v23  ;;  %vm5474_vm6 = vcmp.lt.s32.totalorder %v5452_v44, 4  ;;  %v5487_v18 = vshll.u32 %v5447_v30, 8 }
 0x4d0   : > { %v5339_v54 = vshrl.u32 %v5338_v7, 23  ;;  %v5190_v1 = vshll.u32 %v10001_v34, 30  ;;  %v5470_v6 = vor.u32 %v5469_v2, %v5468_v22  ;;  %vm5471_vm10 = vcmp.lt.s32.totalorder %v5452_v44, 1 }
 0x4d1   : > { %v5476_v8 = vsel %vm5474_vm6, %v5464_v59, 2102212464  ;;  %v11241_v31 = vmov 683565275   ;;  %vm5473_vm11 = vcmp.lt.s32.totalorder %v5452_v44, 3  ;;  %v5479_v63 = vsel %vm5471_vm10, %v5458_v47, %v5461_v21 }
 0x4d2   : > { %v5455_v10 = vshrl.u32 %v11241_v31, %v5454_v19  ;;  %v5480_v60 = vsel %vm5474_vm6, %v5467_v17, 920167782  ;;  %v10009_v41 = vsub.s32 %v5187_v13, %v5190_v1  ;;  %vm5472_vm13 = vcmp.lt.s32.totalorder %v5452_v44, 2 }
 0x4d3   : > { %v5481_v11 = vsel %vm5473_vm11, %v5464_v59, %v5480_v60  ;;  %v5483_v23 = vsel %vm5471_vm10, %v5461_v21, %v5464_v59  ;;  %v5477_v30 = vsel %vm5473_vm11, %v5461_v21, %v5476_v8  ;;  %v5484_v2 = vsel %vm5474_vm6, %v5470_v6, 1326507024 }
 0x4d4   : > { %v5475_v33 = vsel %vm5471_vm10, %v5455_v10, %v5458_v47  ;;  %v5482_v7 = vsel %vm5472_vm13, %v5479_v63, %v5481_v11  ;;  %v5193_v22 = vsub.s32 0, %v10009_v41  ;;  %v5485_v28 = vsel %vm5473_vm11, %v5467_v17, %v5484_v2 }
 0x4d5   : > { %v10014_v36 = vmul.u32.u64.low %v5487_v18, %v5482_v7  ;;  %v10015_v19 = vmul.u32.u64.high %v5487_v18, %v5482_v7, %v10014_v36  ;;  %v6790_v55 = vadd.s32 4294967294, %v5091_v49  ;;  %vm6799_vm14 = vcmp.lt.s32.totalorder %v6798_v5, 0 }
 0x4d6   : > { %v5486_v1 = vsel %vm5472_vm13, %v5483_v23, %v5485_v28  ;;  %v6800_v13 = vadd.s32 4294967169, %v5339_v54  ;;  %vm6779_vm15 = vcmp.lt.s32.totalorder %v9984_v9, 0  ;;  %v4987_v47 = vclz %v6785_v3 }
 0x4d7   : > { %v10020_v21 = vmul.u32.u64.low %v5487_v18, %v5486_v1  ;;  %v10021_v59 = vmul.u32.u64.high %v5487_v18, %v5486_v1, %v10020_v21  ;;  %v6793_v6 = vmin.u32 %v5193_v22, %v10009_v41  ;;  %v5478_v8 = vsel %vm5472_vm13, %v5475_v33, %v5477_v30 }
 0x4d8   : > { %v5345_v17 = vadd.s32 1, %v6800_v13  ;;  %v11242_v10 = vshll.u32 %v9718_v43, %v9901_v35  ;;  %v11243_v63 = vshll.u32 %v9934_v4, 23  ;;  %v10035_v60 = vsel %vm6799_vm14, 0, %v6798_v5 }
 0x4d9   : > { %v5497_v3 = vadd.s32 1, %v10015_v19  ;;  %v10039_v11 = vsel %vm6779_vm15, 0, %v9984_v9  ;;  %vm6791_vm0 = vcmp.lt.s32.totalorder %v6790_v55, 0  ;;  %v11191_v44 = vand.u32 2147483647, %v9970_v15 }
 0x4da   : > { %v10029_v49 = vor.u32 %v9981_v42, %v11242_v10  ;;  %v10033_v54 = vor.u32 4788187, %v11243_v63  ;;  %vm5346_vm1 = vcmp.gt.s32.totalorder %v5345_v17, 0  ;;  %v6786_v23 = vadd.s32 4294967294, %v4987_v47 }
 0x4db   : > { %v5494_v43 = vmul.u32 %v5487_v18, %v5478_v8  ;;  %vm5496_vm3 = vc.u32 %v10021_v59, %v10014_v36  ;;  %v5347_v35 = vsel %vm5346_vm1, %v5345_v17, 0  ;;  %v5307_v4 = vsub.s32 4294967266, %v10035_v60 }
 0x4dc   : > { %v5195_v42 = vclz %v6793_v6  ;;  %v5498_v5 = vsel %vm5496_vm3, %v5497_v3, %v10015_v19  ;;  %v5349_v33 = vand.u32 31, %v5347_v35  ;;  %v4897_v30 = vcvt.s32.f32 %v10029_v49 }
 0x4dd   : > { %v10049_v9 = vadd.s32 %v9678_v46, %v9688_v58  ;;  %v10053_v7 = vadd.s32 %v9778_v12, %v9785_v53  ;;  %v5499_v18 = vadd.s32 %v5498_v5, %v5494_v43  ;;  %v4895_v2 = vand.u32 2147483647, %v10033_v54 }
 0x4de   : > { %v4783_v22 = vsub.s32 32, %v10039_v11  ;;  %v4787_v28 = vsub.s32 4294967266, %v10039_v11  ;;  %v5350_v1 = vsub.s32 32, %v5349_v33  ;;  %v10059_v19 = vsel %vm6791_vm0, 0, %v6790_v55 }
 0x4df   : > { %vm6787_vm8 = vcmp.lt.s32.totalorder %v6786_v23, 0  ;;  %v5500_v13 = vadd.s32 536870912, %v5499_v18  ;;  %v5342_v46 = vand.u32 8388607, %v11191_v44  ;;  %v10063_v58 = vadd.s32 127, %v5307_v4 }
 0x4e0   : > { %v6794_v12 = vadd.s32 4294967294, %v5195_v42  ;;  %v5353_v53 = vshrl.u32 %v11238_v45, %v5350_v1  ;;  %v5356_v47 = vshrl.u32 %v11239_v27, %v5350_v1  ;;  %v5352_v6 = vshll.u32 %v11241_v31, %v5349_v33 }
 0x4e1   : > { %v10067_v21 = vshrl.u32 %v5500_v13, 30  ;;  %v5355_v8 = vshll.u32 %v11238_v45, %v5349_v33  ;;  %v5359_v55 = vshrl.u32 %v11240_v29, %v5350_v1  ;;  %v5348_v17 = vshrl.u32 %v5347_v35, 5 }
 0x4e2   : > { %v5358_v10 = vshll.u32 %v11239_v27, %v5349_v33  ;;  %v5361_v49 = vshll.u32 %v11240_v29, %v5349_v33  ;;  %v5362_v63 = vshrl.u32 %v11195_v32, %v5350_v1  ;;  %v5287_v54 = vadd.s32 %v9878_v38, %v9887_v50 }
 0x4e3   : > { %v5502_v3 = vshll.u32 %v10067_v21, 30  ;;  %v5354_v43 = vor.u32 %v5353_v53, %v5352_v6  ;;  %v5357_v4 = vor.u32 %v5356_v47, %v5355_v8  ;;  %v5364_v13 = vshll.u32 %v11195_v32, %v5349_v33 }
 0x4e4   : > { %v5360_v42 = vor.u32 %v5359_v55, %v5358_v10  ;;  %v5363_v5 = vor.u32 %v5362_v63, %v5361_v49  ;;  %v5365_v44 = vshrl.u32 %v11226_v14, %v5350_v1  ;;  %v10081_v35 = vsel %vm6787_vm8, 0, %v6786_v23 }
 0x4e5   : > { %v5303_v29 = vsub.s32 32, %v10035_v60  ;;  %v5309_v27 = vshll.u32 %v10063_v58, 23  ;;  %v10085_v45 = vsub.s32 %v5499_v18, %v5502_v3  ;;  %vm6795_vm7 = vcmp.lt.s32.totalorder %v6794_v12, 0 }
 0x4e6   : > { %v5343_v38 = vor.u32 8388608, %v5342_v46  ;;  %v5366_v50 = vor.u32 %v5365_v44, %v5364_v13  ;;  %vm5367_vm2 = vcmp.lt.s32.totalorder %v5348_v17, 1  ;;  %vm5369_vm4 = vcmp.lt.s32.totalorder %v5348_v17, 3 }
 0x4e7   : > { %v5505_v53 = vsub.s32 0, %v10085_v45  ;;  %vm5370_vm9 = vcmp.lt.s32.totalorder %v5348_v17, 4  ;;  %v5375_v33 = vsel %vm5367_vm2, %v5354_v43, %v5357_v4  ;;  %v5379_v23 = vsel %vm5367_vm2, %v5357_v4, %v5360_v42 }
 0x4e8   : > { %v5372_v47 = vsel %vm5370_vm9, %v5360_v42, 2102212464  ;;  %v5376_v6 = vsel %vm5370_vm9, %v5363_v5, 920167782  ;;  %v5380_v8 = vsel %vm5370_vm9, %v5366_v50, 1326507024  ;;  %v5351_v18 = vshrl.u32 %v11241_v31, %v5350_v1 }
 0x4e9   : > { %v6805_v55 = vmin.u32 %v5505_v53, %v10085_v45  ;;  %vm5368_vm5 = vcmp.lt.s32.totalorder %v5348_v17, 2  ;;  %v5377_v46 = vsel %vm5369_vm4, %v5360_v42, %v5376_v6  ;;  %v10094_v44 = vsel %vm6795_vm7, 0, %v6794_v12 }
 0x4ea   : > { %v5378_v58 = vsel %vm5368_vm5, %v5375_v33, %v5377_v46  ;;  %v5381_v10 = vsel %vm5369_vm4, %v5363_v5, %v5380_v8  ;;  %v5383_v49 = vshll.u32 %v5343_v38, 8  ;;  %v5371_v3 = vsel %vm5367_vm2, %v5351_v18, %v5354_v43 }
 0x4eb   : > { %v5507_v63 = vclz %v6805_v55  ;;  %v5373_v13 = vsel %vm5369_vm4, %v5357_v4, %v5372_v47  ;;  %v5382_v50 = vsel %vm5368_vm5, %v5379_v23, %v5381_v10  ;;  %v10108_v12 = vmul.f32 %v4897_v30, %v4895_v2 }
 0x4ec   : > { %v10101_v53 = vmul.u32.u64.low %v5383_v49, %v5382_v50  ;;  %v10102_v1 = vmul.u32.u64.high %v5383_v49, %v5382_v50, %v10101_v53  ;;  %v10104_v32 = vmul.u32.u64.low %v5383_v49, %v5378_v58  ;;  %v10105_v42 = vmul.u32.u64.high %v5383_v49, %v5378_v58, %v10104_v32 }
 0x4ed   : > { %v4784_v5 = vshll.u32 %v9898_v56, %v10039_v11  ;;  %v4785_v38 = vshrl.u32 %v10049_v9, %v4783_v22  ;;  %v6806_v33 = vadd.s32 4294967294, %v5507_v63  ;;  %v4788_v43 = vadd.s32 127, %v4787_v28 }
 0x4ee   : > { %v5305_v6 = vshrl.u32 %v5287_v54, %v5303_v29  ;;  %v5203_v4 = vsub.s32 4294967266, %v10094_v44  ;;  %v5374_v47 = vsel %vm5368_vm5, %v5371_v3, %v5373_v13  ;;  %v5099_v23 = vsub.s32 4294967266, %v10059_v19 }
 0x4ef   : > { %v4995_v8 = vsub.s32 4294967266, %v10081_v35  ;;  %v5304_v30 = vshll.u32 %v9943_v26, %v10035_v60  ;;  %vm6807_vm6 = vcmp.lt.s32.totalorder %v6806_v33, 0  ;;  %v5310_v2 = vor.u32 4788187, %v5309_v27 }
 0x4f0   : > { %v5510_v55 = vsel %vm6807_vm6, 0, %v6806_v33  ;;  %vm5392_vm10 = vc.u32 %v10102_v1, %v10104_v32  ;;  %v5393_v56 = vadd.s32 1, %v10105_v42  ;;  %v5495_v29 = vadd.s32 %v10014_v36, %v10021_v59 }
 0x4f1   : > { %v5511_v11 = vsub.s32 32, %v5510_v55  ;;  %v5515_v9 = vsub.s32 4294967266, %v5510_v55  ;;  %v5390_v22 = vmul.u32 %v5383_v49, %v5374_v47  ;;  %v4789_v28 = vshll.u32 %v4788_v43, 23 }
 0x4f2   : > { %v5306_v17 = vor.u32 %v5305_v6, %v5304_v30  ;;  %v5204_v54 = vadd.s32 127, %v5203_v4  ;;  %v5394_v18 = vsel %vm5392_vm10, %v5393_v56, %v10105_v42  ;;  %v5512_v26 = vshll.u32 %v10085_v45, %v5510_v55 }
 0x4f3   : > { %v5513_v27 = vshrl.u32 %v5495_v29, %v5511_v11  ;;  %v5516_v60 = vadd.s32 127, %v5515_v9  ;;  %v5395_v46 = vadd.s32 %v5394_v18, %v5390_v22  ;;  %v10126_v58 = vor.u32 %v4785_v38, %v4784_v5 }
 0x4f4   : > { %v5100_v10 = vadd.s32 127, %v5099_v23  ;;  %v4996_v63 = vadd.s32 127, %v4995_v8  ;;  %v5311_v3 = vand.u32 2147483647, %v5310_v2  ;;  %v5199_v36 = vsub.s32 32, %v10094_v44 }
 0x4f5   : > { %v5514_v59 = vor.u32 %v5513_v27, %v5512_v26  ;;  %v5517_v13 = vshll.u32 %v5516_v60, 23  ;;  %v5396_v49 = vadd.s32 536870912, %v5395_v46  ;;  %v4790_v50 = vor.u32 4788187, %v4789_v28 }
 0x4f6   : > { %v5095_v53 = vsub.s32 32, %v10059_v19  ;;  %v4991_v42 = vsub.s32 32, %v10081_v35  ;;  %v5313_v33 = vcvt.s32.f32 %v5306_v17  ;;  %vm5233_vm11 = vcmp.lt.s32.totalorder %v9711_v61, 0 }
 0x4f7   : > { %v5183_v45 = vadd.s32 %v9956_v24, %v9962_v39  ;;  %v5205_v5 = vshll.u32 %v5204_v54, 23  ;;  %v5518_v38 = vor.u32 4788187, %v5517_v13  ;;  %v10134_v43 = vshrl.u32 %v5396_v49, 30 }
 0x4f8   : > { %v5101_v6 = vshll.u32 %v5100_v10, 23  ;;  %v4975_v4 = vadd.s32 %v9834_v25, %v9831_v16  ;;  %v4997_v47 = vshll.u32 %v4996_v63, 23  ;;  %v5314_v23 = vmul.f32 %v5313_v33, %v5311_v3 }
 0x4f9   : > { %v5201_v8 = vshrl.u32 %v5183_v45, %v5199_v36  ;;  %v5519_v30 = vand.u32 2147483647, %v5518_v38  ;;  %v5521_v2 = vcvt.s32.f32 %v5514_v59  ;;  %v5398_v55 = vshll.u32 %v10134_v43, 30 }
 0x4fa   : > { %v4793_v56 = vcvt.s32.f32 %v10126_v58  ;;  %v5096_v24 = vshll.u32 %v9938_v51, %v10059_v19  ;;  %v5097_v39 = vshrl.u32 %v10053_v7, %v5095_v53  ;;  %v4993_v29 = vshrl.u32 %v4975_v4, %v4991_v42 }
 0x4fb   : > { %v5200_v11 = vshll.u32 %v10009_v41, %v10094_v44  ;;  %v5206_v9 = vor.u32 4788187, %v5205_v5  ;;  %v5522_v16 = vmul.f32 %v5521_v2, %v5519_v30  ;;  %v5399_v25 = vsub.s32 %v5395_v46, %v5398_v55 }
 0x4fc   : > { %v5102_v22 = vor.u32 4788187, %v5101_v6  ;;  %v4992_v28 = vshll.u32 %v9967_v0, %v10081_v35  ;;  %v5315_v17 = vxor.u32 2147483648, %v5314_v23  ;;  %v5525_v54 = vsub.s32 4, %v10067_v21 }
 0x4fd   : > { %v4998_v18 = vor.u32 4788187, %v4997_v47  ;;  %v5202_v26 = vor.u32 %v5201_v8, %v5200_v11  ;;  %v5523_v27 = vxor.u32 2147483648, %v5522_v16  ;;  %v5401_v51 = vsub.s32 0, %v5399_v25 }
 0x4fe   : > { %v4791_v19 = vand.u32 2147483647, %v4790_v50  ;;  %v5098_v7 = vor.u32 %v5097_v39, %v5096_v24  ;;  %v4994_v60 = vor.u32 %v4993_v29, %v4992_v28  ;;  %vm5441_vm13 = vcmp.lt.s32.totalorder %v9895_v62, 0 }
 0x4ff   : > { %v5207_v41 = vand.u32 2147483647, %v5206_v9  ;;  %v5524_v44 = vsel %vm5441_vm13, %v5523_v27, %v5522_v16  ;;  %v6801_v58 = vmin.u32 %v5401_v51, %v5399_v25  ;;  %v11244_v46 = vand.u32 2147483647, %v9895_v62 }
 0x500   : > { %v5103_v0 = vand.u32 2147483647, %v5102_v22  ;;  %v5316_v35 = vsel %vm5233_vm11, %v5315_v17, %v5314_v23  ;;  %v5526_v63 = vsel %vm5441_vm13, %v5525_v54, %v10067_v21  ;;  %v4999_v36 = vand.u32 2147483647, %v4998_v18 }
 0x501   : > { %vm10151_vm14 = vcmp.le.f32.partialorder %v11244_v46, 0.7853982  ;;  %v5209_v59 = vcvt.s32.f32 %v5202_v26  ;;  %v5403_v13 = vclz %v6801_v58  ;;  %v5105_v49 = vcvt.s32.f32 %v5098_v7  ;;  %v11271_v7 = vld [vmem:[#allocation8_spill] sm:$0xff] }
 0x502   : > { %v5527_v3 = vsel %vm10151_vm14, %v9895_v62, %v5524_v44  ;;  %v5001_v50 = vcvt.s32.f32 %v4994_v60  ;;  %v11247_v53 = vand.u32 2147483647, %v9711_v61  ;;  %v5528_v21 = vsel %vm10151_vm14, 0, %v5526_v63 }
 0x503   : > { %7677 = vcosq.f32 %v5527_v3  ;;  %v5210_v33 = vmul.f32 %v5209_v59, %v5207_v41  ;;  %v6802_v45 = vadd.s32 4294967294, %v5403_v13  ;;  %v4794_v38 = vmul.f32 %v4793_v56, %v4791_v19 }
 0x504   : > { %7679 = vsinq.f32 %v5527_v3  ;;  %vm10163_vm15 = vcmp.le.f32.partialorder %v11247_v53, 0.7853982  ;;  %v5106_v6 = vmul.f32 %v5105_v49, %v5103_v0  ;;  %v5317_v4 = vsub.s32 4, %v9919_v57 }
 0x505   : > { %v5319_v5 = vsel %vm10163_vm15, %v9711_v61, %v5316_v35  ;;  %vm4817_vm0 = vcmp.lt.s32.totalorder %v9579_v20, 0  ;;  %vm4713_vm1 = vcmp.lt.s32.totalorder %v9582_v48, 0  ;;  %v5002_v47 = vmul.f32 %v5001_v50, %v4999_v36 }
 0x506   : > { %vm6803_vm3 = vcmp.lt.s32.totalorder %v6802_v45, 0  ;;  %v4899_v23 = vxor.u32 2147483648, %v10108_v12  ;;  %v5532_v30 = vadd.s32 3, %v5528_v21  ;;  %7681 = vsinq.f32 %v5319_v5 }
 0x507   : > { %v5406_v8 = vsel %vm6803_vm3, 0, %v6802_v45  ;;  %v5211_v2 = vxor.u32 2147483648, %v5210_v33  ;;  %v5391_v55 = vadd.s32 %v10104_v32, %v10102_v1  ;;  %v4795_v39 = vxor.u32 2147483648, %v4794_v38 }
 0x508   : > { %v5407_v24 = vsub.s32 32, %v5406_v8  ;;  %v5411_v56 = vsub.s32 4294967266, %v5406_v8  ;;  %v5107_v29 = vxor.u32 2147483648, %v5106_v6  ;;  %v5318_v11 = vsel %vm5233_vm11, %v5317_v4, %v9919_v57 }
 0x509   : > { %7683 = vcosq.f32 %v5319_v5  ;;  %v5003_v9 = vxor.u32 2147483648, %v5002_v47  ;;  %v5408_v16 = vshll.u32 %v5399_v25, %v5406_v8  ;;  %vm5025_vm8 = vcmp.lt.s32.totalorder %v9588_v52, 0 }
 0x50a   : > { %v5409_v22 = vshrl.u32 %v5391_v55, %v5407_v24  ;;  %v5412_v28 = vadd.s32 127, %v5411_v56  ;;  %vm4921_vm7 = vcmp.lt.s32.totalorder %v9627_v37, 0  ;;  %vm5129_vm2 = vcmp.lt.s32.totalorder %v9850_v40, 0 }
 0x50b   : > { %v5533_v32 = vand.u32 3, %v5532_v30  ;;  %v5212_v1 = vsel %vm5129_vm2, %v5211_v2, %v5210_v33  ;;  %v5320_v57 = vsel %vm10163_vm15, 0, %v5318_v11  ;;  %v4900_v25 = vsel %vm4817_vm0, %v4899_v23, %v10108_v12  ;;  %v11262_v23 = vld [vmem:[#allocation9_spill] sm:$0xff] }
 0x50c   : > { %v5410_v17 = vor.u32 %v5409_v22, %v5408_v16  ;;  %v5413_v54 = vshll.u32 %v5412_v28, 23  ;;  %v4796_v18 = vsel %vm4713_vm1, %v4795_v39, %v4794_v38  ;;  %v5108_v26 = vsel %vm5025_vm8, %v5107_v29, %v5106_v6 }
 0x50d   : > { %vm5337_vm4 = vcmp.lt.s32.totalorder %v9970_v15, 0  ;;  %v5004_v27 = vsel %vm4921_vm7, %v5003_v9, %v5002_v47  ;;  %vm5531_vm9 = vweird.f32 %v9895_v62  ;;  %v11250_v19 = vand.u32 2147483647, %v9850_v40 }
 0x50e   : > { %v5414_v51 = vor.u32 4788187, %v5413_v54  ;;  %vm5534_vm6 = vcmp.lt.s32.totalorder %v5533_v32, 2  ;;  %v5324_v60 = vadd.s32 3, %v5320_v57  ;;  %v5213_v41 = vsub.s32 4, %v10001_v34 }
 0x50f   : > { %vm10201_vm5 = vcmp.le.f32.partialorder %v11250_v19, 0.7853982  ;;  %v5417_v10 = vcvt.s32.f32 %v5410_v17  ;;  %v11253_v35 = vand.u32 2147483647, %v9588_v52  ;;  %vm5535_vm11 = vcmp.eq.s32.totalorder %v5533_v32, 0 }
 0x510   : > { %v7678_v12 = vpop.eup %7677  ;;  %v5215_v44 = vsel %vm10201_vm5, %v9850_v40, %v5212_v1  ;;  %v5415_v46 = vand.u32 2147483647, %v5414_v51  ;;  %vm5538_vm13 = vcmp.eq.s32.totalorder %v5533_v32, 2  ;;  %v11256_v49 = vand.u32 2147483647, %v9627_v37  ;;  %v11269_v1 = vld [vmem:[#allocation10_spill] sm:$0xff] }
 0x511   : > { %v7680_v58 = vpop.eup %7679  ;;  %v5539_v0 = vxor.u32 2147483648, %v7678_v12  ;;  %vm10211_vm10 = vcmp.le.f32.partialorder %v11253_v35, 0.7853982  ;;  %7685 = vcosq.f32 %v5215_v44  ;;  %v5421_v42 = vsub.s32 4, %v10134_v43 }
 0x512   : > { %v5536_v3 = vxor.u32 2147483648, %v7680_v58  ;;  %v5111_v36 = vsel %vm10211_vm10, %v9588_v52, %v5108_v26  ;;  %v5418_v59 = vmul.f32 %v5417_v10, %v5415_v46  ;;  %vm10220_vm14 = vcmp.le.f32.partialorder %v11256_v49, 0.7853982 }
 0x513   : > { %v5540_v13 = vsel %vm5538_vm13, %v5539_v0, %v7680_v58  ;;  %7687 = vsinq.f32 %v5215_v44  ;;  %v5007_v33 = vsel %vm10220_vm14, %v9627_v37, %v5004_v27  ;;  %v7682_v45 = vpop.eup %7681  ;;  %v11259_v38 = vand.u32 2147483647, %v9970_v15 }
 0x514   : > { %v5537_v53 = vsel %vm5535_vm11, %v7678_v12, %v5536_v3  ;;  %v5419_v21 = vxor.u32 2147483648, %v5418_v59  ;;  %7689 = vcosq.f32 %v5111_v36  ;;  %v5214_v47 = vsel %vm5129_vm2, %v5213_v41, %v10001_v34 }
 0x515   : > { %v5541_v5 = vsel %vm5534_vm6, %v5537_v53, %v5540_v13  ;;  %vm10231_vm15 = vcmp.le.f32.partialorder %v11259_v38, 0.7853982  ;;  %v5109_v8 = vsub.s32 4, %v11262_v23  ;;  %7691 = vsinq.f32 %v5111_v36 }
 0x516   : > { %v5542_v4 = vsel %vm5531_vm9, nan, %v5541_v5  ;;  %v7684_v30 = vpop.eup %7683  ;;  %v5420_v2 = vsel %vm5337_vm4, %v5419_v21, %v5418_v59  ;;  %v5325_v55 = vand.u32 3, %v5324_v60  ;;  %7693 = vcosq.f32 %v5007_v33 }
 0x517   : > { %7435 = vmatprep.subr.mxu1 %v5542_v4  ;;  %v11263_v24 = vand.u32 2147483647, %v9579_v20  ;;  %v5422_v62 = vsel %vm5337_vm4, %v5421_v42, %v10134_v43  ;;  %v5423_v34 = vsel %vm10231_vm15, %v9970_v15, %v5420_v2  ;;  %7695 = vsinq.f32 %v5007_v33 }
 0x518   : > { %7436 = vmatpush3.msra.mxu1 %v5542_v4  ;;  %7697 = vcosq.f32 %v5423_v34  ;;  %v5328_v29 = vxor.u32 2147483648, %v7682_v45  ;;  %v5216_v11 = vsel %vm10201_vm5, 0, %v5214_v47  ;;  %v11266_v9 = vand.u32 2147483647, %v9582_v48 }
 0x519   : > { %vm10245_vm3 = vcmp.le.f32.partialorder %v11263_v24, 0.7853982  ;;  %7699 = vsinq.f32 %v5423_v34  ;;  %v5331_v43 = vxor.u32 2147483648, %v7684_v30  ;;  %v5110_v22 = vsel %vm5025_vm8, %v5109_v8, %v11262_v23 }
 0x51a   : > { %v4903_v39 = vsel %vm10245_vm3, %v9579_v20, %v4900_v25  ;;  %vm10262_vm2 = vcmp.le.f32.partialorder %v11266_v9, 0.7853982  ;;  %v5424_v32 = vsel %vm10231_vm15, 0, %v5422_v62  ;;  %v5005_v17 = vsub.s32 4, %v11269_v1  ;;  %v11270_v25 = vld [vmem:[#allocation7_spill] sm:$0xff] }
 0x51b   : > { %v4799_v28 = vsel %vm10262_vm2, %v9582_v48, %v4796_v18  ;;  %7701 = vcosq.f32 %v4903_v39  ;;  %vm5327_vm4 = vcmp.eq.s32.totalorder %v5325_v55, 0  ;;  %v5220_v54 = vadd.s32 3, %v5216_v11 }
 0x51c   : > { %7703 = vsinq.f32 %v4903_v39  ;;  %vm5330_vm9 = vcmp.eq.s32.totalorder %v5325_v55, 2  ;;  %v5112_v57 = vsel %vm10211_vm10, 0, %v5110_v22  ;;  %v4901_v26 = vsub.s32 4, %v11270_v25 }
 0x51d   : > { %7705 = vcosq.f32 %v4799_v28  ;;  %v5428_v27 = vadd.s32 3, %v5424_v32  ;;  %v5329_v51 = vsel %vm5327_vm4, %v7684_v30, %v5328_v29  ;;  %v5332_v19 = vsel %vm5330_vm9, %v5331_v43, %v7682_v45 }
 0x51e   : > { %7707 = vsinq.f32 %v4799_v28  ;;  %v5006_v18 = vsel %vm4921_vm7, %v5005_v17, %v11269_v1  ;;  %v4797_v12 = vsub.s32 4, %v11271_v7  ;;  %v7686_v60 = vpop.eup %7685  ;;  %vm5326_vm8 = vcmp.lt.s32.totalorder %v5325_v55, 2 }
 0x51f   : > { %v5221_v41 = vand.u32 3, %v5220_v54  ;;  %v5116_v44 = vadd.s32 3, %v5112_v57  ;;  %v5333_v46 = vsel %vm5326_vm8, %v5329_v51, %v5332_v19  ;;  %v4902_v10 = vsel %vm4817_vm0, %v4901_v26, %v11270_v25 }
 0x520   : > { %v7688_v58 = vpop.eup %7687  ;;  %v5429_v35 = vand.u32 3, %v5428_v27  ;;  %v5008_v63 = vsel %vm10220_vm14, 0, %v5006_v18  ;;  %vm5427_vm7 = vweird.f32 %v9970_v15  ;;  %vm5323_vm5 = vweird.f32 %v9711_v61 }
 0x521   : > { %v7690_v0 = vpop.eup %7689  ;;  %v4798_v36 = vsel %vm4713_vm1, %v4797_v12, %v11271_v7  ;;  %v5334_v13 = vsel %vm5323_vm5, nan, %v5333_v46  ;;  %vm5222_vm6 = vcmp.lt.s32.totalorder %v5221_v41, 2  ;;  %v5117_v49 = vand.u32 3, %v5116_v44 }
 0x522   : > { %v7692_v3 = vpop.eup %7691  ;;  %v4904_v53 = vsel %vm10245_vm3, 0, %v4902_v10  ;;  %vm5223_vm0 = vcmp.eq.s32.totalorder %v5221_v41, 0  ;;  %vm5226_vm10 = vcmp.eq.s32.totalorder %v5221_v41, 2  ;;  %v5227_v50 = vxor.u32 2147483648, %v7686_v60 }
 0x523   : > { %v7694_v59 = vpop.eup %7693  ;;  %v5012_v33 = vadd.s32 3, %v5008_v63  ;;  %vm5430_vm11 = vcmp.lt.s32.totalorder %v5429_v35, 2  ;;  %vm5431_vm13 = vcmp.eq.s32.totalorder %v5429_v35, 0  ;;  %v5224_v61 = vxor.u32 2147483648, %v7688_v58  ;;  %v6814_v63 = vld [vmem:[%s11159_s5 + $0x70] sm:$0xff] }
 0x524   : > { %v7696_v42 = vpop.eup %7695  ;;  %v4800_v21 = vsel %vm10262_vm2, 0, %v4798_v36  ;;  %vm5434_vm1 = vcmp.eq.s32.totalorder %v5429_v35, 2  ;;  %v5120_v6 = vxor.u32 2147483648, %v7692_v3  ;;  %v4908_v4 = vadd.s32 3, %v4904_v53  ;;  %v6813_v35 = vld [vmem:[%s11159_s5 + $0x68] sm:$0xff]  ;;  %v10337_v36 = vpop.permute.xlu0 %5598 }
 0x525   : > { %v7698_v45 = vpop.eup %7697  ;;  %vm5118_vm14 = vcmp.lt.s32.totalorder %v5117_v49, 2  ;;  %vm5119_vm15 = vcmp.eq.s32.totalorder %v5117_v49, 0  ;;  %v5123_v8 = vxor.u32 2147483648, %v7690_v0  ;;  %v5228_v55 = vsel %vm5226_vm10, %v5227_v50, %v7688_v58 }
 0x526   : > { %v7700_v5 = vpop.eup %7699  ;;  %v5435_v38 = vxor.u32 2147483648, %v7698_v45  ;;  %v5013_v24 = vand.u32 3, %v5012_v33  ;;  %v4804_v56 = vadd.s32 3, %v4800_v21  ;;  %v5225_v39 = vsel %vm5223_vm0, %v7686_v60, %v5224_v61 }
 0x527   : > { %v5432_v23 = vxor.u32 2147483648, %v7700_v5  ;;  %v5016_v29 = vxor.u32 2147483648, %v7696_v42  ;;  %v5019_v11 = vxor.u32 2147483648, %v7694_v59  ;;  %v5121_v43 = vsel %vm5119_vm15, %v7690_v0, %v5120_v6  ;;  %v6809_v0 = vld [vmem:[%s11159_s5 + $0x48] sm:$0xff] }
 0x528   : > { %v7702_v47 = vpop.eup %7701  ;;  %v5436_v2 = vsel %vm5434_vm1, %v5435_v38, %v7700_v5  ;;  %vm5122_vm3 = vcmp.eq.s32.totalorder %v5117_v49, 2  ;;  %v4909_v22 = vand.u32 3, %v4908_v4  ;;  %v5229_v54 = vsel %vm5222_vm6, %v5225_v39, %v5228_v55 }
 0x529   : > { %v7704_v30 = vpop.eup %7703  ;;  %v5433_v34 = vsel %vm5431_vm13, %v7698_v45, %v5432_v23  ;;  %v5124_v32 = vsel %vm5122_vm3, %v5123_v8, %v7692_v3  ;;  %v4915_v17 = vxor.u32 2147483648, %v7702_v47  ;;  %vm5015_vm2 = vcmp.eq.s32.totalorder %v5013_v24, 0  ;;  %v6815_v3 = vld [vmem:[%s11159_s5 + $0x78] sm:$0xff] }
 0x52a   : > { %v7706_v62 = vpop.eup %7705  ;;  %v5437_v16 = vsel %vm5430_vm11, %v5433_v34, %v5436_v2  ;;  %v4912_v1 = vxor.u32 2147483648, %v7704_v30  ;;  %vm5018_vm4 = vcmp.eq.s32.totalorder %v5013_v24, 2  ;;  %v4805_v57 = vand.u32 3, %v4804_v56 }
 0x52b   : > { %v7708_v9 = vpop.eup %7707  ;;  %v5438_v28 = vsel %vm5427_vm7, nan, %v5437_v16  ;;  %v5017_v25 = vsel %vm5015_vm2, %v7694_v59, %v5016_v29  ;;  %v5020_v26 = vsel %vm5018_vm4, %v5019_v11, %v7696_v42  ;;  %v4811_v51 = vxor.u32 2147483648, %v7706_v62  ;;  %v10339_v59 = vpop.permute.xlu1 %5593 }
 0x52c   : > { %7437 = vmatprep.subr.mxu1 %v5438_v28  ;;  %v4808_v27 = vxor.u32 2147483648, %v7708_v9  ;;  %vm5219_vm9 = vweird.f32 %v9850_v40  ;;  %v5125_v15 = vsel %vm5118_vm14, %v5121_v43, %v5124_v32  ;;  %vm4911_vm8 = vcmp.eq.s32.totalorder %v4909_v22, 0 }
 0x52d   : > { %7438 = vmatpush3.msra.mxu1 %v5438_v28  ;;  %vm4914_vm7 = vcmp.eq.s32.totalorder %v4909_v22, 2  ;;  %v5230_v19 = vsel %vm5219_vm9, nan, %v5229_v54  ;;  %vm5014_vm5 = vcmp.lt.s32.totalorder %v5013_v24, 2  ;;  %v4913_v18 = vsel %vm4911_vm8, %v7702_v47, %v4912_v1 }
 0x52e   : > { %7439 = vmatprep.subr.mxu1 %v5334_v13  ;;  %v4916_v7 = vsel %vm4914_vm7, %v4915_v17, %v7704_v30  ;;  %vm5115_vm6 = vweird.f32 %v9588_v52  ;;  %v5021_v12 = vsel %vm5014_vm5, %v5017_v25, %v5020_v26  ;;  %vm4807_vm0 = vcmp.eq.s32.totalorder %v4805_v57, 0 }
 0x52f   : > { %7440 = vmatpush3.msra.mxu1 %v5334_v13  ;;  %vm4810_vm10 = vcmp.eq.s32.totalorder %v4805_v57, 2  ;;  %v5126_v60 = vsel %vm5115_vm6, nan, %v5125_v15  ;;  %vm4910_vm11 = vcmp.lt.s32.totalorder %v4909_v22, 2  ;;  %v4809_v41 = vsel %vm4807_vm0, %v7706_v62, %v4808_v27  ;;  %v10341_v13 = vpop.permute.xlu0 %5588  ;;  %v10343_v49 = vpop.permute.xlu1 %5583 }
 0x530   : > { %7441 = vmatprep.subr.mxu1 %v5230_v19  ;;  %v4812_v40 = vsel %vm4810_vm10, %v4811_v51, %v7708_v9  ;;  %vm5011_vm13 = vweird.f32 %v9627_v37  ;;  %v4917_v44 = vsel %vm4910_vm11, %v4913_v18, %v4916_v7  ;;  %vm4806_vm1 = vcmp.lt.s32.totalorder %v4805_v57, 2  ;;  %v6810_v37 = vld [vmem:[%s11159_s5 + $0x50] sm:$0xff] }
 0x531   : > { %7442 = vmatpush3.msra.mxu1 %v5230_v19  ;;  %v5022_v58 = vsel %vm5011_vm13, nan, %v5021_v12  ;;  %vm4907_vm14 = vweird.f32 %v9579_v20  ;;  %v4813_v46 = vsel %vm4806_vm1, %v4809_v41, %v4812_v40  ;;  %vm4803_vm15 = vweird.f32 %v9582_v48  ;;  %v6811_v20 = vld [vmem:[%s11159_s5 + $0x58] sm:$0xff]  ;;  %v6812_v48 = vld [vmem:[%s11159_s5 + $0x60] sm:$0xff] }
 0x532   : > { %7443 = vmatprep.subr.mxu1 %v5126_v60  ;;  %v4918_v52 = vsel %vm4907_vm14, nan, %v4917_v44  ;;  %v4814_v10 = vsel %vm4803_vm15, nan, %v4813_v46  ;;  %v11272_v11 = vmov 2475754826   ;;  %v11273_v16 = vmov 2131351028  }
 0x533   : > { %7444 = vmatpush3.msra.mxu1 %v5126_v60  ;;  %v5579_v53 = vpop.permute.xlu0 %5578  ;;  %v10345_v42 = vpop.permute.xlu1 %5573  ;;  %v11274_v22 = vmov 2102212464   ;;  %v11275_v1 = vmov 920167782  }
 0x534   : > { %7445 = vmatprep.subr.mxu1 %v5022_v58 }
 0x535   : > { %7446 = vmatpush3.msra.mxu1 %v5022_v58 }
 0x536   : > { %7447 = vmatprep.subr.mxu1 %v4918_v52 }
 0x537   : > { %7448 = vmatpush3.msra.mxu1 %v4918_v52  ;;  %v5569_v50 = vpop.permute.xlu0 %5568  ;;  %v5564_v61 = vpop.permute.xlu1 %5563 }
 0x538   : > { %7449 = vmatprep.subr.mxu1 %v4814_v10 }
 0x539   : > { %7450 = vmatpush3.msra.mxu1 %v4814_v10 }
 0x53a   : > { %7452 = vmatmul.mubr.msk.f32.vlgmr.msra.gmra.mxu1 %vm4581_vm12, %v6809_v0 }
 0x53b   : > { %7454 = vmatprep.mubr.msk.f32.mxu1 %vm4581_vm12, %v6810_v37 }
 0x53e   : > { %7455 = vmatmul.mubr.msk.f32.gmra.mxu1 %vm4581_vm12, %v6811_v20 }
 0x53f   : > { %7457 = vmatprep.mubr.msk.f32.mxu1 %vm4581_vm12, %v6812_v48 }
 0x542   : > { %7458 = vmatmul.mubr.msk.f32.gmra.mxu1 %vm4581_vm12, %v6813_v35 }
 0x543   : > { %7460 = vmatprep.mubr.msk.f32.mxu1 %vm4581_vm12, %v6814_v63 }
 0x546   : > { %7461 = vmatmul.mubr.msk.f32.gmra.mxu1 %vm4581_vm12, %v6815_v3 }
 0x5fa   : > { %v7453_v33 = vpop.f32.mrf.mxu1 }
 0x5fb   : > { %v10347_v45 = vadd.f32 %v7453_v33, %v5569_v50 }
 0x5fc   : > { %v5691_v21 = vpop.f32.mrf.mxu1 }
 0x5fd   : > { %v5837_v5 = vand.u32 2139095040, %v10347_v45  ;;  %v10350_v38 = vadd.f32 %v5691_v21, %v5564_v61  ;;  %v11200_v62 = vand.u32 2147483647, %v10347_v45 }
 0x5fe   : > { %v7456_v24 = vpop.f32.mrf.mxu1 }
 0x5ff   : > { %v5838_v6 = vshrl.u32 %v5837_v5, 23  ;;  %v5733_v4 = vand.u32 2139095040, %v10350_v38  ;;  %v10354_v39 = vadd.f32 %v7456_v24, %v5579_v53  ;;  %v5841_v51 = vand.u32 8388607, %v11200_v62 }
 0x600   : > { %v5701_v5 = vpop.f32.mrf.mxu1 }
 0x601   : > { %v6836_v47 = vadd.s32 4294967169, %v5838_v6  ;;  %v5734_v23 = vshrl.u32 %v5733_v4, 23  ;;  %v6045_v41 = vand.u32 2139095040, %v10354_v39  ;;  %v5842_v58 = vor.u32 8388608, %v5841_v51 }
 0x603   : > { %v5844_v8 = vadd.s32 1, %v6836_v47  ;;  %v6832_v2 = vadd.s32 4294967169, %v5734_v23  ;;  %v6046_v37 = vshrl.u32 %v6045_v41, 23  ;;  %v5882_v63 = vshll.u32 %v5842_v58, 8 }
 0x605   : > { %vm5845_vm3 = vcmp.gt.s32.totalorder %v5844_v8, 0  ;;  %v5740_v34 = vadd.s32 1, %v6832_v2  ;;  %v6844_v3 = vadd.s32 4294967169, %v6046_v37 }
 0x606   : > { %v5846_v30 = vsel %vm5845_vm3, %v5844_v8, 0  ;;  %v11197_v8 = vand.u32 2147483647, %v10350_v38 }
 0x607   : > { %v5848_v55 = vand.u32 31, %v5846_v30  ;;  %v10356_v29 = vshrl.u32 %v5846_v30, 5  ;;  %vm5741_vm2 = vcmp.gt.s32.totalorder %v5740_v34, 0  ;;  %v6052_v4 = vadd.s32 1, %v6844_v3 }
 0x608   : > { %v5742_v44 = vsel %vm5741_vm2, %v5740_v34, 0  ;;  %v5737_v51 = vand.u32 8388607, %v11197_v8 }
 0x609   : > { %v5849_v56 = vsub.s32 32, %v5848_v55  ;;  %v5860_v32 = vshll.u32 %v11274_v22, %v5848_v55  ;;  %v5863_v54 = vshll.u32 %v11275_v1, %v5848_v55  ;;  %v5851_v25 = vshll.u32 %v11241_v31, %v5848_v55 }
 0x60a   : > { %v5854_v26 = vshll.u32 %v11272_v11, %v5848_v55  ;;  %v5857_v27 = vshll.u32 %v11273_v16, %v5848_v55  ;;  %vm5869_vm4 = vcmp.lt.s32.totalorder %v10356_v29, 4  ;;  %vm5866_vm9 = vcmp.lt.s32.totalorder %v10356_v29, 1 }
 0x60b   : > { %v5852_v9 = vshrl.u32 %v11272_v11, %v5849_v56  ;;  %v5855_v43 = vshrl.u32 %v11273_v16, %v5849_v56  ;;  %v5858_v28 = vshrl.u32 %v11274_v22, %v5849_v56  ;;  %v5861_v17 = vshrl.u32 %v11275_v1, %v5849_v56 }
 0x60c   : > { %v5864_v57 = vshrl.u32 %v11226_v14, %v5849_v56  ;;  %vm5868_vm8 = vcmp.lt.s32.totalorder %v10356_v29, 3  ;;  %vm5867_vm7 = vcmp.lt.s32.totalorder %v10356_v29, 2  ;;  %v5744_v20 = vand.u32 31, %v5742_v44 }
 0x60d   : > { %v5862_v15 = vor.u32 %v5861_v17, %v5860_v32  ;;  %v5853_v18 = vor.u32 %v5852_v9, %v5851_v25  ;;  %v5856_v7 = vor.u32 %v5855_v43, %v5854_v26  ;;  %v5859_v12 = vor.u32 %v5858_v28, %v5857_v27 }
 0x60e   : > { %v5865_v19 = vor.u32 %v5864_v57, %v5863_v54  ;;  %v10395_v33 = vsub.s32 32, %v5744_v20  ;;  %v5850_v47 = vshrl.u32 %v11241_v31, %v5849_v56  ;;  %v10406_v30 = vshrl.u32 %v5742_v44, 5 }
 0x60f   : > { %v5875_v60 = vsel %vm5869_vm4, %v5862_v15, 920167782  ;;  %v5874_v46 = vsel %vm5866_vm9, %v5853_v18, %v5856_v7  ;;  %v5878_v10 = vsel %vm5866_vm9, %v5856_v7, %v5859_v12  ;;  %v5871_v6 = vsel %vm5869_vm4, %v5859_v12, 2102212464 }
 0x610   : > { %v5879_v40 = vsel %vm5869_vm4, %v5865_v19, 1326507024  ;;  %v5876_v52 = vsel %vm5868_vm8, %v5859_v12, %v5875_v60  ;;  %v5757_v23 = vshrl.u32 %v11275_v1, %v10395_v33  ;;  %v5760_v2 = vshrl.u32 %v11226_v14, %v10395_v33 }
 0x611   : > { %v5880_v0 = vsel %vm5868_vm8, %v5862_v15, %v5879_v40  ;;  %v5877_v48 = vsel %vm5867_vm7, %v5874_v46, %v5876_v52  ;;  %v10411_v55 = vadd.f32 %v5701_v5, %v10345_v42  ;;  %v5870_v24 = vsel %vm5866_vm9, %v5850_v47, %v5853_v18 }
 0x612   : > { %v5881_v35 = vsel %vm5867_vm7, %v5878_v10, %v5880_v0  ;;  %v10391_v53 = vmul.u32.u64.low %v5882_v63, %v5877_v48  ;;  %v10392_v50 = vmul.u32.u64.high %v5882_v63, %v5877_v48, %v10391_v53  ;;  %v5872_v34 = vsel %vm5868_vm8, %v5856_v7, %v5871_v6 }
 0x613   : > { %v10397_v61 = vmul.u32.u64.low %v5882_v63, %v5881_v35  ;;  %v10398_v21 = vmul.u32.u64.high %v5882_v63, %v5881_v35, %v10397_v61  ;;  %v5748_v56 = vshrl.u32 %v11272_v11, %v10395_v33  ;;  %v5756_v9 = vshll.u32 %v11274_v22, %v5744_v20 }
 0x614   : > { %v5751_v43 = vshrl.u32 %v11273_v16, %v10395_v33  ;;  %v5754_v28 = vshrl.u32 %v11274_v22, %v10395_v33  ;;  %v5759_v42 = vshll.u32 %v11275_v1, %v5744_v20  ;;  %vm6053_vm5 = vcmp.gt.s32.totalorder %v6052_v4, 0 }
 0x615   : > { %v5892_v32 = vadd.s32 1, %v10392_v50  ;;  %v5747_v17 = vshll.u32 %v11241_v31, %v5744_v20  ;;  %v5758_v54 = vor.u32 %v5757_v23, %v5756_v9  ;;  %vm5891_vm6 = vc.u32 %v10398_v21, %v10391_v53 }
 0x616   : > { %v5750_v57 = vshll.u32 %v11272_v11, %v5744_v20  ;;  %v5753_v25 = vshll.u32 %v11273_v16, %v5744_v20  ;;  %v5761_v26 = vor.u32 %v5760_v2, %v5759_v42  ;;  %v5873_v27 = vsel %vm5867_vm7, %v5870_v24, %v5872_v34 }
 0x617   : > { %v6054_v15 = vsel %vm6053_vm5, %v6052_v4, 0  ;;  %v5941_v19 = vand.u32 2139095040, %v10411_v55  ;;  %v5749_v18 = vor.u32 %v5748_v56, %v5747_v17  ;;  %vm5765_vm0 = vcmp.lt.s32.totalorder %v10406_v30, 4 }
 0x618   : > { %v5752_v7 = vor.u32 %v5751_v43, %v5750_v57  ;;  %v5755_v12 = vor.u32 %v5754_v28, %v5753_v25  ;;  %v5893_v60 = vsel %vm5891_vm6, %v5892_v32, %v10392_v50  ;;  %v5771_v41 = vsel %vm5765_vm0, %v5758_v54, 920167782 }
 0x619   : > { %v5889_v40 = vmul.u32 %v5882_v63, %v5873_v27  ;;  %v5775_v29 = vsel %vm5765_vm0, %v5761_v26, 1326507024  ;;  %v6056_v44 = vand.u32 31, %v6054_v15  ;;  %vm5762_vm10 = vcmp.lt.s32.totalorder %v10406_v30, 1 }
 0x61a   : > { %vm5764_vm11 = vcmp.lt.s32.totalorder %v10406_v30, 3  ;;  %v5942_v58 = vshrl.u32 %v5941_v19, 23  ;;  %v5738_v52 = vor.u32 8388608, %v5737_v51  ;;  %v5770_v10 = vsel %vm5762_vm10, %v5749_v18, %v5752_v7 }
 0x61b   : > { %v5894_v46 = vadd.s32 %v5893_v60, %v5889_v40  ;;  %v5772_v0 = vsel %vm5764_vm11, %v5755_v12, %v5771_v41  ;;  %v5774_v37 = vsel %vm5762_vm10, %v5752_v7, %v5755_v12  ;;  %v5776_v20 = vsel %vm5764_vm11, %v5758_v54, %v5775_v29 }
 0x61c   : > { %vm5763_vm13 = vcmp.lt.s32.totalorder %v10406_v30, 2  ;;  %v10453_v48 = vsub.s32 32, %v6056_v44  ;;  %v6840_v63 = vadd.s32 4294967169, %v5942_v58  ;;  %v5778_v61 = vshll.u32 %v5738_v52, 8 }
 0x61d   : > { %v5773_v35 = vsel %vm5763_vm13, %v5770_v10, %v5772_v0  ;;  %v5895_v3 = vadd.s32 536870912, %v5894_v46  ;;  %v5777_v50 = vsel %vm5763_vm13, %v5774_v37, %v5776_v20  ;;  %v11201_v2 = vand.u32 2147483647, %v10354_v39  ;;  %v7459_v20 = vpop.f32.mrf.mxu1 }
 0x61e   : > { %v10459_v5 = vmul.u32.u64.low %v5778_v61, %v5773_v35  ;;  %v10460_v6 = vmul.u32.u64.high %v5778_v61, %v5773_v35, %v10459_v5  ;;  %v6069_v4 = vshrl.u32 %v11275_v1, %v10453_v48  ;;  %v5948_v24 = vadd.s32 1, %v6840_v63 }
 0x61f   : > { %v10465_v47 = vmul.u32.u64.low %v5778_v61, %v5777_v50  ;;  %v10466_v23 = vmul.u32.u64.high %v5778_v61, %v5777_v50, %v10465_v47  ;;  %v10469_v34 = vshrl.u32 %v5895_v3, 30  ;;  %v6060_v56 = vshrl.u32 %v11272_v11, %v10453_v48 }
 0x620   : > { %v6068_v9 = vshll.u32 %v11274_v22, %v6056_v44  ;;  %v6072_v43 = vshrl.u32 %v11226_v14, %v10453_v48  ;;  %v10476_v28 = vshrl.u32 %v6054_v15, 5  ;;  %v6063_v42 = vshrl.u32 %v11273_v16, %v10453_v48 }
 0x621   : > { %11276 = vst [vmem:[#allocation9_spill] sm:$0xff] %v10469_v34  ;;  %v6066_v32 = vshrl.u32 %v11274_v22, %v10453_v48  ;;  %vm5949_vm1 = vcmp.gt.s32.totalorder %v5948_v24, 0  ;;  %v6059_v17 = vshll.u32 %v11241_v31, %v6056_v44  ;;  %v6071_v57 = vshll.u32 %v11275_v1, %v6056_v44 }
 0x622   : > { %v6070_v54 = vor.u32 %v6069_v4, %v6068_v9  ;;  %v5950_v25 = vsel %vm5949_vm1, %v5948_v24, 0  ;;  %v5767_v26 = vsel %vm5765_vm0, %v5755_v12, 2102212464  ;;  %v6049_v27 = vand.u32 8388607, %v11201_v2 }
 0x623   : > { %v6062_v51 = vshll.u32 %v11272_v11, %v6056_v44  ;;  %v6065_v15 = vshll.u32 %v11273_v16, %v6056_v44  ;;  %v5746_v19 = vshrl.u32 %v11241_v31, %v10395_v33  ;;  %v10492_v60 = vor.u32 %v6060_v56, %v6059_v17 }
 0x624   : > { %v6073_v41 = vor.u32 %v6072_v43, %v6071_v57  ;;  %vm6077_vm14 = vcmp.lt.s32.totalorder %v10476_v28, 4  ;;  %v5952_v58 = vand.u32 31, %v5950_v25  ;;  %v5897_v12 = vshll.u32 %v10469_v34, 30 }
 0x625   : > { %v10494_v40 = vor.u32 %v6063_v42, %v6062_v51  ;;  %v6067_v29 = vor.u32 %v6066_v32, %v6065_v15  ;;  %v5766_v52 = vsel %vm5762_vm10, %v5746_v19, %v5749_v18  ;;  %v5768_v44 = vsel %vm5764_vm11, %v5752_v7, %v5767_v26 }
 0x626   : > { %v6083_v33 = vsel %vm6077_vm14, %v6070_v54, 920167782  ;;  %v5788_v10 = vadd.s32 1, %v10460_v6  ;;  %v6050_v0 = vor.u32 8388608, %v6049_v27  ;;  %v11198_v37 = vand.u32 2147483647, %v10411_v55 }
 0x627   : > { %vm5787_vm15 = vc.u32 %v10466_v23, %v10459_v5  ;;  %vm6074_vm3 = vcmp.lt.s32.totalorder %v10476_v28, 1  ;;  %vm6076_vm2 = vcmp.lt.s32.totalorder %v10476_v28, 3  ;;  %v6087_v18 = vsel %vm6077_vm14, %v6073_v41, 1326507024 }
 0x628   : > { %v5769_v7 = vsel %vm5763_vm13, %v5766_v52, %v5768_v44  ;;  %v6082_v35 = vsel %vm6074_vm3, %v10492_v60, %v10494_v40  ;;  %v6084_v63 = vsel %vm6076_vm2, %v6067_v29, %v6083_v33  ;;  %v10520_v3 = vsub.s32 32, %v5952_v58 }
 0x629   : > { %v10522_v50 = vsub.s32 %v5894_v46, %v5897_v12  ;;  %v10525_v4 = vadd.f32 %v7459_v20, %v10341_v13  ;;  %v5789_v47 = vsel %vm5787_vm15, %v5788_v10, %v10460_v6  ;;  %vm6075_vm4 = vcmp.lt.s32.totalorder %v10476_v28, 2 }
 0x62a   : > { %v6086_v30 = vsel %vm6074_vm3, %v10494_v40, %v6067_v29  ;;  %v6088_v24 = vsel %vm6076_vm2, %v6070_v54, %v6087_v18  ;;  %v5785_v56 = vmul.u32 %v5778_v61, %v5769_v7  ;;  %v6085_v9 = vsel %vm6075_vm4, %v6082_v35, %v6084_v63 }
 0x62b   : > { %v10536_v46 = vshll.u32 %v6050_v0, 8  ;;  %v5945_v13 = vand.u32 8388607, %v11198_v37  ;;  %v5965_v6 = vshrl.u32 %v11275_v1, %v10520_v3  ;;  %v5900_v43 = vsub.s32 0, %v10522_v50 }
 0x62c   : > { %v5790_v42 = vadd.s32 %v5789_v47, %v5785_v56  ;;  %v6089_v32 = vsel %vm6075_vm4, %v6086_v30, %v6088_v24  ;;  %v6253_v17 = vand.u32 2139095040, %v10525_v4  ;;  %v5964_v57 = vshll.u32 %v11274_v22, %v5952_v58 }
 0x62d   : > { %v10547_v61 = vmul.u32.u64.low %v10536_v46, %v6085_v9  ;;  %v10548_v54 = vmul.u32.u64.high %v10536_v46, %v6085_v9, %v10547_v61  ;;  %v5968_v26 = vshrl.u32 %v11226_v14, %v10520_v3  ;;  %v10554_v27 = vshrl.u32 %v5950_v25, 5 }
 0x62e   : > { %v5956_v51 = vshrl.u32 %v11272_v11, %v10520_v3  ;;  %v5959_v15 = vshrl.u32 %v11273_v16, %v10520_v3  ;;  %v5962_v19 = vshrl.u32 %v11274_v22, %v10520_v3  ;;  %v5966_v52 = vor.u32 %v5965_v6, %v5964_v57 }
 0x62f   : > { %v10563_v41 = vmul.u32.u64.low %v10536_v46, %v6089_v32  ;;  %v10564_v12 = vmul.u32.u64.high %v10536_v46, %v6089_v32, %v10563_v41  ;;  %v5967_v44 = vshll.u32 %v11275_v1, %v5952_v58  ;;  %v5955_v33 = vshll.u32 %v11241_v31, %v5952_v58 }
 0x630   : > { %v5958_v25 = vshll.u32 %v11272_v11, %v5952_v58  ;;  %v5961_v10 = vshll.u32 %v11273_v16, %v5952_v58  ;;  %v6254_v0 = vshrl.u32 %v6253_v17, 23  ;;  %v5791_v20 = vadd.s32 536870912, %v5790_v42 }
 0x631   : > { %v6058_v18 = vshrl.u32 %v11241_v31, %v10453_v48  ;;  %v6079_v7 = vsel %vm6077_vm14, %v6067_v29, 2102212464  ;;  %v5969_v35 = vor.u32 %v5968_v26, %v5967_v44  ;;  %v10574_v63 = vor.u32 %v5956_v51, %v5955_v33 }
 0x632   : > { %v10576_v47 = vor.u32 %v5959_v15, %v5958_v25  ;;  %v5963_v30 = vor.u32 %v5962_v19, %v5961_v10  ;;  %vm5973_vm9 = vcmp.lt.s32.totalorder %v10554_v27, 4  ;;  %v6837_v24 = vmin.u32 %v5900_v43, %v10522_v50 }
 0x633   : > { %v5946_v56 = vor.u32 8388608, %v5945_v13  ;;  %v5979_v58 = vsel %vm5973_vm9, %v5966_v52, 920167782  ;;  %v6078_v48 = vsel %vm6074_vm3, %v6058_v18, %v10492_v60  ;;  %v6080_v29 = vsel %vm6076_vm2, %v10494_v40, %v6079_v7 }
 0x634   : > { %v11202_v9 = vand.u32 2147483647, %v10525_v4  ;;  %v6852_v6 = vadd.s32 4294967169, %v6254_v0  ;;  %v10589_v32 = vshrl.u32 %v5791_v20, 30  ;;  %vm5970_vm8 = vcmp.lt.s32.totalorder %v10554_v27, 1 }
 0x635   : > { %vm5972_vm7 = vcmp.lt.s32.totalorder %v10554_v27, 3  ;;  %v5983_v13 = vsel %vm5973_vm9, %v5969_v35, 1326507024  ;;  %v6100_v43 = vadd.s32 1, %v10548_v54  ;;  %v5978_v60 = vsel %vm5970_vm8, %v10574_v63, %v10576_v47 }
 0x636   : > { %11277 = vst [vmem:[#allocation10_spill] sm:$0xff] %v10589_v32  ;;  %v5980_v40 = vsel %vm5972_vm7, %v5963_v30, %v5979_v58  ;;  %v6260_v17 = vadd.s32 1, %v6852_v6  ;;  %v5902_v57 = vclz %v6837_v24  ;;  %v6081_v26 = vsel %vm6075_vm4, %v6078_v48, %v6080_v29 }
 0x637   : > { %vm6099_vm5 = vc.u32 %v10564_v12, %v10547_v61  ;;  %vm5971_vm6 = vcmp.lt.s32.totalorder %v10554_v27, 2  ;;  %v5982_v51 = vsel %vm5970_vm8, %v10576_v47, %v5963_v30  ;;  %v5984_v15 = vsel %vm5972_vm7, %v5966_v52, %v5983_v13 }
 0x638   : > { %vm6261_vm0 = vcmp.gt.s32.totalorder %v6260_v17, 0  ;;  %v5793_v19 = vshll.u32 %v10589_v32, 30  ;;  %v5981_v41 = vsel %vm5971_vm6, %v5978_v60, %v5980_v40  ;;  %v6101_v28 = vsel %vm6099_vm5, %v6100_v43, %v10548_v54 }
 0x639   : > { %v10616_v44 = vshll.u32 %v5946_v56, 8  ;;  %v6257_v33 = vand.u32 8388607, %v11202_v9  ;;  %v6262_v25 = vsel %vm6261_vm0, %v6260_v17, 0  ;;  %v6097_v10 = vmul.u32 %v10536_v46, %v6081_v26 }
 0x63a   : > { %v5985_v0 = vsel %vm5971_vm6, %v5982_v51, %v5984_v15  ;;  %v6264_v52 = vand.u32 31, %v6262_v25  ;;  %v10623_v20 = vadd.s32 4294967294, %v5902_v57  ;;  %v10630_v54 = vsub.s32 %v5790_v42, %v5793_v19  ;;  %v5711_v57 = vpop.f32.mrf.mxu1 }
 0x63b   : > { %v10626_v18 = vmul.u32.u64.low %v10616_v44, %v5981_v41  ;;  %v10627_v7 = vmul.u32.u64.high %v10616_v44, %v5981_v41, %v10626_v18  ;;  %v10632_v35 = vadd.s32 %v6101_v28, %v6097_v10  ;;  %v5975_v24 = vsel %vm5973_vm9, %v5963_v30, 2102212464 }
 0x63c   : > { %v6265_v56 = vsub.s32 32, %v6264_v52  ;;  %v10637_v46 = vmul.u32.u64.low %v10616_v44, %v5985_v0  ;;  %v10638_v58 = vmul.u32.u64.high %v10616_v44, %v5985_v0, %v10637_v46  ;;  %v6258_v48 = vor.u32 8388608, %v6257_v33 }
 0x63d   : > { %v6263_v29 = vshrl.u32 %v6262_v25, 5  ;;  %v6267_v6 = vshll.u32 %v11241_v31, %v6264_v52  ;;  %v6270_v43 = vshll.u32 %v11272_v11, %v6264_v52  ;;  %v6273_v42 = vshll.u32 %v11273_v16, %v6264_v52 }
 0x63e   : > { %v6268_v13 = vshrl.u32 %v11272_v11, %v6265_v56  ;;  %v6271_v60 = vshrl.u32 %v11273_v16, %v6265_v56  ;;  %v6274_v40 = vshrl.u32 %v11274_v22, %v6265_v56  ;;  %v6276_v30 = vshll.u32 %v11274_v22, %v6264_v52 }
 0x63f   : > { %v6277_v17 = vshrl.u32 %v11275_v1, %v6265_v56  ;;  %v5954_v26 = vshrl.u32 %v11241_v31, %v10520_v3  ;;  %v6279_v15 = vshll.u32 %v11275_v1, %v6264_v52  ;;  %v6280_v19 = vshrl.u32 %v11226_v14, %v6265_v56 }
 0x640   : > { %v6269_v51 = vor.u32 %v6268_v13, %v6267_v6  ;;  %vm6839_vm10 = vcmp.lt.s32.totalorder %v10623_v20, 0  ;;  %v6103_v41 = vadd.s32 536870912, %v10632_v35  ;;  %v6272_v28 = vor.u32 %v6271_v60, %v6270_v43 }
 0x641   : > { %v6275_v33 = vor.u32 %v6274_v40, %v6273_v42  ;;  %v6278_v25 = vor.u32 %v6277_v17, %v6276_v30  ;;  %v5974_v10 = vsel %vm5970_vm8, %v5954_v26, %v10574_v63  ;;  %v5976_v3 = vsel %vm5972_vm7, %v10576_v47, %v5975_v24  ;;  %v7462_v40 = vpop.f32.mrf.mxu1 }
 0x642   : > { %v6281_v0 = vor.u32 %v6280_v19, %v6279_v15  ;;  %v10661_v52 = vadd.f32 %v5711_v57, %v10343_v49  ;;  %v5996_v46 = vadd.s32 1, %v10627_v7  ;;  %vm6282_vm11 = vcmp.lt.s32.totalorder %v6263_v29, 1 }
 0x643   : > { %vm6285_vm13 = vcmp.lt.s32.totalorder %v6263_v29, 4  ;;  %v6298_v6 = vshll.u32 %v6258_v48, 8  ;;  %v6266_v13 = vshrl.u32 %v11241_v31, %v6265_v56  ;;  %vm6284_vm1 = vcmp.lt.s32.totalorder %v6263_v29, 3 }
 0x644   : > { %v6290_v43 = vsel %vm6282_vm11, %v6269_v51, %v6272_v28  ;;  %v6291_v42 = vsel %vm6285_vm13, %v6278_v25, 920167782  ;;  %vm6283_vm14 = vcmp.lt.s32.totalorder %v6263_v29, 2  ;;  %v6287_v63 = vsel %vm6285_vm13, %v6275_v33, 2102212464 }
 0x645   : > { %v6292_v60 = vsel %vm6284_vm1, %v6275_v33, %v6291_v42  ;;  %v6294_v47 = vsel %vm6282_vm11, %v6272_v28, %v6275_v33  ;;  %vm5995_vm15 = vc.u32 %v10638_v58, %v10626_v18  ;;  %v6295_v24 = vsel %vm6285_vm13, %v6281_v0, 1326507024 }
 0x646   : > { %v6293_v49 = vsel %vm6283_vm14, %v6290_v43, %v6292_v60  ;;  %v6149_v48 = vand.u32 2139095040, %v10661_v52  ;;  %v10672_v56 = vshrl.u32 %v6103_v41, 30  ;;  %v5977_v30 = vsel %vm5971_vm6, %v5974_v10, %v5976_v3 }
 0x647   : > { %v6286_v17 = vsel %vm6282_vm11, %v6266_v13, %v6269_v51  ;;  %v6296_v57 = vsel %vm6284_vm1, %v6278_v25, %v6295_v24  ;;  %v6288_v26 = vsel %vm6284_vm1, %v6272_v28, %v6287_v63  ;;  %v5997_v0 = vsel %vm5995_vm15, %v5996_v46, %v10627_v7 }
 0x648   : > { %v6297_v15 = vsel %vm6283_vm14, %v6294_v47, %v6296_v57  ;;  %v10680_v19 = vmul.u32.u64.low %v6298_v6, %v6293_v49  ;;  %v10681_v33 = vmul.u32.u64.high %v6298_v6, %v6293_v49, %v10680_v19  ;;  %v10689_v27 = vadd.f32 %v7462_v40, %v10337_v36 }
 0x649   : > { %v10685_v43 = vmul.u32.u64.low %v6298_v6, %v6297_v15  ;;  %v10686_v41 = vmul.u32.u64.high %v6298_v6, %v6297_v15, %v10685_v43  ;;  %v5993_v51 = vmul.u32 %v10616_v44, %v5977_v30  ;;  %v6150_v10 = vshrl.u32 %v6149_v48, 23 }
 0x64a   : > { %v5796_v25 = vsub.s32 0, %v10630_v54  ;;  %v6105_v28 = vshll.u32 %v10672_v56, 30  ;;  %v6289_v3 = vsel %vm6283_vm14, %v6286_v17, %v6288_v26  ;;  %v10698_v13 = vsel %vm6839_vm10, 0, %v10623_v20 }
 0x64b   : > { %v10700_v7 = vadd.s32 %v5997_v0, %v5993_v51  ;;  %v6308_v46 = vadd.s32 1, %v10681_v33  ;;  %v6848_v36 = vadd.s32 4294967169, %v6150_v10  ;;  %v6461_v42 = vand.u32 2139095040, %v10689_v27 }
 0x64c   : > { %v6305_v44 = vmul.u32 %v6298_v6, %v6289_v3  ;;  %vm6307_vm3 = vc.u32 %v10686_v41, %v10680_v19  ;;  %v5910_v29 = vsub.s32 4294967266, %v10698_v13  ;;  %v10708_v60 = vmin.u32 %v5796_v25, %v10630_v54 }
 0x64d   : > { %v6156_v63 = vadd.s32 1, %v6848_v36  ;;  %v10711_v20 = vsub.s32 %v10632_v35, %v6105_v28  ;;  %v6309_v47 = vsel %vm6307_vm3, %v6308_v46, %v10681_v33  ;;  %v5999_v49 = vadd.s32 536870912, %v10700_v7 }
 0x64e   : > { %v6310_v24 = vadd.s32 %v6309_v47, %v6305_v44  ;;  %v11199_v48 = vand.u32 2147483647, %v10661_v52  ;;  %v6462_v40 = vshrl.u32 %v6461_v42, 23  ;;  %v10718_v30 = vadd.s32 %v10391_v53, %v10398_v21  ;;  %v5721_v44 = vpop.f32.mrf.mxu1 }
 0x64f   : > { %vm6157_vm2 = vcmp.gt.s32.totalorder %v6156_v63, 0  ;;  %v10721_v35 = vadd.s32 127, %v5910_v29  ;;  %v6108_v33 = vsub.s32 0, %v10711_v20  ;;  %v10725_v0 = vshrl.u32 %v5999_v49, 30 }
 0x650   : > { %v6158_v6 = vsel %vm6157_vm2, %v6156_v63, 0  ;;  %v6311_v17 = vadd.s32 536870912, %v6310_v24  ;;  %v6153_v51 = vand.u32 8388607, %v11199_v48  ;;  %v6860_v28 = vadd.s32 4294967169, %v6462_v40 }
 0x651   : > { %v6160_v57 = vand.u32 31, %v6158_v6  ;;  %11278 = vst [vmem:[#allocation7_spill] sm:$0xff] %v10725_v0  ;;  %v6159_v53 = vshrl.u32 %v6158_v6, 5  ;;  %v6845_v6 = vmin.u32 %v6108_v33, %v10711_v20  ;;  %v10744_v2 = vadd.f32 %v5721_v44, %v10339_v59 }
 0x652   : > { %v10727_v43 = vshrl.u32 %v6311_v17, 30  ;;  %v6154_v37 = vor.u32 8388608, %v6153_v51  ;;  %v6001_v9 = vshll.u32 %v10725_v0, 30  ;;  %v11207_v33 = vand.u32 2147483647, %v10689_v27 }
 0x653   : > { %v6161_v10 = vsub.s32 32, %v6160_v57  ;;  %v6163_v21 = vshll.u32 %v11241_v31, %v6160_v57  ;;  %v6166_v25 = vshll.u32 %v11272_v11, %v6160_v57  ;;  %v6169_v42 = vshll.u32 %v11273_v16, %v6160_v57 }
 0x654   : > { %v6313_v3 = vshll.u32 %v10727_v43, 30  ;;  %v6172_v29 = vshll.u32 %v11274_v22, %v6160_v57  ;;  %v6175_v8 = vshll.u32 %v11275_v1, %v6160_v57  ;;  %vm6178_vm4 = vcmp.lt.s32.totalorder %v6159_v53, 1 }
 0x655   : > { %v6164_v46 = vshrl.u32 %v11272_v11, %v6161_v10  ;;  %v6167_v36 = vshrl.u32 %v11273_v16, %v6161_v10  ;;  %v6170_v63 = vshrl.u32 %v11274_v22, %v6161_v10  ;;  %v6173_v47 = vshrl.u32 %v11275_v1, %v6161_v10 }
 0x656   : > { %v6176_v49 = vshrl.u32 %v11226_v14, %v6161_v10  ;;  %v10747_v15 = vsub.s32 %v6310_v24, %v6313_v3  ;;  %vm6181_vm9 = vcmp.lt.s32.totalorder %v6159_v53, 4  ;;  %vm6180_vm8 = vcmp.lt.s32.totalorder %v6159_v53, 3 }
 0x657   : > { %v6165_v40 = vor.u32 %v6164_v46, %v6163_v21  ;;  %v6168_v17 = vor.u32 %v6167_v36, %v6166_v25  ;;  %v6171_v48 = vor.u32 %v6170_v63, %v6169_v42  ;;  %v6174_v62 = vor.u32 %v6173_v47, %v6172_v29 }
 0x658   : > { %v6177_v26 = vor.u32 %v6176_v49, %v6175_v8  ;;  %v6468_v21 = vadd.s32 1, %v6860_v28  ;;  %v6162_v25 = vshrl.u32 %v11241_v31, %v6161_v10  ;;  %vm6179_vm7 = vcmp.lt.s32.totalorder %v6159_v53, 2 }
 0x659   : > { %v6186_v32 = vsel %vm6178_vm4, %v6165_v40, %v6168_v17  ;;  %v6183_v57 = vsel %vm6181_vm9, %v6171_v48, 2102212464  ;;  %v6187_v51 = vsel %vm6181_vm9, %v6174_v62, 920167782  ;;  %v6190_v59 = vsel %vm6178_vm4, %v6168_v17, %v6171_v48 }
 0x65a   : > { %v6188_v46 = vsel %vm6180_vm8, %v6171_v48, %v6187_v51  ;;  %v6194_v36 = vshll.u32 %v6154_v37, 8  ;;  %v6316_v42 = vsub.s32 0, %v10747_v15  ;;  %v6182_v24 = vsel %vm6178_vm4, %v6162_v25, %v6165_v40 }
 0x65b   : > { %v6189_v8 = vsel %vm6179_vm7, %v6186_v32, %v6188_v46  ;;  %v6191_v3 = vsel %vm6181_vm9, %v6177_v26, 1326507024  ;;  %v6184_v44 = vsel %vm6180_vm8, %v6168_v17, %v6183_v57  ;;  %v6110_v10 = vclz %v6845_v6 }
 0x65c   : > { %v6192_v63 = vsel %vm6180_vm8, %v6174_v62, %v6191_v3  ;;  %v10753_v29 = vmul.u32.u64.low %v6194_v36, %v6189_v8  ;;  %v10754_v47 = vmul.u32.u64.high %v6194_v36, %v6189_v8, %v10753_v29  ;;  %v10758_v28 = vsub.s32 %v10700_v7, %v6001_v9 }
 0x65d   : > { %v6193_v49 = vsel %vm6179_vm7, %v6190_v59, %v6192_v63  ;;  %vm6469_vm5 = vcmp.gt.s32.totalorder %v6468_v21, 0  ;;  %v6465_v32 = vand.u32 8388607, %v11207_v33  ;;  %v6853_v62 = vmin.u32 %v6316_v42, %v10747_v15 }
 0x65e   : > { %v10761_v37 = vmul.u32.u64.low %v6194_v36, %v6193_v49  ;;  %v10762_v48 = vmul.u32.u64.high %v6194_v36, %v6193_v49, %v10761_v37  ;;  %v6470_v26 = vsel %vm6469_vm5, %v6468_v21, 0  ;;  %v6185_v40 = vsel %vm6179_vm7, %v6182_v24, %v6184_v44 }
 0x65f   : > { %v6472_v17 = vand.u32 31, %v6470_v26  ;;  %v6357_v6 = vand.u32 2139095040, %v10744_v2  ;;  %v5907_v9 = vshll.u32 %v10522_v50, %v10698_v13  ;;  %v10773_v7 = vadd.s32 %v10459_v5, %v10466_v23 }
 0x660   : > { %v6204_v25 = vadd.s32 1, %v10754_v47  ;;  %v11279_v57 = vsub.s32 32, %v10698_v13  ;;  %v11280_v53 = vclz %v10708_v60  ;;  %v11205_v42 = vmov 0.0  }
 0x661   : > { %v6473_v59 = vsub.s32 32, %v6472_v17  ;;  %7463 = vmatprep.subr.mxu0 %v11205_v42  ;;  %v6846_v50 = vadd.s32 4294967294, %v6110_v10  ;;  %v6004_v5 = vsub.s32 0, %v10758_v28  ;;  %v6201_v23 = vmul.u32 %v6194_v36, %v6185_v40 }
 0x662   : > { %v5908_v21 = vshrl.u32 %v10718_v30, %v11279_v57  ;;  %v10782_v46 = vadd.s32 4294967294, %v11280_v53  ;;  %vm6203_vm6 = vc.u32 %v10762_v48, %v10753_v29  ;;  %v6318_v13 = vclz %v6853_v62 }
 0x663   : > { %v6205_v30 = vsel %vm6203_vm6, %v6204_v25, %v10754_v47  ;;  %v6466_v24 = vor.u32 8388608, %v6465_v32  ;;  %v6358_v8 = vshrl.u32 %v6357_v6, 23  ;;  %v6471_v60 = vshrl.u32 %v6470_v26, 5 }
 0x664   : > { %v6206_v3 = vadd.s32 %v6205_v30, %v6201_v23  ;;  %v6476_v44 = vshrl.u32 %v11272_v11, %v6473_v59  ;;  %v6479_v63 = vshrl.u32 %v11273_v16, %v6473_v59  ;;  %v6475_v49 = vshll.u32 %v11241_v31, %v6472_v17 }
 0x665   : > { %v6478_v10 = vshll.u32 %v11272_v11, %v6472_v17  ;;  %v6481_v36 = vshll.u32 %v11273_v16, %v6472_v17  ;;  %v6482_v37 = vshrl.u32 %v11274_v22, %v6473_v59  ;;  %vm6847_vm0 = vcmp.lt.s32.totalorder %v6846_v50, 0 }
 0x666   : > { %v6207_v62 = vadd.s32 536870912, %v6206_v3  ;;  %v6484_v47 = vshll.u32 %v11274_v22, %v6472_v17  ;;  %v6485_v32 = vshrl.u32 %v11275_v1, %v6473_v59  ;;  %v6841_v26 = vmin.u32 %v6004_v5, %v10758_v28 }
 0x667   : > { %v6477_v40 = vor.u32 %v6476_v44, %v6475_v49  ;;  %v6480_v6 = vor.u32 %v6479_v63, %v6478_v10  ;;  %v6483_v25 = vor.u32 %v6482_v37, %v6481_v36  ;;  %v6487_v23 = vshll.u32 %v11275_v1, %v6472_v17 }
 0x668   : > { %v10798_v57 = vshrl.u32 %v6207_v62, 30  ;;  %v6486_v53 = vor.u32 %v6485_v32, %v6484_v47  ;;  %v6488_v30 = vshrl.u32 %v11226_v14, %v6473_v59  ;;  %v6854_v42 = vadd.s32 4294967294, %v6318_v13 }
 0x669   : > { %vm6493_vm10 = vcmp.lt.s32.totalorder %v6471_v60, 4  ;;  %v6506_v33 = vshll.u32 %v6466_v24, 8  ;;  %v6856_v51 = vadd.s32 4294967169, %v6358_v8  ;;  %vm6490_vm11 = vcmp.lt.s32.totalorder %v6471_v60, 1 }
 0x66a   : > { %v6209_v34 = vshll.u32 %v10798_v57, 30  ;;  %v6489_v0 = vor.u32 %v6488_v30, %v6487_v23  ;;  %v6495_v5 = vsel %vm6493_vm10, %v6483_v25, 2102212464  ;;  %v6474_v44 = vshrl.u32 %v11241_v31, %v6473_v59 }
 0x66b   : > { %vm6492_vm13 = vcmp.lt.s32.totalorder %v6471_v60, 3  ;;  %v6498_v63 = vsel %vm6490_vm11, %v6477_v40, %v6480_v6  ;;  %v6499_v49 = vsel %vm6493_vm10, %v6486_v53, 920167782  ;;  %vm6491_vm1 = vcmp.lt.s32.totalorder %v6471_v60, 2 }
 0x66c   : > { %v10806_v10 = vsub.s32 %v6206_v3, %v6209_v34  ;;  %v6500_v17 = vsel %vm6492_vm13, %v6483_v25, %v6499_v49  ;;  %v6502_v13 = vsel %vm6490_vm11, %v6480_v6, %v6483_v25  ;;  %v6494_v36 = vsel %vm6490_vm11, %v6474_v44, %v6477_v40 }
 0x66d   : > { %v6496_v24 = vsel %vm6492_vm13, %v6480_v6, %v6495_v5  ;;  %v6501_v8 = vsel %vm6491_vm1, %v6498_v63, %v6500_v17  ;;  %v6503_v37 = vsel %vm6493_vm10, %v6489_v0, 1326507024  ;;  %v10815_v23 = vor.u32 %v5908_v21, %v5907_v9 }
 0x66e   : > { %v6212_v62 = vsub.s32 0, %v10806_v10  ;;  %v6504_v47 = vsel %vm6492_vm13, %v6486_v53, %v6503_v37  ;;  %v10811_v32 = vmul.u32.u64.low %v6506_v33, %v6501_v8  ;;  %v10812_v59 = vmul.u32.u64.high %v6506_v33, %v6501_v8, %v10811_v32 }
 0x66f   : > { %v10818_v34 = vsel %vm6847_vm0, 0, %v6846_v50  ;;  %v6505_v3 = vsel %vm6491_vm1, %v6502_v13, %v6504_v47  ;;  %v6364_v40 = vadd.s32 1, %v6856_v51  ;;  %vm6835_vm14 = vcmp.lt.s32.totalorder %v10782_v46, 0 }
 0x670   : > { %v6849_v6 = vmin.u32 %v6212_v62, %v10806_v10  ;;  %v10823_v0 = vmul.u32.u64.low %v6506_v33, %v6505_v3  ;;  %v10824_v25 = vmul.u32.u64.high %v6506_v33, %v6505_v3, %v10823_v0  ;;  %v11281_v53 = vshll.u32 %v10721_v35, 23 }
 0x671   : > { %vm6855_vm15 = vcmp.lt.s32.totalorder %v6854_v42, 0  ;;  %v6497_v9 = vsel %vm6491_vm1, %v6494_v36, %v6496_v24  ;;  %vm6365_vm3 = vcmp.gt.s32.totalorder %v6364_v40, 0  ;;  %v6118_v21 = vsub.s32 4294967266, %v10818_v34 }
 0x672   : > { %v10828_v30 = vor.u32 4788187, %v11281_v53  ;;  %v6006_v50 = vclz %v6841_v26  ;;  %v6516_v51 = vadd.s32 1, %v10812_v59  ;;  %v6366_v5 = vsel %vm6365_vm3, %v6364_v40, 0 }
 0x673   : > { %v10835_v63 = vsel %vm6835_vm14, 0, %v10782_v46  ;;  %v11212_v49 = vand.u32 2147483647, %v10744_v2  ;;  %v6368_v35 = vand.u32 31, %v6366_v5  ;;  %v10838_v17 = vsel %vm6855_vm15, 0, %v6854_v42 }
 0x674   : > { %v6214_v13 = vclz %v6849_v6  ;;  %v6513_v60 = vmul.u32 %v6506_v33, %v6497_v9  ;;  %vm6515_vm2 = vc.u32 %v10824_v25, %v10811_v32  ;;  %v5914_v26 = vand.u32 2147483647, %v10828_v30 }
 0x675   : > { %v10845_v36 = vadd.s32 %v10547_v61, %v10564_v12  ;;  %v6517_v24 = vsel %vm6515_vm2, %v6516_v51, %v10812_v59  ;;  %v6369_v46 = vsub.s32 32, %v6368_v35  ;;  %v10849_v37 = vadd.s32 127, %v6118_v21 }
 0x676   : > { %v6842_v42 = vadd.s32 4294967294, %v6006_v50  ;;  %v6518_v62 = vadd.s32 %v6517_v24, %v6513_v60  ;;  %v6326_v33 = vsub.s32 4294967266, %v10838_v17  ;;  %v6361_v47 = vand.u32 8388607, %v11212_v49 }
 0x677   : > { %v6372_v3 = vshrl.u32 %v11272_v11, %v6369_v46  ;;  %v6375_v40 = vshrl.u32 %v11273_v16, %v6369_v46  ;;  %v6850_v61 = vadd.s32 4294967294, %v6214_v13  ;;  %v6371_v59 = vshll.u32 %v11241_v31, %v6368_v35 }
 0x678   : > { %v6519_v12 = vadd.s32 536870912, %v6518_v62  ;;  %v6374_v6 = vshll.u32 %v11272_v11, %v6368_v35  ;;  %v6377_v0 = vshll.u32 %v11273_v16, %v6368_v35  ;;  %v6378_v53 = vshrl.u32 %v11274_v22, %v6369_v46 }
 0x679   : > { %v6380_v30 = vshll.u32 %v11274_v22, %v6368_v35  ;;  %v6381_v9 = vshrl.u32 %v11275_v1, %v6369_v46  ;;  %v6367_v50 = vshrl.u32 %v6366_v5, 5  ;;  %v6373_v51 = vor.u32 %v6372_v3, %v6371_v59 }
 0x67a   : > { %v10862_v21 = vshrl.u32 %v6519_v12, 30  ;;  %v6376_v60 = vor.u32 %v6375_v40, %v6374_v6  ;;  %v6379_v24 = vor.u32 %v6378_v53, %v6377_v0  ;;  %v6383_v49 = vshll.u32 %v11275_v1, %v6368_v35 }
 0x67b   : > { %v6382_v13 = vor.u32 %v6381_v9, %v6380_v30  ;;  %v6384_v8 = vshrl.u32 %v11226_v14, %v6369_v46  ;;  %vm6843_vm4 = vcmp.lt.s32.totalorder %v6842_v42, 0  ;;  %v6306_v11 = vadd.s32 %v10680_v19, %v10686_v41 }
 0x67c   : > { %v6521_v16 = vshll.u32 %v10862_v21, 30  ;;  %v6362_v22 = vor.u32 8388608, %v6361_v47  ;;  %v6322_v44 = vsub.s32 32, %v10838_v17  ;;  %v6327_v12 = vadd.s32 127, %v6326_v33 }
 0x67d   : > { %vm6851_vm9 = vcmp.lt.s32.totalorder %v6850_v61, 0  ;;  %v6385_v5 = vor.u32 %v6384_v8, %v6383_v49  ;;  %v6370_v40 = vshrl.u32 %v11241_v31, %v6369_v46  ;;  %vm6386_vm8 = vcmp.lt.s32.totalorder %v6367_v50, 1 }
 0x67e   : > { %v10870_v3 = vsub.s32 %v6518_v62, %v6521_v16  ;;  %vm6389_vm7 = vcmp.lt.s32.totalorder %v6367_v50, 4  ;;  %vm6388_vm5 = vcmp.lt.s32.totalorder %v6367_v50, 3  ;;  %v6394_v1 = vsel %vm6386_vm8, %v6373_v51, %v6376_v60 }
 0x67f   : > { %v6391_v14 = vsel %vm6389_vm7, %v6379_v24, 2102212464  ;;  %v6395_v35 = vsel %vm6389_vm7, %v6382_v13, 920167782  ;;  %vm6387_vm6 = vcmp.lt.s32.totalorder %v6367_v50, 2  ;;  %v6398_v47 = vsel %vm6386_vm8, %v6376_v60, %v6379_v24 }
 0x680   : > { %v6524_v19 = vsub.s32 0, %v10870_v3  ;;  %v6396_v41 = vsel %vm6388_vm5, %v6379_v24, %v6395_v35  ;;  %v10874_v59 = vsel %vm6851_vm9, 0, %v6850_v61  ;;  %v6399_v49 = vsel %vm6389_vm7, %v6385_v5, 1326507024 }
 0x681   : > { %v6397_v33 = vsel %vm6387_vm6, %v6394_v1, %v6396_v41  ;;  %v6402_v8 = vshll.u32 %v6362_v22, 8  ;;  %v6390_v31 = vsel %vm6386_vm8, %v6370_v40, %v6373_v51  ;;  %v6392_v46 = vsel %vm6388_vm5, %v6376_v60, %v6391_v14 }
 0x682   : > { %v6861_v62 = vmin.u32 %v6524_v19, %v10870_v3  ;;  %v6400_v6 = vsel %vm6388_vm5, %v6382_v13, %v6399_v49  ;;  %v6328_v0 = vshll.u32 %v6327_v12, 23  ;;  %v11282_v24 = vcvt.s32.f32 %v10815_v23 }
 0x683   : > { %v6401_v53 = vsel %vm6387_vm6, %v6398_v47, %v6400_v6  ;;  %v10879_v30 = vmul.u32.u64.low %v6402_v8, %v6397_v33  ;;  %v10880_v9 = vmul.u32.u64.high %v6402_v8, %v6397_v33, %v10879_v30  ;;  %v10891_v22 = vsel %vm6843_vm4, 0, %v6842_v42 }
 0x684   : > { %v10885_v61 = vmul.f32 %v11282_v24, %v5914_v26  ;;  %v6526_v16 = vclz %v6861_v62  ;;  %v10887_v1 = vmul.u32.u64.low %v6402_v8, %v6401_v53  ;;  %v10888_v5 = vmul.u32.u64.high %v6402_v8, %v6401_v53, %v10887_v1 }
 0x685   : > { %v6324_v51 = vshrl.u32 %v6306_v11, %v6322_v44  ;;  %v6222_v60 = vsub.s32 4294967266, %v10874_v59  ;;  %v6393_v13 = vsel %vm6387_vm6, %v6390_v31, %v6392_v46  ;;  %v5802_v12 = vsub.s32 32, %v10835_v63 }
 0x686   : > { %v11283_v40 = vsub.s32 4294967266, %v10835_v63  ;;  %v6114_v23 = vsub.s32 32, %v10818_v34  ;;  %v6862_v26 = vadd.s32 4294967294, %v6526_v16  ;;  %v6120_v35 = vshll.u32 %v10849_v37, 23 }
 0x687   : > { %v6323_v19 = vshll.u32 %v10747_v15, %v10838_v17  ;;  %v6329_v42 = vor.u32 4788187, %v6328_v0  ;;  %v6412_v44 = vadd.s32 1, %v10880_v9  ;;  %v6014_v11 = vsub.s32 4294967266, %v10891_v22 }
 0x688   : > { %v5807_v14 = vadd.s32 127, %v11283_v40  ;;  %vm6863_vm0 = vcmp.lt.s32.totalorder %v6862_v26, 0  ;;  %v6409_v50 = vmul.u32 %v6402_v8, %v6393_v13  ;;  %vm6411_vm10 = vc.u32 %v10888_v5, %v10879_v30 }
 0x689   : > { %v6325_v41 = vor.u32 %v6324_v51, %v6323_v19  ;;  %v6223_v47 = vadd.s32 127, %v6222_v60  ;;  %v6529_v33 = vsel %vm6863_vm0, 0, %v6862_v26  ;;  %v6413_v49 = vsel %vm6411_vm10, %v6412_v44, %v10880_v9 }
 0x68a   : > { %v6514_v37 = vadd.s32 %v10811_v32, %v10824_v25  ;;  %v6530_v62 = vsub.s32 32, %v6529_v33  ;;  %v6534_v15 = vsub.s32 4294967266, %v6529_v33  ;;  %v6414_v17 = vadd.s32 %v6413_v49, %v6409_v50 }
 0x68b   : > { %v6115_v31 = vshll.u32 %v10711_v20, %v10818_v34  ;;  %v6116_v46 = vshrl.u32 %v10845_v36, %v6114_v23  ;;  %v6330_v8 = vand.u32 2147483647, %v6329_v42  ;;  %v6218_v6 = vsub.s32 32, %v10874_v59 }
 0x68c   : > { %v6531_v0 = vshll.u32 %v10870_v3, %v6529_v33  ;;  %v6532_v53 = vshrl.u32 %v6514_v37, %v6530_v62  ;;  %v6535_v24 = vadd.s32 127, %v6534_v15  ;;  %v6415_v16 = vadd.s32 536870912, %v6414_v17 }
 0x68d   : > { %v6015_v9 = vadd.s32 127, %v6014_v11  ;;  %v6332_v1 = vcvt.s32.f32 %v6325_v41  ;;  %v6202_v32 = vadd.s32 %v10753_v29, %v10762_v48  ;;  %v6224_v25 = vshll.u32 %v6223_v47, 23 }
 0x68e   : > { %v6121_v51 = vor.u32 4788187, %v6120_v35  ;;  %vm6252_vm11 = vcmp.lt.s32.totalorder %v10525_v4, 0  ;;  %v6533_v20 = vor.u32 %v6532_v53, %v6531_v0  ;;  %v6536_v34 = vshll.u32 %v6535_v24, 23 }
 0x68f   : > { %v10917_v36 = vshrl.u32 %v6415_v16, 30  ;;  %v5804_v60 = vshrl.u32 %v10773_v7, %v5802_v12  ;;  %v6010_v3 = vsub.s32 32, %v10891_v22  ;;  %v6333_v13 = vmul.f32 %v6332_v1, %v6330_v8 }
 0x690   : > { %v6220_v40 = vshrl.u32 %v6202_v32, %v6218_v6  ;;  %v5808_v23 = vshll.u32 %v5807_v14, 23  ;;  %v6117_v26 = vor.u32 %v6116_v46, %v6115_v31  ;;  %v6537_v19 = vor.u32 4788187, %v6536_v34 }
 0x691   : > { %v6417_v42 = vshll.u32 %v10917_v36, 30  ;;  %v5994_v29 = vadd.s32 %v10626_v18, %v10638_v58  ;;  %v6016_v48 = vshll.u32 %v6015_v9, 23  ;;  %v6219_v35 = vshll.u32 %v10806_v10, %v10874_v59 }
 0x692   : > { %v6225_v44 = vor.u32 4788187, %v6224_v25  ;;  %v6122_v11 = vand.u32 2147483647, %v6121_v51  ;;  %v6538_v50 = vand.u32 2147483647, %v6537_v19  ;;  %v6540_v7 = vcvt.s32.f32 %v6533_v20 }
 0x693   : > { %v10926_v12 = vsub.s32 %v6414_v17, %v6417_v42  ;;  %v5803_v14 = vshll.u32 %v10630_v54, %v10835_v63  ;;  %v6012_v41 = vshrl.u32 %v5994_v29, %v6010_v3  ;;  %v6334_v47 = vxor.u32 2147483648, %v6333_v13 }
 0x694   : > { %v6221_v33 = vor.u32 %v6220_v40, %v6219_v35  ;;  %v5809_v49 = vor.u32 4788187, %v5808_v23  ;;  %v6124_v37 = vcvt.s32.f32 %v6117_v26  ;;  %v6541_v62 = vmul.f32 %v6540_v7, %v6538_v50 }
 0x695   : > { %v6420_v18 = vsub.s32 0, %v10926_v12  ;;  %v5805_v58 = vor.u32 %v5804_v60, %v5803_v14  ;;  %v6011_v10 = vshll.u32 %v10758_v28, %v10891_v22  ;;  %v6017_v59 = vor.u32 4788187, %v6016_v48 }
 0x696   : > { %v6226_v15 = vand.u32 2147483647, %v6225_v44  ;;  %v6125_v31 = vmul.f32 %v6124_v37, %v6122_v11  ;;  %vm6460_vm13 = vcmp.lt.s32.totalorder %v10689_v27, 0  ;;  %v6542_v17 = vxor.u32 2147483648, %v6541_v62 }
 0x697   : > { %v6857_v54 = vmin.u32 %v6420_v18, %v10926_v12  ;;  %v6013_v63 = vor.u32 %v6012_v41, %v6011_v10  ;;  %v6335_v46 = vsel %vm6252_vm11, %v6334_v47, %v6333_v13  ;;  %v6228_v8 = vcvt.s32.f32 %v6221_v33 }
 0x698   : > { %v6544_v6 = vsub.s32 4, %v10862_v21  ;;  %vm5836_vm1 = vcmp.lt.s32.totalorder %v10347_v45, 0  ;;  %v5810_v0 = vand.u32 2147483647, %v5809_v49  ;;  %v11284_v28 = vand.u32 2147483647, %v10689_v27 }
 0x699   : > { %v6543_v53 = vsel %vm6460_vm13, %v6542_v17, %v6541_v62  ;;  %v6422_v24 = vclz %v6857_v54  ;;  %v6018_v16 = vand.u32 2147483647, %v6017_v59  ;;  %v11287_v9 = vand.u32 2147483647, %v10525_v4 }
 0x69a   : > { %vm10941_vm14 = vcmp.le.f32.partialorder %v11284_v28, 0.7853982  ;;  %v6229_v32 = vmul.f32 %v6228_v8, %v6226_v15  ;;  %v5812_v51 = vcvt.s32.f32 %v5805_v58  ;;  %v6126_v60 = vxor.u32 2147483648, %v6125_v31 }
 0x69b   : > { %vm10949_vm15 = vcmp.le.f32.partialorder %v11287_v9, 0.7853982  ;;  %v6546_v25 = vsel %vm10941_vm14, %v10689_v27, %v6543_v53  ;;  %v6858_v34 = vadd.s32 4294967294, %v6422_v24  ;;  %v6020_v3 = vcvt.s32.f32 %v6013_v63 }
 0x69c   : > { %v6338_v20 = vsel %vm10949_vm15, %v10525_v4, %v6335_v46  ;;  %7709 = vcosq.f32 %v6546_v25  ;;  %v6545_v13 = vsel %vm6460_vm13, %v6544_v6, %v10862_v21  ;;  %v5918_v40 = vxor.u32 2147483648, %v10885_v61 }
 0x69d   : > { %7711 = vsinq.f32 %v6546_v25  ;;  %v5813_v23 = vmul.f32 %v5812_v51, %v5810_v0  ;;  %vm6044_vm3 = vcmp.lt.s32.totalorder %v10354_v39, 0  ;;  %vm6859_vm2 = vcmp.lt.s32.totalorder %v6858_v34, 0 }
 0x69e   : > { %v6021_v26 = vmul.f32 %v6020_v3, %v6018_v16  ;;  %7713 = vcosq.f32 %v6338_v20  ;;  %v6230_v19 = vxor.u32 2147483648, %v6229_v32  ;;  %v6425_v42 = vsel %vm6859_vm2, 0, %v6858_v34 }
 0x69f   : > { %v6410_v29 = vadd.s32 %v10879_v30, %v10888_v5  ;;  %v6426_v48 = vsub.s32 32, %v6425_v42  ;;  %v6430_v35 = vsub.s32 4294967266, %v6425_v42  ;;  %v6547_v44 = vsel %vm10941_vm14, 0, %v6545_v13 }
 0x6a0   : > { %v11290_v21 = vand.u32 2147483647, %v10354_v39  ;;  %v6127_v50 = vsel %vm6044_vm3, %v6126_v60, %v6125_v31  ;;  %7715 = vsinq.f32 %v6338_v20  ;;  %vm6148_vm9 = vcmp.lt.s32.totalorder %v10661_v52, 0 }
 0x6a1   : > { %v6427_v7 = vshll.u32 %v10926_v12, %v6425_v42  ;;  %v6428_v30 = vshrl.u32 %v6410_v29, %v6426_v48  ;;  %v6431_v5 = vadd.s32 127, %v6430_v35  ;;  %v6336_v14 = vsub.s32 4, %v10727_v43 }
 0x6a2   : > { %vm10970_vm4 = vcmp.le.f32.partialorder %v11290_v21, 0.7853982  ;;  %v5919_v41 = vsel %vm5836_vm1, %v5918_v40, %v10885_v61  ;;  %v5814_v47 = vxor.u32 2147483648, %v5813_v23  ;;  %v6231_v33 = vsel %vm6148_vm9, %v6230_v19, %v6229_v32 }
 0x6a3   : > { %v6551_v49 = vadd.s32 3, %v6547_v44  ;;  %v6130_v37 = vsel %vm10970_vm4, %v10354_v39, %v6127_v50  ;;  %v6022_v62 = vxor.u32 2147483648, %v6021_v26  ;;  %v6429_v18 = vor.u32 %v6428_v30, %v6427_v7 }
 0x6a4   : > { %v6432_v12 = vshll.u32 %v6431_v5, 23  ;;  %v11293_v58 = vand.u32 2147483647, %v10347_v45  ;;  %vm5732_vm7 = vcmp.lt.s32.totalorder %v10350_v38, 0  ;;  %vm5940_vm5 = vcmp.lt.s32.totalorder %v10411_v55, 0 }
 0x6a5   : > { %v11296_v61 = vand.u32 2147483647, %v10661_v52  ;;  %v11299_v15 = vand.u32 2147483647, %v10411_v55  ;;  %v6337_v63 = vsel %vm6252_vm11, %v6336_v14, %v10727_v43  ;;  %v5815_v8 = vsel %vm5732_vm7, %v5814_v47, %v5813_v23  ;;  %v11309_v47 = vld [vmem:[#allocation7_spill] sm:$0xff] }
 0x6a6   : > { %vm10989_vm8 = vcmp.le.f32.partialorder %v11293_v58, 0.7853982  ;;  %v6433_v54 = vor.u32 4788187, %v6432_v12  ;;  %7717 = vcosq.f32 %v6130_v37  ;;  %v6552_v6 = vand.u32 3, %v6551_v49  ;;  %v11310_v12 = vld [vmem:[#allocation9_spill] sm:$0xff] }
 0x6a7   : > { %vm10997_vm6 = vcmp.le.f32.partialorder %v11296_v61, 0.7853982  ;;  %vm11003_vm0 = vcmp.le.f32.partialorder %v11299_v15, 0.7853982  ;;  %v5922_v46 = vsel %vm10989_vm8, %v10347_v45, %v5919_v41  ;;  %7719 = vsinq.f32 %v6130_v37 }
 0x6a8   : > { %v6234_v17 = vsel %vm10997_vm6, %v10661_v52, %v6231_v33  ;;  %v6023_v0 = vsel %vm5940_vm5, %v6022_v62, %v6021_v26  ;;  %v6434_v28 = vand.u32 2147483647, %v6433_v54  ;;  %v6436_v22 = vcvt.s32.f32 %v6429_v18  ;;  %v11311_v54 = vld [vmem:[#allocation10_spill] sm:$0xff] }
 0x6a9   : > { %v7710_v53 = vpop.eup %7709  ;;  %7721 = vcosq.f32 %v6234_v17  ;;  %v6339_v43 = vsel %vm10949_vm15, 0, %v6337_v63  ;;  %v6232_v24 = vsub.s32 4, %v10798_v57  ;;  %vm6356_vm10 = vcmp.lt.s32.totalorder %v10744_v2, 0 }
 0x6aa   : > { %v7712_v16 = vpop.eup %7711  ;;  %7723 = vsinq.f32 %v6234_v17  ;;  %v6437_v9 = vmul.f32 %v6436_v22, %v6434_v28  ;;  %v6558_v32 = vxor.u32 2147483648, %v7710_v53  ;;  %vm7812_vm11 = vmmov 0  }
 0x6ab   : > { %v11302_v25 = vmov 0.0   ;;  %v6026_v51 = vsel %vm11003_vm0, %v10411_v55, %v6023_v0  ;;  %v11303_v20 = vand.u32 2147483647, %v10744_v2  ;;  %v6555_v34 = vxor.u32 2147483648, %v7712_v16  ;;  %v7714_v60 = vpop.eup %7713 }
 0x6ac   : > { %7479 = vmatprep.mubr.msk.f32.mxu0 %vm7812_vm11, %v11302_v25  ;;  %vm6557_vm14 = vcmp.eq.s32.totalorder %v6552_v6, 2  ;;  %v6438_v3 = vxor.u32 2147483648, %v6437_v9  ;;  %vm6554_vm15 = vcmp.eq.s32.totalorder %v6552_v6, 0  ;;  %v6343_v40 = vadd.s32 3, %v6339_v43 }
 0x6ad   : > { %vm11030_vm13 = vcmp.le.f32.partialorder %v11303_v20, 0.7853982  ;;  %v6559_v13 = vsel %vm6557_vm14, %v6558_v32, %v7712_v16  ;;  %vm6553_vm2 = vcmp.lt.s32.totalorder %v6552_v6, 2  ;;  %v6556_v23 = vsel %vm6554_vm15, %v7710_v53, %v6555_v34  ;;  %v7716_v42 = vpop.eup %7715 }
 0x6ae   : > { %v6440_v26 = vsub.s32 4, %v10917_v36  ;;  %v6233_v19 = vsel %vm6148_vm9, %v6232_v24, %v10798_v57  ;;  %7725 = vcosq.f32 %v6026_v51  ;;  %v6439_v29 = vsel %vm6356_vm10, %v6438_v3, %v6437_v9 }
 0x6af   : > { %vm6550_vm11 = vweird.f32 %v10689_v27  ;;  %v6560_v48 = vsel %vm6553_vm2, %v6556_v23, %v6559_v13  ;;  %7727 = vsinq.f32 %v6026_v51  ;;  %v6442_v35 = vsel %vm11030_vm13, %v10744_v2, %v6439_v29 }
 0x6b0   : > { %v6561_v44 = vsel %vm6550_vm11, nan, %v6560_v48  ;;  %v6128_v21 = vsub.s32 4, %v10672_v56  ;;  %v11306_v50 = vand.u32 2147483647, %v10350_v38  ;;  %7729 = vcosq.f32 %v6442_v35 }
 0x6b1   : > { %7464 = vmatpush3.msra.mxu0 %v6561_v44  ;;  %v6344_v7 = vand.u32 3, %v6343_v40  ;;  %v6235_v27 = vsel %vm10997_vm6, 0, %v6233_v19  ;;  %7731 = vsinq.f32 %v6442_v35  ;;  %v6441_v5 = vsel %vm6356_vm10, %v6440_v26, %v10917_v36 }
 0x6b2   : > { %vm11047_vm14 = vcmp.le.f32.partialorder %v11306_v50, 0.7853982  ;;  %7465 = vmatprep.subr.mxu0 %v11302_v25  ;;  %v6347_v14 = vxor.u32 2147483648, %v7716_v42  ;;  %7733 = vcosq.f32 %v5922_v46  ;;  %v6350_v41 = vxor.u32 2147483648, %v7714_v60 }
 0x6b3   : > { %v5818_v30 = vsel %vm11047_vm14, %v10350_v38, %v5815_v8  ;;  %v6024_v33 = vsub.s32 4, %v11309_v47  ;;  %7735 = vsinq.f32 %v5922_v46  ;;  %v6239_v49 = vadd.s32 3, %v6235_v27  ;;  %v11064_v62 = vpop.eup %7717 }
 0x6b4   : > { %v6129_v37 = vsel %vm6044_vm3, %v6128_v21, %v10672_v56  ;;  %7737 = vcosq.f32 %v5818_v30  ;;  %v6443_v18 = vsel %vm11030_vm13, 0, %v6441_v5  ;;  %vm6346_vm9 = vcmp.eq.s32.totalorder %v6344_v7, 0  ;;  %v11069_v58 = vpop.eup %7719 }
 0x6b5   : > { %v5920_v36 = vsub.s32 4, %v11310_v12  ;;  %7739 = vsinq.f32 %v5818_v30  ;;  %v6348_v61 = vsel %vm6346_vm9, %v7714_v60, %v6347_v14  ;;  %vm6349_vm6 = vcmp.eq.s32.totalorder %v6344_v7, 2 }
 0x6b6   : > { %v7722_v59 = vpop.eup %7721  ;;  %v6351_v15 = vsel %vm6349_vm6, %v6350_v41, %v7716_v42  ;;  %v6131_v17 = vsel %vm10970_vm4, 0, %v6129_v37  ;;  %v6025_v56 = vsel %vm5940_vm5, %v6024_v33, %v11309_v47  ;;  %v5816_v63 = vsub.s32 4, %v11311_v54 }
 0x6b7   : > { %v7724_v46 = vpop.eup %7723  ;;  %v6447_v8 = vadd.s32 3, %v6443_v18  ;;  %v6240_v6 = vand.u32 3, %v6239_v49  ;;  %vm6345_vm3 = vcmp.lt.s32.totalorder %v6344_v7, 2  ;;  %v5921_v0 = vsel %vm5836_vm1, %v5920_v36, %v11310_v12 }
 0x6b8   : > { %v6352_v28 = vsel %vm6345_vm3, %v6348_v61, %v6351_v15  ;;  %v6135_v22 = vadd.s32 3, %v6131_v17  ;;  %v6027_v11 = vsel %vm11003_vm0, 0, %v6025_v56  ;;  %vm6446_vm4 = vweird.f32 %v10744_v2 }
 0x6b9   : > { %v6243_v53 = vxor.u32 2147483648, %v7724_v46  ;;  %v6246_v43 = vxor.u32 2147483648, %v7722_v59  ;;  %v5817_v24 = vsel %vm5732_vm7, %v5816_v63, %v11311_v54  ;;  %v6448_v9 = vand.u32 3, %v6447_v8 }
 0x6ba   : > { %vm6342_vm5 = vweird.f32 %v10525_v4  ;;  %vm6241_vm10 = vcmp.lt.s32.totalorder %v6240_v6, 2  ;;  %v5923_v32 = vsel %vm10989_vm8, 0, %v5921_v0  ;;  %vm6242_vm1 = vcmp.eq.s32.totalorder %v6240_v6, 0  ;;  %v11312_v0 = vld [vmem:[#allocation6_spill] sm:$0xff] }
 0x6bb   : > { %v7726_v16 = vpop.eup %7725  ;;  %v6353_v20 = vsel %vm6342_vm5, nan, %v6352_v28  ;;  %vm6245_vm0 = vcmp.eq.s32.totalorder %v6240_v6, 2  ;;  %v6031_v31 = vadd.s32 3, %v6027_v11  ;;  %v6136_v34 = vand.u32 3, %v6135_v22  ;;  %v6567_v28 = vpop.permute.xlu0 %6566 }
 0x6bc   : > { %v7728_v51 = vpop.eup %7727  ;;  %v6139_v60 = vxor.u32 2147483648, %v11069_v58  ;;  %v6142_v3 = vxor.u32 2147483648, %v11064_v62  ;;  %v5819_v13 = vsel %vm11047_vm14, 0, %v5817_v24  ;;  %v6244_v23 = vsel %vm6242_vm1, %v7722_v59, %v6243_v53 }
 0x6bd   : > { %v7730_v1 = vpop.eup %7729  ;;  %v6247_v26 = vsel %vm6245_vm0, %v6246_v43, %v7724_v46  ;;  %v5927_v10 = vadd.s32 3, %v5923_v32  ;;  %vm6453_vm8 = vcmp.eq.s32.totalorder %v6448_v9, 2  ;;  %v6035_v29 = vxor.u32 2147483648, %v7728_v51 }
 0x6be   : > { %v7732_v40 = vpop.eup %7731  ;;  %v6454_v4 = vxor.u32 2147483648, %v7730_v1  ;;  %v6038_v48 = vxor.u32 2147483648, %v7726_v16  ;;  %vm6450_vm7 = vcmp.eq.s32.totalorder %v6448_v9, 0  ;;  %v6032_v21 = vand.u32 3, %v6031_v31 }
 0x6bf   : > { %v7734_v19 = vpop.eup %7733  ;;  %v6451_v42 = vxor.u32 2147483648, %v7732_v40  ;;  %v5823_v50 = vadd.s32 3, %v5819_v13  ;;  %vm6449_vm13 = vcmp.lt.s32.totalorder %v6448_v9, 2  ;;  %v6248_v57 = vsel %vm6241_vm10, %v6244_v23, %v6247_v26 }
 0x6c0   : > { %v7736_v35 = vpop.eup %7735  ;;  %v6455_v44 = vsel %vm6453_vm8, %v6454_v4, %v7732_v40  ;;  %vm6138_vm15 = vcmp.eq.s32.totalorder %v6136_v34, 0  ;;  %vm6141_vm2 = vcmp.eq.s32.totalorder %v6136_v34, 2  ;;  %v5928_v41 = vand.u32 3, %v5927_v10 }
 0x6c1   : > { %v7738_v7 = vpop.eup %7737  ;;  %v6452_v27 = vsel %vm6450_vm7, %v7730_v1, %v6451_v42  ;;  %v6140_v14 = vsel %vm6138_vm15, %v11064_v62, %v6139_v60  ;;  %v6143_v33 = vsel %vm6141_vm2, %v6142_v3, %v11069_v58  ;;  %v5931_v49 = vxor.u32 2147483648, %v7736_v35 }
 0x6c2   : > { %v7740_v30 = vpop.eup %7739  ;;  %v6456_v5 = vsel %vm6449_vm13, %v6452_v27, %v6455_v44  ;;  %v5934_v37 = vxor.u32 2147483648, %v7734_v19  ;;  %vm6137_vm11 = vcmp.lt.s32.totalorder %v6136_v34, 2  ;;  %vm6034_vm14 = vcmp.eq.s32.totalorder %v6032_v21, 0 }
 0x6c3   : > { %v6457_v47 = vsel %vm6446_vm4, nan, %v6456_v5  ;;  %vm6037_vm9 = vcmp.eq.s32.totalorder %v6032_v21, 2  ;;  %v5824_v18 = vand.u32 3, %v5823_v50  ;;  %v6036_v12 = vsel %vm6034_vm14, %v7726_v16, %v6035_v29 }
 0x6c4   : > { %7466 = vmatpush3.msra.mxu0 %v6457_v47  ;;  %v6039_v36 = vsel %vm6037_vm9, %v6038_v48, %v7728_v51  ;;  %v5827_v61 = vxor.u32 2147483648, %v7740_v30  ;;  %v5830_v62 = vxor.u32 2147483648, %v7738_v7  ;;  %vm6238_vm6 = vweird.f32 %v10661_v52 }
 0x6c5   : > { %7467 = vmatprep.subr.mxu0 %v11302_v25  ;;  %v6144_v2 = vsel %vm6137_vm11, %v6140_v14, %v6143_v33  ;;  %vm5930_vm3 = vcmp.eq.s32.totalorder %v5928_v41, 0  ;;  %vm5933_vm4 = vcmp.eq.s32.totalorder %v5928_v41, 2  ;;  %v6249_v58 = vsel %vm6238_vm6, nan, %v6248_v57 }
 0x6c6   : > { %7468 = vmatpush3.msra.mxu0 %v6353_v20  ;;  %vm6033_vm5 = vcmp.lt.s32.totalorder %v6032_v21, 2  ;;  %v5932_v59 = vsel %vm5930_vm3, %v7734_v19, %v5931_v49  ;;  %v5935_v15 = vsel %vm5933_vm4, %v5934_v37, %v7736_v35  ;;  %vm6134_vm10 = vweird.f32 %v10354_v39 }
 0x6c7   : > { %7469 = vmatprep.subr.mxu0 %v11302_v25  ;;  %v6040_v17 = vsel %vm6033_vm5, %v6036_v12, %v6039_v36  ;;  %vm5826_vm1 = vcmp.eq.s32.totalorder %v5824_v18, 0  ;;  %vm5829_vm0 = vcmp.eq.s32.totalorder %v5824_v18, 2  ;;  %v6145_v56 = vsel %vm6134_vm10, nan, %v6144_v2 }
 0x6c8   : > { %7470 = vmatpush3.msra.mxu0 %v6249_v58  ;;  %vm5929_vm8 = vcmp.lt.s32.totalorder %v5928_v41, 2  ;;  %v5828_v52 = vsel %vm5826_vm1, %v7738_v7, %v5827_v61  ;;  %v5831_v54 = vsel %vm5829_vm0, %v5830_v62, %v7740_v30  ;;  %vm6030_vm7 = vweird.f32 %v10411_v55  ;;  %v6562_v55 = vld [vmem:[%s11161_s7] sm:$0x1] }
 0x6c9   : > { %7471 = vmatprep.subr.mxu0 %v11302_v25  ;;  %v5936_v63 = vsel %vm5929_vm8, %v5932_v59, %v5935_v15  ;;  %v6041_v46 = vsel %vm6030_vm7, nan, %v6040_v17  ;;  %vm5825_vm13 = vcmp.lt.s32.totalorder %v5824_v18, 2  ;;  %vm5926_vm15 = vweird.f32 %v10347_v45 }
 0x6ca   : > { %7472 = vmatpush3.msra.mxu0 %v6145_v56  ;;  %v5832_v39 = vsel %vm5825_vm13, %v5828_v52, %v5831_v54  ;;  %v5937_v8 = vsel %vm5926_vm15, nan, %v5936_v63  ;;  %vm5822_vm2 = vweird.f32 %v10350_v38  ;;  %v6571_v45 = vsub.s32 0, %v11312_v0 }
 0x6cb   : > { %7473 = vmatprep.subr.mxu0 %v11302_v25  ;;  %v5833_v6 = vsel %vm5822_vm2, nan, %v5832_v39 }
 0x6cc   : > { %7474 = vmatpush3.msra.mxu0 %v6041_v46  ;;  %v6572_v22 = vrot.slane %v6567_v28, %v6571_v45 }
 0x6cd   : > { %7475 = vmatprep.subr.mxu0 %v11302_v25 }
 0x6ce   : > { %7476 = vmatpush3.msra.mxu0 %v5937_v8 }
 0x6cf   : > { %7477 = vmatprep.subr.mxu0 %v11302_v25 }
 0x6d0   : > { %7478 = vmatpush3.msra.mxu0 %v5833_v6 }
 0x6d1   : > { %7480 = vmatmul.mubr.msk.f32.vlgmr.msra.gmra.mxu0 %vm4581_vm12, %v6562_v55 }
 0x791   : > { %v6642_v38 = vpop.f32.mrf.mxu0 }
 0x792   : > { %v6643_v11 = vadd.f32 %v6642_v38, %v6572_v22 }
 0x793   : > { %v7481_v25 = vpop.f32.mrf.mxu0 }
 0x794   : > { %6646 = vst [vmem:[%s324_s29] sm:$0x1] %v6643_v11 }
 0x795   : > { %7754 = shalt.err (!%p7751_p3)
}
 0x796   : > { %s7755_s25 = scalar_lea.hbm %s11119_s17, 16  ;;  %s7759_s28 = scalar_lea.hbm %s11163_s9, 64 }
 0x797   : > { %p7756_p4 = scmp.ne.s32.totalorder %s11119_s17, %s7755_s25  ;;  %p7760_p9 = scmp.lt.s32.totalorder %s11119_s17, %s11163_s9 }
 0x798   : > { %p7761_p10 = scmp.lt.s32.totalorder %s7759_s28, %s7755_s25 }
 0x799   : > { %p7757_p7 = pnand %p7756_p4, %p7905_p5 }
 0x79a   : > { %p7762_p11 = por %p7761_p10, %p7760_p9 }
 0x79b   : > { %p7758_p8 = pneg %p7757_p7 }
 0x79d   : > { %p7763_p12 = pnand %p7762_p11, %p7758_p8 }
 0x79f   : > { %7766 = shalt.err (!%p7763_p12)
}
 0x7a0   : > { %7586 = dma.vmem_to_hbm [thread:$0]  (%p7905_p5), %s6661_s30, 16, %s11119_s17, %s6648_s18  }
 0x7a1 PF: > { %p7592_p13 = scmp.ge.s32.totalorder %s7801_s14, 2  ;;  %s6672_s15 = sand.u32 1, %s7789_s11  }
 0x7a2   : > { %s6673_s22 = scalar_lea.sflag [#allocation4], %s6672_s15 }
 0x7a3   : > { %p7589_p0 = pnand %p7592_p13, %p7909_p6 }
 0x7a5   : > { %p7590_p1 = pneg %p7589_p0 }
 0x7a7   : > { %7784 = dma.done.wait (%p7590_p1), %s6673_s22, 16  }
 0x7a8   : > { %7786 = vsyncadd (%p7590_p1), %s6673_s22, 4294967280  ;;  %p21_p2 = scmp.ge.s32.totalorder %s7892_s16, 6   ;;  %s11313_s11 = smov %s7793_s12 }
 0x7a9   : > { %s11314_s12 = smov %s7797_s13  ;;  %s11315_s13 = smov %s7903_s19 }
 0x7aa   : > { %s11316_s14 = smov %s7892_s16  ;;  %23 = sbr.rel (!%p21_p2) target bundleno = 6 (0x6), region = 93 }
 0x7af   :  { %6677 = vsyncpa [#allocation4], 1 }
 0x7b0   :  { %6679 = vsyncpa [#allocation4 + $0x1], 1 }

</bundles_post_ra>
